<compile_context>
chip_gen: v5e
topology: v5e:2x2
jax: 0.10.0
libtpu: 0.0.40
codegen_flags: <defaults>
</compile_context>

<pallas_src>
import jax
import jax.numpy as jnp
import numpy as np
from jax.experimental import pallas as pl
from jax.experimental.pallas import tpu as pltpu

# ----------------------------- configuration --------------------------------
B, T = 1, 2            # batch, video frames
CIN = 3                # input image channels
H = W = 32             # input spatial size
L = 8                  # text sequence length
VOCAB = 64             # synthetic vocab
D = 32                 # text hidden dim
DK = 32                # fusion attention dim
C1, C2, C3, C4 = 16, 32, 64, 128   # backbone stage channels (strides 4/8/16/32)
PATCH = 4
NUM_CLASSES = 2


# ------------------- trace-time (numpy) static operators ---------------------
def _np_interp_matrix(out_size, in_size):
    """1-D bilinear (align_corners=True) interpolation matrix [out, in]."""
    if in_size == 1:
        return np.ones((out_size, 1), np.float32)
    src = np.arange(out_size, dtype=np.float64) * (in_size - 1) / (out_size - 1)
    lo = np.clip(np.floor(src).astype(np.int64), 0, in_size - 2)
    frac = src - lo
    m = np.zeros((out_size, in_size), np.float64)
    idx = np.arange(out_size)
    m[idx, lo] += 1.0 - frac
    m[idx, lo + 1] += frac
    return m.astype(np.float32)


def _np_merge_select(h, w):
    """S[p, j, i] = 1 iff token i of an h*w grid feeds 2x2-merged token j at
    intra-block position p = 2*(r%2) + (c%2)."""
    ho, wo = h // 2, w // 2
    s = np.zeros((4, ho * wo, h * w), np.float32)
    for r in range(h):
        for c in range(w):
            p = (r % 2) * 2 + (c % 2)
            j = (r // 2) * wo + (c // 2)
            s[p, j, r * w + c] = 1.0
    return s


def _np_up2_select(h, w):
    """U[j, i] = 1 iff output token j of the 2h*2w grid copies input token i
    (nearest-neighbour 2x upsample as a matmul)."""
    u = np.zeros((4 * h * w, h * w), np.float32)
    for r in range(2 * h):
        for c in range(2 * w):
            u[r * (2 * w) + c, (r // 2) * w + (c // 2)] = 1.0
    return u


# ----------------------------- constant slab ----------------------------------
def _pack_slab(entries):
    """Pack a list of (name, 2-D array) into one [R, 128] f32 slab.

    Each entry is padded to (ceil(rows/8)*8, 128) so every static in-kernel
    view starts on an (8,128) tile boundary.  Returns (slab, layout) where
    layout[name] = (row_offset, rows, cols).
    """
    layout = {}
    blocks = []
    off = 0
    for name, arr in entries:
        arr = jnp.asarray(arr, jnp.float32)
        r, c = arr.shape
        assert c <= 128, (name, arr.shape)
        rp = ((r + 7) // 8) * 8
        blocks.append(jnp.pad(arr, ((0, rp - r), (0, 128 - c))))
        layout[name] = (off, r, c)
        off += rp
    return jnp.concatenate(blocks, axis=0), layout


# ----------------------------- the fused kernel -------------------------------
def _make_kernel(layout):
    """Build the megakernel closed over the static slab layout (Python ints)."""

    def kernel(lang_ref, maskb_ref, patch_ref, slab_ref, rt_ref, out_ref):
        f32 = jnp.float32

        def view(name):
            off, r, c = layout[name]
            return slab_ref[off:off + r, :c]

        lang = lang_ref[0]           # [L, D]   (frame-invariant, computed outside)
        mask_bias = maskb_ref[0]     # [1, L]   additive: 0 for kept, -1e30 masked
        x0 = patch_ref[0]            # [T*N1, PDIM]  frames stacked on the token axis

        # ------ masked language->vision cross-attention (PWAM-style) ----------
        def fuse(vis, stage):
            # 1/sqrt(DK) is folded into the q weights at trace time.
            q = jnp.dot(vis, view(f"f{stage}_q"), preferred_element_type=f32)
            k = jnp.dot(lang, view(f"f{stage}_k"), preferred_element_type=f32)
            v = jnp.dot(lang, view(f"f{stage}_v"), preferred_element_type=f32)
            s = jax.lax.dot_general(q, k, (((1,), (1,)), ((), ())),
                                    preferred_element_type=f32) + mask_bias
            m = jnp.max(s, axis=-1, keepdims=True)
            p = jnp.exp(s - m)
            denom = jnp.sum(p, axis=-1, keepdims=True)
            # Deferred softmax normalization: one approx reciprocal (EUP slot).
            attn = jnp.dot(p, v, preferred_element_type=f32)
            attn = attn * pl.reciprocal(denom, approx=True)
            return vis + attn

        # ------ 2x2 patch merge (Swin downsample): four block-diag gathers,
        # lane-concat, then ONE K=4*cin matmul against the full merge weight.
        def merge(x, stage):
            parts = [jnp.dot(view(f"s{stage}_{p_idx}"), x,
                             preferred_element_type=f32) for p_idx in range(4)]
            g = jnp.concatenate(parts, axis=-1)          # [N_out, 4*cin]
            return (jnp.dot(g, view(f"pm{stage}_w"), preferred_element_type=f32)
                    + view(f"pm{stage}_b"))

        # ------ decode stage: nearest up2 (selection matmul) + concat + 1x1
        # conv fused via split weight rows (no concat materialization).
        def dec(top, skip, stage):
            up = jnp.dot(view(f"u_d{stage}"), top, preferred_element_type=f32)
            y = (jnp.dot(up, view(f"dec{stage}_wt"), preferred_element_type=f32)
                 + jnp.dot(skip, view(f"dec{stage}_ws"), preferred_element_type=f32)
                 + view(f"dec{stage}_b"))
            return jnp.maximum(y, 0.0)

        # ---------------- backbone --------------------------------------------
        v1 = jnp.dot(x0, view("pe_w"), preferred_element_type=f32) + view("pe_b")
        x1 = fuse(v1, 1)                                   # [T*N1, C1]
        x2 = fuse(merge(x1, 2), 2)                         # [T*N2, C2]
        x3 = fuse(merge(x2, 3), 3)                         # [T*N3, C3]
        x4 = fuse(merge(x3, 4), 4)                         # [T*N4, C4]

        # ---------------- decode head ------------------------------------------
        y = dec(x4, x3, 3)                                 # [T*N3, C3]
        y = dec(y, x2, 2)                                  # [T*N2, C2]
        y = dec(y, x1, 1)                                  # [T*N1, C1]

        # ------ cls 1x1 conv + bilinear (align_corners) resize, lane-dense ----
        logits = jnp.dot(y, view("cls_w"), preferred_element_type=f32) + view("cls_b")
        # Every column of rt sums to exactly 1 (bilinear rows), so applying the
        # class bias before the resize is exact.  Contracting dim 0 lets Mosaic
        # fold the transpose into the MXU operand feed (no XLU transpose).
        out = jax.lax.dot_general(logits, rt_ref[...], (((0,), (0,)), ((), ())),
                                  preferred_element_type=f32)   # [ncls, T*H*W]
        out_ref[0] = out.astype(out_ref.dtype)

    return kernel


# ----------------------------- full forward ----------------------------------
def lavt_forward(x, text, l_mask, params):
    """Mirrors _LAVTVideoSimpleDecode.forward (lazy_pred=False, seg_last=False).

    x:      [B, T, CIN, H, W]  float32
    text:   [B, L]             int32 token ids
    l_mask: [B, L]             float32 {0,1} attention mask
    returns [B, T, NUM_CLASSES, H, W] float32
    """
    b, t, cin, h, w = x.shape
    h1, w1 = h // PATCH, w // PATCH
    n1 = h1 * w1
    pdim = cin * PATCH * PATCH
    ntok = t * n1

    # --- frame-invariant text encoder + mask bias, hoisted out of the kernel.
    emb = jnp.take(params["tok_emb"], text, axis=0)                   # [B, L, D]
    lang = emb @ params["txt_w"] + params["txt_b"]                    # [B, L, D]
    mask_bias = ((l_mask.astype(jnp.float32) - 1.0) * 1e30)[:, None, :]  # [B,1,L]

    # --- layout prep: permute(0,2,1,3,4) + frame flatten collapses to a
    # frame-major token stacking; patches feed the in-kernel patch-embed matmul.
    patches = x.reshape(b, t, cin, h1, PATCH, w1, PATCH)
    patches = patches.transpose(0, 1, 3, 5, 2, 4, 6).reshape(b, ntok, pdim)

    # --- static operators, block-diagonal over the T frames stacked on tokens.
    eye_t = np.eye(t, dtype=np.float32)
    s2 = _np_merge_select(h1, w1)
    s3 = _np_merge_select(h1 // 2, w1 // 2)
    s4 = _np_merge_select(h1 // 4, w1 // 4)
    u3 = _np_up2_select(h1 // 8, w1 // 8)
    u2 = _np_up2_select(h1 // 4, w1 // 4)
    u1 = _np_up2_select(h1 // 2, w1 // 2)
    rt_frame = np.kron(_np_interp_matrix(h, h1), _np_interp_matrix(w, w1)).T
    rt = jnp.asarray(np.ascontiguousarray(np.kron(eye_t, rt_frame)))  # [T*N1, T*H*W]

    # --- pack every other constant into one [R, 128] slab (one DMA).
    scale = 1.0 / float(DK) ** 0.5

    def r2(v):
        return v.reshape(1, -1)

    entries = [("pe_w", params["pe_w"]), ("pe_b", r2(params["pe_b"]))]
    for i in (1, 2, 3, 4):
        entries += [(f"f{i}_q", params[f"f{i}_q"] * scale),     # scale folded in
                    (f"f{i}_k", params[f"f{i}_k"]),
                    (f"f{i}_v", params[f"f{i}_v"])]
    for i, sel in ((2, s2), (3, s3), (4, s4)):
        for p_idx in range(4):
            entries.append((f"s{i}_{p_idx}", np.kron(eye_t, sel[p_idx])))
        entries += [(f"pm{i}_w", params[f"pm{i}_w"]),
                    (f"pm{i}_b", r2(params[f"pm{i}_b"]))]
    for i, u, ctop in ((3, u3, C4), (2, u2, C3), (1, u1, C2)):
        entries += [(f"u_d{i}", np.kron(eye_t, u)),
                    (f"dec{i}_wt", params[f"dec{i}_w"][:ctop]),
                    (f"dec{i}_ws", params[f"dec{i}_w"][ctop:]),
                    (f"dec{i}_b", r2(params[f"dec{i}_b"]))]
    entries += [("cls_w", params["cls_w"]), ("cls_b", r2(params["cls_b"]))]

    slab, layout = _pack_slab(entries)
    kernel = _make_kernel(layout)

    out = pl.pallas_call(
        kernel,
        out_shape=jax.ShapeDtypeStruct((b, NUM_CLASSES, t * h * w), jnp.float32),
        grid=(b,),
        in_specs=[
            pl.BlockSpec((1,) + tuple(lang.shape[1:]), lambda i: (i, 0, 0)),
            pl.BlockSpec((1,) + tuple(mask_bias.shape[1:]), lambda i: (i, 0, 0)),
            pl.BlockSpec((1, ntok, pdim), lambda i: (i, 0, 0)),
            pl.BlockSpec(tuple(slab.shape), lambda i: (0, 0)),
            pl.BlockSpec(tuple(rt.shape), lambda i: (0, 0)),
        ],
        out_specs=pl.BlockSpec((1, NUM_CLASSES, t * h * w), lambda i: (i, 0, 0)),
        compiler_params=pltpu.CompilerParams(dimension_semantics=("parallel",)),
    )(lang, mask_bias, patches, slab, rt)

    # [B, ncls, T, H*W] -> [B, T, ncls, H, W]  (pure layout plumbing in XLA)
    out = out.reshape(b, NUM_CLASSES, t, h * w).transpose(0, 2, 1, 3)
    return out.reshape(b, t, NUM_CLASSES, h, w)


# ----------------------------- pure-JAX reference -----------------------------
def reference_forward(x, text, l_mask, params):
    """No-Pallas reference implementing the same math (for a sanity check)."""
    b, t, cin, h, w = x.shape
    nf = b * t
    h1, w1 = h // PATCH, w // PATCH

    frames = x.reshape(nf, cin, h, w)
    patches = frames.reshape(nf, cin, h1, PATCH, w1, PATCH)
    patches = patches.transpose(0, 2, 4, 1, 3, 5).reshape(
        nf, h1 * w1, cin * PATCH * PATCH)

    emb = jnp.take(params["tok_emb"], text, axis=0)                 # [B, L, D]
    lang = emb @ params["txt_w"] + params["txt_b"]
    lang = jnp.repeat(lang, t, axis=0)                              # [NF, L, D]
    mask = jnp.repeat(l_mask[:, None, :], t, axis=0)                # [NF, 1, L]

    def fuse(vis, wq, wk, wv):
        q = vis @ wq
        k = lang @ wk
        v = lang @ wv
        s = jnp.einsum("bnd,bld->bnl", q, k) / (wq.shape[1] ** 0.5)
        s = jnp.where(mask > 0.0, s, -1e30)
        p = jax.nn.softmax(s, axis=-1)
        return vis + jnp.einsum("bnl,blc->bnc", p, v)

    def merge(xtok, hg, wg, wmat, bvec):
        c = xtok.shape[-1]
        z = xtok.reshape(nf, hg // 2, 2, wg // 2, 2, c)
        z = z.transpose(0, 1, 3, 2, 4, 5).reshape(nf, (hg // 2) * (wg // 2), 4 * c)
        return z @ wmat + bvec

    def up2(xtok, hg, wg):
        c = xtok.shape[-1]
        z = xtok.reshape(nf, hg, wg, c)
        z = jnp.repeat(jnp.repeat(z, 2, axis=1), 2, axis=2)
        return z.reshape(nf, 4 * hg * wg, c)

    v1 = patches @ params["pe_w"] + params["pe_b"]
    x1 = fuse(v1, params["f1_q"], params["f1_k"], params["f1_v"])
    v2 = merge(x1, h1, w1, params["pm2_w"], params["pm2_b"])
    x2 = fuse(v2, params["f2_q"], params["f2_k"], params["f2_v"])
    v3 = merge(x2, h1 // 2, w1 // 2, params["pm3_w"], params["pm3_b"])
    x3 = fuse(v3, params["f3_q"], params["f3_k"], params["f3_v"])
    v4 = merge(x3, h1 // 4, w1 // 4, params["pm4_w"], params["pm4_b"])
    x4 = fuse(v4, params["f4_q"], params["f4_k"], params["f4_v"])

    y = jnp.concatenate([up2(x4, h1 // 8, w1 // 8), x3], axis=-1)
    y = jnp.maximum(y @ params["dec3_w"] + params["dec3_b"], 0.0)
    y = jnp.concatenate([up2(y, h1 // 4, w1 // 4), x2], axis=-1)
    y = jnp.maximum(y @ params["dec2_w"] + params["dec2_b"], 0.0)
    y = jnp.concatenate([up2(y, h1 // 2, w1 // 2), x1], axis=-1)
    y = jnp.maximum(y @ params["dec1_w"] + params["dec1_b"], 0.0)
    logits = y @ params["cls_w"] + params["cls_b"]                  # [NF, N1, ncls]

    rmat = jnp.asarray(
        np.kron(_np_interp_matrix(h, h1), _np_interp_matrix(w, w1)))  # [H*W, N1]
    out = jnp.einsum("on,bnc->bco", rmat, logits)                   # [NF, ncls, H*W]
    return out.reshape(b, t, NUM_CLASSES, h, w)


# ----------------------------- parameters ------------------------------------
def init_params(key):
    ks = iter(jax.random.split(key, 40))

    def wrand(shape, scale=0.05):
        return jax.random.normal(next(ks), shape, jnp.float32) * scale

    def zeros(shape):
        return jnp.zeros(shape, jnp.float32)

    return {
        # synthetic text encoder
        "tok_emb": wrand((VOCAB, D), 0.1),
        "txt_w": wrand((D, D)), "txt_b": zeros((D,)),
        # patch embed
        "pe_w": wrand((CIN * PATCH * PATCH, C1)), "pe_b": zeros((C1,)),
        # fusion stages
        "f1_q": wrand((C1, DK)), "f1_k": wrand((D, DK)), "f1_v": wrand((D, C1)),
        "f2_q": wrand((C2, DK)), "f2_k": wrand((D, DK)), "f2_v": wrand((D, C2)),
        "f3_q": wrand((C3, DK)), "f3_k": wrand((D, DK)), "f3_v": wrand((D, C3)),
        "f4_q": wrand((C4, DK)), "f4_k": wrand((D, DK)), "f4_v": wrand((D, C4)),
        # patch-merge downsamples
        "pm2_w": wrand((4 * C1, C2)), "pm2_b": zeros((C2,)),
        "pm3_w": wrand((4 * C2, C3)), "pm3_b": zeros((C3,)),
        "pm4_w": wrand((4 * C3, C4)), "pm4_b": zeros((C4,)),
        # simple decode head
        "dec3_w": wrand((C4 + C3, C3)), "dec3_b": zeros((C3,)),
        "dec2_w": wrand((C3 + C2, C2)), "dec2_b": zeros((C2,)),
        "dec1_w": wrand((C2 + C1, C1)), "dec1_b": zeros((C1,)),
        "cls_w": wrand((C1, NUM_CLASSES)), "cls_b": zeros((NUM_CLASSES,)),
    }


# ----------------------------- main -------------------------------------------
if __name__ == "__main__":
    key = jax.random.PRNGKey(0)
    k_x, k_txt, k_p = jax.random.split(key, 3)

    x = jax.random.normal(k_x, (B, T, CIN, H, W), jnp.float32)
    text = jax.random.randint(k_txt, (B, L), 0, VOCAB, jnp.int32)
    l_mask = jnp.concatenate(
        [jnp.ones((B, L - 2), jnp.float32), jnp.zeros((B, 2), jnp.float32)], axis=1)

    params = init_params(k_p)

    fwd = jax.jit(lavt_forward)
    out = jax.block_until_ready(fwd(x, text, l_mask, params))

    assert out.shape == (B, T, NUM_CLASSES, H, W), out.shape
    assert bool(jnp.all(jnp.isfinite(out)))

    # Cross-check the fused kernel against the pure-JAX reference (the only
    # intentional numerical deviation is the approx reciprocal in softmax).
    ref = jax.block_until_ready(jax.jit(reference_forward)(x, text, l_mask, params))
    rel_err = float(jnp.max(jnp.abs(out - ref)) / (jnp.max(jnp.abs(ref)) + 1e-12))
    assert rel_err < 5e-2, f"kernel/reference mismatch: rel_err={rel_err}"

    print("KERNEL_OK")
</pallas_src>

<mosaic_0001>
module attributes {stable_mosaic.version = 11 : i64} {
  func.func @kernel(%arg0: i32, %arg1: memref<1x8x32xf32, #tpu.memory_space<vmem>>, %arg2: memref<1x1x8xf32, #tpu.memory_space<vmem>>, %arg3: memref<1x128x48xf32, #tpu.memory_space<vmem>>, %arg4: memref<1768x128xf32, #tpu.memory_space<vmem>>, %arg5: memref<128x2048xf32, #tpu.memory_space<vmem>>, %arg6: memref<1x2x2048xf32, #tpu.memory_space<vmem>>) attributes {dimension_semantics = [#tpu.dimension_semantics<parallel>], iteration_bounds = array<i64: 1>, scalar_prefetch = 0 : i64, scratch_operands = 0 : i64, tpu.core_type = #tpu.core_type<tc>, window_params = [{transform_indices = @transform_0, window_bounds = array<i64: 1, 8, 32>}, {transform_indices = @transform_1, window_bounds = array<i64: 1, 1, 8>}, {transform_indices = @transform_2, window_bounds = array<i64: 1, 128, 48>}, {pipeline_mode = #tpu.pipeline_mode<synchronous>, transform_indices = @transform_3, window_bounds = array<i64: 1768, 128>}, {pipeline_mode = #tpu.pipeline_mode<synchronous>, transform_indices = @transform_4, window_bounds = array<i64: 128, 2048>}, {transform_indices = @transform_5, window_bounds = array<i64: 1, 2, 2048>}]} {
    %c0 = arith.constant 0 : index
    %c0_0 = arith.constant 0 : index
    %c0_1 = arith.constant 0 : index
    %0 = vector.load %arg1[%c0, %c0_0, %c0_1] : memref<1x8x32xf32, #tpu.memory_space<vmem>>, vector<1x8x32xf32>
    %1 = vector.shape_cast %0 : vector<1x8x32xf32> to vector<8x32xf32>
    %c0_2 = arith.constant 0 : index
    %c0_3 = arith.constant 0 : index
    %c0_4 = arith.constant 0 : index
    %2 = vector.load %arg2[%c0_2, %c0_3, %c0_4] : memref<1x1x8xf32, #tpu.memory_space<vmem>>, vector<1x1x8xf32>
    %3 = vector.shape_cast %2 : vector<1x1x8xf32> to vector<1x8xf32>
    %c0_5 = arith.constant 0 : index
    %c0_6 = arith.constant 0 : index
    %c0_7 = arith.constant 0 : index
    %4 = vector.load %arg3[%c0_5, %c0_6, %c0_7] : memref<1x128x48xf32, #tpu.memory_space<vmem>>, vector<1x128x48xf32>
    %5 = vector.shape_cast %4 : vector<1x128x48xf32> to vector<128x48xf32>
    %c0_8 = arith.constant 0 : index
    %c0_9 = arith.constant 0 : index
    %6 = vector.load %arg4[%c0_8, %c0_9] : memref<1768x128xf32, #tpu.memory_space<vmem>>, vector<48x16xf32>
    %cst = arith.constant dense<0.000000e+00> : vector<128x16xf32>
    %7 = tpu.matmul %5, %6, %cst {dimension_numbers = #tpu.dot_dimension_numbers<[1], [0], [0], [1], [0, 0, 1, 1], [], []>} : vector<128x48xf32>, vector<48x16xf32>, vector<128x16xf32> -> vector<128x16xf32>
    %c48 = arith.constant 48 : index
    %c0_10 = arith.constant 0 : index
    %8 = vector.load %arg4[%c48, %c0_10] : memref<1768x128xf32, #tpu.memory_space<vmem>>, vector<1x16xf32>
    %9 = vector.broadcast %8 : vector<1x16xf32> to vector<128x16xf32>
    %10 = arith.addf %7, %9 : vector<128x16xf32>
    %c56 = arith.constant 56 : index
    %c0_11 = arith.constant 0 : index
    %11 = vector.load %arg4[%c56, %c0_11] : memref<1768x128xf32, #tpu.memory_space<vmem>>, vector<16x32xf32>
    %cst_12 = arith.constant dense<0.000000e+00> : vector<128x32xf32>
    %12 = tpu.matmul %10, %11, %cst_12 {dimension_numbers = #tpu.dot_dimension_numbers<[1], [0], [0], [1], [0, 0, 1, 1], [], []>} : vector<128x16xf32>, vector<16x32xf32>, vector<128x32xf32> -> vector<128x32xf32>
    %c72 = arith.constant 72 : index
    %c0_13 = arith.constant 0 : index
    %13 = vector.load %arg4[%c72, %c0_13] : memref<1768x128xf32, #tpu.memory_space<vmem>>, vector<32x32xf32>
    %cst_14 = arith.constant dense<0.000000e+00> : vector<8x32xf32>
    %14 = tpu.matmul %1, %13, %cst_14 {dimension_numbers = #tpu.dot_dimension_numbers<[1], [0], [0], [1], [0, 0, 1, 1], [], []>} : vector<8x32xf32>, vector<32x32xf32>, vector<8x32xf32> -> vector<8x32xf32>
    %c104 = arith.constant 104 : index
    %c0_15 = arith.constant 0 : index
    %15 = vector.load %arg4[%c104, %c0_15] : memref<1768x128xf32, #tpu.memory_space<vmem>>, vector<32x16xf32>
    %cst_16 = arith.constant dense<0.000000e+00> : vector<8x16xf32>
    %16 = tpu.matmul %1, %15, %cst_16 {dimension_numbers = #tpu.dot_dimension_numbers<[1], [0], [0], [1], [0, 0, 1, 1], [], []>} : vector<8x32xf32>, vector<32x16xf32>, vector<8x16xf32> -> vector<8x16xf32>
    %cst_17 = arith.constant dense<0.000000e+00> : vector<128x8xf32>
    %17 = tpu.matmul %12, %14, %cst_17 {dimension_numbers = #tpu.dot_dimension_numbers<[1], [1], [0], [0], [0, 0, 1, 0], [], []>} : vector<128x32xf32>, vector<8x32xf32>, vector<128x8xf32> -> vector<128x8xf32>
    %18 = vector.broadcast %3 : vector<1x8xf32> to vector<128x8xf32>
    %19 = arith.addf %17, %18 : vector<128x8xf32>
    %cst_18 = arith.constant dense<0xFF800000> : vector<128xf32>
    %20 = vector.multi_reduction <maximumf>, %19, %cst_18 [1] : vector<128x8xf32> to vector<128xf32>
    %21 = vector.shape_cast %20 : vector<128xf32> to vector<128x1xf32>
    %22 = vector.broadcast %21 : vector<128x1xf32> to vector<128x8xf32>
    %23 = arith.subf %19, %22 : vector<128x8xf32>
    %24 = math.exp %23 : vector<128x8xf32>
    %cst_19 = arith.constant dense<0.000000e+00> : vector<128xf32>
    %25 = vector.multi_reduction <add>, %24, %cst_19 [1] : vector<128x8xf32> to vector<128xf32>
    %26 = vector.shape_cast %25 : vector<128xf32> to vector<128x1xf32>
    %cst_20 = arith.constant dense<0.000000e+00> : vector<128x16xf32>
    %27 = tpu.matmul %24, %16, %cst_20 {dimension_numbers = #tpu.dot_dimension_numbers<[1], [0], [0], [1], [0, 0, 1, 1], [], []>} : vector<128x8xf32>, vector<8x16xf32>, vector<128x16xf32> -> vector<128x16xf32>
    %28 = tpu.reciprocal %26 {approx = true} : vector<128x1xf32> -> vector<128x1xf32>
    %29 = vector.broadcast %28 : vector<128x1xf32> to vector<128x16xf32>
    %30 = arith.mulf %27, %29 : vector<128x16xf32>
    %31 = arith.addf %10, %30 : vector<128x16xf32>
    %c552 = arith.constant 552 : index
    %c0_21 = arith.constant 0 : index
    %32 = vector.load %arg4[%c552, %c0_21] : memref<1768x128xf32, #tpu.memory_space<vmem>>, vector<32x128xf32>
    %cst_22 = arith.constant dense<0.000000e+00> : vector<32x16xf32>
    %33 = tpu.matmul %32, %31, %cst_22 {dimension_numbers = #tpu.dot_dimension_numbers<[1], [0], [0], [1], [0, 0, 1, 1], [], []>} : vector<32x128xf32>, vector<128x16xf32>, vector<32x16xf32> -> vector<32x16xf32>
    %c584 = arith.constant 584 : index
    %c0_23 = arith.constant 0 : index
    %34 = vector.load %arg4[%c584, %c0_23] : memref<1768x128xf32, #tpu.memory_space<vmem>>, vector<32x128xf32>
    %cst_24 = arith.constant dense<0.000000e+00> : vector<32x16xf32>
    %35 = tpu.matmul %34, %31, %cst_24 {dimension_numbers = #tpu.dot_dimension_numbers<[1], [0], [0], [1], [0, 0, 1, 1], [], []>} : vector<32x128xf32>, vector<128x16xf32>, vector<32x16xf32> -> vector<32x16xf32>
    %c616 = arith.constant 616 : index
    %c0_25 = arith.constant 0 : index
    %36 = vector.load %arg4[%c616, %c0_25] : memref<1768x128xf32, #tpu.memory_space<vmem>>, vector<32x128xf32>
    %cst_26 = arith.constant dense<0.000000e+00> : vector<32x16xf32>
    %37 = tpu.matmul %36, %31, %cst_26 {dimension_numbers = #tpu.dot_dimension_numbers<[1], [0], [0], [1], [0, 0, 1, 1], [], []>} : vector<32x128xf32>, vector<128x16xf32>, vector<32x16xf32> -> vector<32x16xf32>
    %c648 = arith.constant 648 : index
    %c0_27 = arith.constant 0 : index
    %38 = vector.load %arg4[%c648, %c0_27] : memref<1768x128xf32, #tpu.memory_space<vmem>>, vector<32x128xf32>
    %cst_28 = arith.constant dense<0.000000e+00> : vector<32x16xf32>
    %39 = tpu.matmul %38, %31, %cst_28 {dimension_numbers = #tpu.dot_dimension_numbers<[1], [0], [0], [1], [0, 0, 1, 1], [], []>} : vector<32x128xf32>, vector<128x16xf32>, vector<32x16xf32> -> vector<32x16xf32>
    %40 = tpu.concatenate %33, %35, %37, %39 in 1 : vector<32x16xf32>, vector<32x16xf32>, vector<32x16xf32>, vector<32x16xf32> -> vector<32x64xf32>
    %c680 = arith.constant 680 : index
    %c0_29 = arith.constant 0 : index
    %41 = vector.load %arg4[%c680, %c0_29] : memref<1768x128xf32, #tpu.memory_space<vmem>>, vector<64x32xf32>
    %cst_30 = arith.constant dense<0.000000e+00> : vector<32x32xf32>
    %42 = tpu.matmul %40, %41, %cst_30 {dimension_numbers = #tpu.dot_dimension_numbers<[1], [0], [0], [1], [0, 0, 1, 1], [], []>} : vector<32x64xf32>, vector<64x32xf32>, vector<32x32xf32> -> vector<32x32xf32>
    %c744 = arith.constant 744 : index
    %c0_31 = arith.constant 0 : index
    %43 = vector.load %arg4[%c744, %c0_31] : memref<1768x128xf32, #tpu.memory_space<vmem>>, vector<1x32xf32>
    %44 = vector.broadcast %43 : vector<1x32xf32> to vector<32x32xf32>
    %45 = arith.addf %42, %44 : vector<32x32xf32>
    %c136 = arith.constant 136 : index
    %c0_32 = arith.constant 0 : index
    %46 = vector.load %arg4[%c136, %c0_32] : memref<1768x128xf32, #tpu.memory_space<vmem>>, vector<32x32xf32>
    %cst_33 = arith.constant dense<0.000000e+00> : vector<32x32xf32>
    %47 = tpu.matmul %45, %46, %cst_33 {dimension_numbers = #tpu.dot_dimension_numbers<[1], [0], [0], [1], [0, 0, 1, 1], [], []>} : vector<32x32xf32>, vector<32x32xf32>, vector<32x32xf32> -> vector<32x32xf32>
    %c168 = arith.constant 168 : index
    %c0_34 = arith.constant 0 : index
    %48 = vector.load %arg4[%c168, %c0_34] : memref<1768x128xf32, #tpu.memory_space<vmem>>, vector<32x32xf32>
    %cst_35 = arith.constant dense<0.000000e+00> : vector<8x32xf32>
    %49 = tpu.matmul %1, %48, %cst_35 {dimension_numbers = #tpu.dot_dimension_numbers<[1], [0], [0], [1], [0, 0, 1, 1], [], []>} : vector<8x32xf32>, vector<32x32xf32>, vector<8x32xf32> -> vector<8x32xf32>
    %c200 = arith.constant 200 : index
    %c0_36 = arith.constant 0 : index
    %50 = vector.load %arg4[%c200, %c0_36] : memref<1768x128xf32, #tpu.memory_space<vmem>>, vector<32x32xf32>
    %cst_37 = arith.constant dense<0.000000e+00> : vector<8x32xf32>
    %51 = tpu.matmul %1, %50, %cst_37 {dimension_numbers = #tpu.dot_dimension_numbers<[1], [0], [0], [1], [0, 0, 1, 1], [], []>} : vector<8x32xf32>, vector<32x32xf32>, vector<8x32xf32> -> vector<8x32xf32>
    %cst_38 = arith.constant dense<0.000000e+00> : vector<32x8xf32>
    %52 = tpu.matmul %47, %49, %cst_38 {dimension_numbers = #tpu.dot_dimension_numbers<[1], [1], [0], [0], [0, 0, 1, 0], [], []>} : vector<32x32xf32>, vector<8x32xf32>, vector<32x8xf32> -> vector<32x8xf32>
    %53 = vector.broadcast %3 : vector<1x8xf32> to vector<32x8xf32>
    %54 = arith.addf %52, %53 : vector<32x8xf32>
    %cst_39 = arith.constant dense<0xFF800000> : vector<32xf32>
    %55 = vector.multi_reduction <maximumf>, %54, %cst_39 [1] : vector<32x8xf32> to vector<32xf32>
    %56 = vector.shape_cast %55 : vector<32xf32> to vector<32x1xf32>
    %57 = vector.broadcast %56 : vector<32x1xf32> to vector<32x8xf32>
    %58 = arith.subf %54, %57 : vector<32x8xf32>
    %59 = math.exp %58 : vector<32x8xf32>
    %cst_40 = arith.constant dense<0.000000e+00> : vector<32xf32>
    %60 = vector.multi_reduction <add>, %59, %cst_40 [1] : vector<32x8xf32> to vector<32xf32>
    %61 = vector.shape_cast %60 : vector<32xf32> to vector<32x1xf32>
    %cst_41 = arith.constant dense<0.000000e+00> : vector<32x32xf32>
    %62 = tpu.matmul %59, %51, %cst_41 {dimension_numbers = #tpu.dot_dimension_numbers<[1], [0], [0], [1], [0, 0, 1, 1], [], []>} : vector<32x8xf32>, vector<8x32xf32>, vector<32x32xf32> -> vector<32x32xf32>
    %63 = tpu.reciprocal %61 {approx = true} : vector<32x1xf32> -> vector<32x1xf32>
    %64 = vector.broadcast %63 : vector<32x1xf32> to vector<32x32xf32>
    %65 = arith.mulf %62, %64 : vector<32x32xf32>
    %66 = arith.addf %45, %65 : vector<32x32xf32>
    %c752 = arith.constant 752 : index
    %c0_42 = arith.constant 0 : index
    %67 = vector.load %arg4[%c752, %c0_42] : memref<1768x128xf32, #tpu.memory_space<vmem>>, vector<8x32xf32>
    %cst_43 = arith.constant dense<0.000000e+00> : vector<8x32xf32>
    %68 = tpu.matmul %67, %66, %cst_43 {dimension_numbers = #tpu.dot_dimension_numbers<[1], [0], [0], [1], [0, 0, 1, 1], [], []>} : vector<8x32xf32>, vector<32x32xf32>, vector<8x32xf32> -> vector<8x32xf32>
    %c760 = arith.constant 760 : index
    %c0_44 = arith.constant 0 : index
    %69 = vector.load %arg4[%c760, %c0_44] : memref<1768x128xf32, #tpu.memory_space<vmem>>, vector<8x32xf32>
    %cst_45 = arith.constant dense<0.000000e+00> : vector<8x32xf32>
    %70 = tpu.matmul %69, %66, %cst_45 {dimension_numbers = #tpu.dot_dimension_numbers<[1], [0], [0], [1], [0, 0, 1, 1], [], []>} : vector<8x32xf32>, vector<32x32xf32>, vector<8x32xf32> -> vector<8x32xf32>
    %c768 = arith.constant 768 : index
    %c0_46 = arith.constant 0 : index
    %71 = vector.load %arg4[%c768, %c0_46] : memref<1768x128xf32, #tpu.memory_space<vmem>>, vector<8x32xf32>
    %cst_47 = arith.constant dense<0.000000e+00> : vector<8x32xf32>
    %72 = tpu.matmul %71, %66, %cst_47 {dimension_numbers = #tpu.dot_dimension_numbers<[1], [0], [0], [1], [0, 0, 1, 1], [], []>} : vector<8x32xf32>, vector<32x32xf32>, vector<8x32xf32> -> vector<8x32xf32>
    %c776 = arith.constant 776 : index
    %c0_48 = arith.constant 0 : index
    %73 = vector.load %arg4[%c776, %c0_48] : memref<1768x128xf32, #tpu.memory_space<vmem>>, vector<8x32xf32>
    %cst_49 = arith.constant dense<0.000000e+00> : vector<8x32xf32>
    %74 = tpu.matmul %73, %66, %cst_49 {dimension_numbers = #tpu.dot_dimension_numbers<[1], [0], [0], [1], [0, 0, 1, 1], [], []>} : vector<8x32xf32>, vector<32x32xf32>, vector<8x32xf32> -> vector<8x32xf32>
    %75 = tpu.concatenate %68, %70, %72, %74 in 1 : vector<8x32xf32>, vector<8x32xf32>, vector<8x32xf32>, vector<8x32xf32> -> vector<8x128xf32>
    %c784 = arith.constant 784 : index
    %c0_50 = arith.constant 0 : index
    %76 = vector.load %arg4[%c784, %c0_50] : memref<1768x128xf32, #tpu.memory_space<vmem>>, vector<128x64xf32>
    %cst_51 = arith.constant dense<0.000000e+00> : vector<8x64xf32>
    %77 = tpu.matmul %75, %76, %cst_51 {dimension_numbers = #tpu.dot_dimension_numbers<[1], [0], [0], [1], [0, 0, 1, 1], [], []>} : vector<8x128xf32>, vector<128x64xf32>, vector<8x64xf32> -> vector<8x64xf32>
    %c912 = arith.constant 912 : index
    %c0_52 = arith.constant 0 : index
    %78 = vector.load %arg4[%c912, %c0_52] : memref<1768x128xf32, #tpu.memory_space<vmem>>, vector<1x64xf32>
    %79 = vector.broadcast %78 : vector<1x64xf32> to vector<8x64xf32>
    %80 = arith.addf %77, %79 : vector<8x64xf32>
    %c232 = arith.constant 232 : index
    %c0_53 = arith.constant 0 : index
    %81 = vector.load %arg4[%c232, %c0_53] : memref<1768x128xf32, #tpu.memory_space<vmem>>, vector<64x32xf32>
    %cst_54 = arith.constant dense<0.000000e+00> : vector<8x32xf32>
    %82 = tpu.matmul %80, %81, %cst_54 {dimension_numbers = #tpu.dot_dimension_numbers<[1], [0], [0], [1], [0, 0, 1, 1], [], []>} : vector<8x64xf32>, vector<64x32xf32>, vector<8x32xf32> -> vector<8x32xf32>
    %c296 = arith.constant 296 : index
    %c0_55 = arith.constant 0 : index
    %83 = vector.load %arg4[%c296, %c0_55] : memref<1768x128xf32, #tpu.memory_space<vmem>>, vector<32x32xf32>
    %cst_56 = arith.constant dense<0.000000e+00> : vector<8x32xf32>
    %84 = tpu.matmul %1, %83, %cst_56 {dimension_numbers = #tpu.dot_dimension_numbers<[1], [0], [0], [1], [0, 0, 1, 1], [], []>} : vector<8x32xf32>, vector<32x32xf32>, vector<8x32xf32> -> vector<8x32xf32>
    %c328 = arith.constant 328 : index
    %c0_57 = arith.constant 0 : index
    %85 = vector.load %arg4[%c328, %c0_57] : memref<1768x128xf32, #tpu.memory_space<vmem>>, vector<32x64xf32>
    %cst_58 = arith.constant dense<0.000000e+00> : vector<8x64xf32>
    %86 = tpu.matmul %1, %85, %cst_58 {dimension_numbers = #tpu.dot_dimension_numbers<[1], [0], [0], [1], [0, 0, 1, 1], [], []>} : vector<8x32xf32>, vector<32x64xf32>, vector<8x64xf32> -> vector<8x64xf32>
    %cst_59 = arith.constant dense<0.000000e+00> : vector<8x8xf32>
    %87 = tpu.matmul %82, %84, %cst_59 {dimension_numbers = #tpu.dot_dimension_numbers<[1], [1], [0], [0], [0, 0, 1, 0], [], []>} : vector<8x32xf32>, vector<8x32xf32>, vector<8x8xf32> -> vector<8x8xf32>
    %88 = vector.broadcast %3 : vector<1x8xf32> to vector<8x8xf32>
    %89 = arith.addf %87, %88 : vector<8x8xf32>
    %cst_60 = arith.constant dense<0xFF800000> : vector<8xf32>
    %90 = vector.multi_reduction <maximumf>, %89, %cst_60 [1] : vector<8x8xf32> to vector<8xf32>
    %91 = vector.shape_cast %90 : vector<8xf32> to vector<8x1xf32>
    %92 = vector.broadcast %91 : vector<8x1xf32> to vector<8x8xf32>
    %93 = arith.subf %89, %92 : vector<8x8xf32>
    %94 = math.exp %93 : vector<8x8xf32>
    %cst_61 = arith.constant dense<0.000000e+00> : vector<8xf32>
    %95 = vector.multi_reduction <add>, %94, %cst_61 [1] : vector<8x8xf32> to vector<8xf32>
    %96 = vector.shape_cast %95 : vector<8xf32> to vector<8x1xf32>
    %cst_62 = arith.constant dense<0.000000e+00> : vector<8x64xf32>
    %97 = tpu.matmul %94, %86, %cst_62 {dimension_numbers = #tpu.dot_dimension_numbers<[1], [0], [0], [1], [0, 0, 1, 1], [], []>} : vector<8x8xf32>, vector<8x64xf32>, vector<8x64xf32> -> vector<8x64xf32>
    %98 = tpu.reciprocal %96 {approx = true} : vector<8x1xf32> -> vector<8x1xf32>
    %99 = vector.broadcast %98 : vector<8x1xf32> to vector<8x64xf32>
    %100 = arith.mulf %97, %99 : vector<8x64xf32>
    %101 = arith.addf %80, %100 : vector<8x64xf32>
    %c920 = arith.constant 920 : index
    %c0_63 = arith.constant 0 : index
    %102 = vector.load %arg4[%c920, %c0_63] : memref<1768x128xf32, #tpu.memory_space<vmem>>, vector<2x8xf32>
    %cst_64 = arith.constant dense<0.000000e+00> : vector<2x64xf32>
    %103 = tpu.matmul %102, %101, %cst_64 {dimension_numbers = #tpu.dot_dimension_numbers<[1], [0], [0], [1], [0, 0, 1, 1], [], []>} : vector<2x8xf32>, vector<8x64xf32>, vector<2x64xf32> -> vector<2x64xf32>
    %c928 = arith.constant 928 : index
    %c0_65 = arith.constant 0 : index
    %104 = vector.load %arg4[%c928, %c0_65] : memref<1768x128xf32, #tpu.memory_space<vmem>>, vector<2x8xf32>
    %cst_66 = arith.constant dense<0.000000e+00> : vector<2x64xf32>
    %105 = tpu.matmul %104, %101, %cst_66 {dimension_numbers = #tpu.dot_dimension_numbers<[1], [0], [0], [1], [0, 0, 1, 1], [], []>} : vector<2x8xf32>, vector<8x64xf32>, vector<2x64xf32> -> vector<2x64xf32>
    %c936 = arith.constant 936 : index
    %c0_67 = arith.constant 0 : index
    %106 = vector.load %arg4[%c936, %c0_67] : memref<1768x128xf32, #tpu.memory_space<vmem>>, vector<2x8xf32>
    %cst_68 = arith.constant dense<0.000000e+00> : vector<2x64xf32>
    %107 = tpu.matmul %106, %101, %cst_68 {dimension_numbers = #tpu.dot_dimension_numbers<[1], [0], [0], [1], [0, 0, 1, 1], [], []>} : vector<2x8xf32>, vector<8x64xf32>, vector<2x64xf32> -> vector<2x64xf32>
    %c944 = arith.constant 944 : index
    %c0_69 = arith.constant 0 : index
    %108 = vector.load %arg4[%c944, %c0_69] : memref<1768x128xf32, #tpu.memory_space<vmem>>, vector<2x8xf32>
    %cst_70 = arith.constant dense<0.000000e+00> : vector<2x64xf32>
    %109 = tpu.matmul %108, %101, %cst_70 {dimension_numbers = #tpu.dot_dimension_numbers<[1], [0], [0], [1], [0, 0, 1, 1], [], []>} : vector<2x8xf32>, vector<8x64xf32>, vector<2x64xf32> -> vector<2x64xf32>
    %110 = tpu.concatenate %103, %105, %107, %109 in 1 : vector<2x64xf32>, vector<2x64xf32>, vector<2x64xf32>, vector<2x64xf32> -> vector<2x256xf32>
    %c952 = arith.constant 952 : index
    %c0_71 = arith.constant 0 : index
    %111 = vector.load %arg4[%c952, %c0_71] : memref<1768x128xf32, #tpu.memory_space<vmem>>, vector<256x128xf32>
    %cst_72 = arith.constant dense<0.000000e+00> : vector<2x128xf32>
    %112 = tpu.matmul %110, %111, %cst_72 {dimension_numbers = #tpu.dot_dimension_numbers<[1], [0], [0], [1], [0, 0, 1, 1], [], []>} : vector<2x256xf32>, vector<256x128xf32>, vector<2x128xf32> -> vector<2x128xf32>
    %c1208 = arith.constant 1208 : index
    %c0_73 = arith.constant 0 : index
    %113 = vector.load %arg4[%c1208, %c0_73] : memref<1768x128xf32, #tpu.memory_space<vmem>>, vector<1x128xf32>
    %114 = vector.broadcast %113 : vector<1x128xf32> to vector<2x128xf32>
    %115 = arith.addf %112, %114 : vector<2x128xf32>
    %c360 = arith.constant 360 : index
    %c0_74 = arith.constant 0 : index
    %116 = vector.load %arg4[%c360, %c0_74] : memref<1768x128xf32, #tpu.memory_space<vmem>>, vector<128x32xf32>
    %cst_75 = arith.constant dense<0.000000e+00> : vector<2x32xf32>
    %117 = tpu.matmul %115, %116, %cst_75 {dimension_numbers = #tpu.dot_dimension_numbers<[1], [0], [0], [1], [0, 0, 1, 1], [], []>} : vector<2x128xf32>, vector<128x32xf32>, vector<2x32xf32> -> vector<2x32xf32>
    %c488 = arith.constant 488 : index
    %c0_76 = arith.constant 0 : index
    %118 = vector.load %arg4[%c488, %c0_76] : memref<1768x128xf32, #tpu.memory_space<vmem>>, vector<32x32xf32>
    %cst_77 = arith.constant dense<0.000000e+00> : vector<8x32xf32>
    %119 = tpu.matmul %1, %118, %cst_77 {dimension_numbers = #tpu.dot_dimension_numbers<[1], [0], [0], [1], [0, 0, 1, 1], [], []>} : vector<8x32xf32>, vector<32x32xf32>, vector<8x32xf32> -> vector<8x32xf32>
    %c520 = arith.constant 520 : index
    %c0_78 = arith.constant 0 : index
    %120 = vector.load %arg4[%c520, %c0_78] : memref<1768x128xf32, #tpu.memory_space<vmem>>, vector<32x128xf32>
    %cst_79 = arith.constant dense<0.000000e+00> : vector<8x128xf32>
    %121 = tpu.matmul %1, %120, %cst_79 {dimension_numbers = #tpu.dot_dimension_numbers<[1], [0], [0], [1], [0, 0, 1, 1], [], []>} : vector<8x32xf32>, vector<32x128xf32>, vector<8x128xf32> -> vector<8x128xf32>
    %cst_80 = arith.constant dense<0.000000e+00> : vector<2x8xf32>
    %122 = tpu.matmul %117, %119, %cst_80 {dimension_numbers = #tpu.dot_dimension_numbers<[1], [1], [0], [0], [0, 0, 1, 0], [], []>} : vector<2x32xf32>, vector<8x32xf32>, vector<2x8xf32> -> vector<2x8xf32>
    %123 = vector.broadcast %3 : vector<1x8xf32> to vector<2x8xf32>
    %124 = arith.addf %122, %123 : vector<2x8xf32>
    %cst_81 = arith.constant dense<0xFF800000> : vector<2xf32>
    %125 = vector.multi_reduction <maximumf>, %124, %cst_81 [1] : vector<2x8xf32> to vector<2xf32>
    %126 = vector.shape_cast %125 : vector<2xf32> to vector<2x1xf32>
    %127 = vector.broadcast %126 : vector<2x1xf32> to vector<2x8xf32>
    %128 = arith.subf %124, %127 : vector<2x8xf32>
    %129 = math.exp %128 : vector<2x8xf32>
    %cst_82 = arith.constant dense<0.000000e+00> : vector<2xf32>
    %130 = vector.multi_reduction <add>, %129, %cst_82 [1] : vector<2x8xf32> to vector<2xf32>
    %131 = vector.shape_cast %130 : vector<2xf32> to vector<2x1xf32>
    %cst_83 = arith.constant dense<0.000000e+00> : vector<2x128xf32>
    %132 = tpu.matmul %129, %121, %cst_83 {dimension_numbers = #tpu.dot_dimension_numbers<[1], [0], [0], [1], [0, 0, 1, 1], [], []>} : vector<2x8xf32>, vector<8x128xf32>, vector<2x128xf32> -> vector<2x128xf32>
    %133 = tpu.reciprocal %131 {approx = true} : vector<2x1xf32> -> vector<2x1xf32>
    %134 = vector.broadcast %133 : vector<2x1xf32> to vector<2x128xf32>
    %135 = arith.mulf %132, %134 : vector<2x128xf32>
    %136 = arith.addf %115, %135 : vector<2x128xf32>
    %c1216 = arith.constant 1216 : index
    %c0_84 = arith.constant 0 : index
    %137 = vector.load %arg4[%c1216, %c0_84] : memref<1768x128xf32, #tpu.memory_space<vmem>>, vector<8x2xf32>
    %cst_85 = arith.constant dense<0.000000e+00> : vector<8x128xf32>
    %138 = tpu.matmul %137, %136, %cst_85 {dimension_numbers = #tpu.dot_dimension_numbers<[1], [0], [0], [1], [0, 0, 1, 1], [], []>} : vector<8x2xf32>, vector<2x128xf32>, vector<8x128xf32> -> vector<8x128xf32>
    %c1224 = arith.constant 1224 : index
    %c0_86 = arith.constant 0 : index
    %139 = vector.load %arg4[%c1224, %c0_86] : memref<1768x128xf32, #tpu.memory_space<vmem>>, vector<128x64xf32>
    %cst_87 = arith.constant dense<0.000000e+00> : vector<8x64xf32>
    %140 = tpu.matmul %138, %139, %cst_87 {dimension_numbers = #tpu.dot_dimension_numbers<[1], [0], [0], [1], [0, 0, 1, 1], [], []>} : vector<8x128xf32>, vector<128x64xf32>, vector<8x64xf32> -> vector<8x64xf32>
    %c1352 = arith.constant 1352 : index
    %c0_88 = arith.constant 0 : index
    %141 = vector.load %arg4[%c1352, %c0_88] : memref<1768x128xf32, #tpu.memory_space<vmem>>, vector<64x64xf32>
    %cst_89 = arith.constant dense<0.000000e+00> : vector<8x64xf32>
    %142 = tpu.matmul %101, %141, %cst_89 {dimension_numbers = #tpu.dot_dimension_numbers<[1], [0], [0], [1], [0, 0, 1, 1], [], []>} : vector<8x64xf32>, vector<64x64xf32>, vector<8x64xf32> -> vector<8x64xf32>
    %143 = arith.addf %140, %142 : vector<8x64xf32>
    %c1416 = arith.constant 1416 : index
    %c0_90 = arith.constant 0 : index
    %144 = vector.load %arg4[%c1416, %c0_90] : memref<1768x128xf32, #tpu.memory_space<vmem>>, vector<1x64xf32>
    %145 = vector.broadcast %144 : vector<1x64xf32> to vector<8x64xf32>
    %146 = arith.addf %143, %145 : vector<8x64xf32>
    %cst_91 = arith.constant 0.000000e+00 : f32
    %147 = vector.broadcast %cst_91 : f32 to vector<8x64xf32>
    %148 = arith.maximumf %146, %147 : vector<8x64xf32>
    %c1424 = arith.constant 1424 : index
    %c0_92 = arith.constant 0 : index
    %149 = vector.load %arg4[%c1424, %c0_92] : memref<1768x128xf32, #tpu.memory_space<vmem>>, vector<32x8xf32>
    %cst_93 = arith.constant dense<0.000000e+00> : vector<32x64xf32>
    %150 = tpu.matmul %149, %148, %cst_93 {dimension_numbers = #tpu.dot_dimension_numbers<[1], [0], [0], [1], [0, 0, 1, 1], [], []>} : vector<32x8xf32>, vector<8x64xf32>, vector<32x64xf32> -> vector<32x64xf32>
    %c1456 = arith.constant 1456 : index
    %c0_94 = arith.constant 0 : index
    %151 = vector.load %arg4[%c1456, %c0_94] : memref<1768x128xf32, #tpu.memory_space<vmem>>, vector<64x32xf32>
    %cst_95 = arith.constant dense<0.000000e+00> : vector<32x32xf32>
    %152 = tpu.matmul %150, %151, %cst_95 {dimension_numbers = #tpu.dot_dimension_numbers<[1], [0], [0], [1], [0, 0, 1, 1], [], []>} : vector<32x64xf32>, vector<64x32xf32>, vector<32x32xf32> -> vector<32x32xf32>
    %c1520 = arith.constant 1520 : index
    %c0_96 = arith.constant 0 : index
    %153 = vector.load %arg4[%c1520, %c0_96] : memref<1768x128xf32, #tpu.memory_space<vmem>>, vector<32x32xf32>
    %cst_97 = arith.constant dense<0.000000e+00> : vector<32x32xf32>
    %154 = tpu.matmul %66, %153, %cst_97 {dimension_numbers = #tpu.dot_dimension_numbers<[1], [0], [0], [1], [0, 0, 1, 1], [], []>} : vector<32x32xf32>, vector<32x32xf32>, vector<32x32xf32> -> vector<32x32xf32>
    %155 = arith.addf %152, %154 : vector<32x32xf32>
    %c1552 = arith.constant 1552 : index
    %c0_98 = arith.constant 0 : index
    %156 = vector.load %arg4[%c1552, %c0_98] : memref<1768x128xf32, #tpu.memory_space<vmem>>, vector<1x32xf32>
    %157 = vector.broadcast %156 : vector<1x32xf32> to vector<32x32xf32>
    %158 = arith.addf %155, %157 : vector<32x32xf32>
    %cst_99 = arith.constant 0.000000e+00 : f32
    %159 = vector.broadcast %cst_99 : f32 to vector<32x32xf32>
    %160 = arith.maximumf %158, %159 : vector<32x32xf32>
    %c1560 = arith.constant 1560 : index
    %c0_100 = arith.constant 0 : index
    %161 = vector.load %arg4[%c1560, %c0_100] : memref<1768x128xf32, #tpu.memory_space<vmem>>, vector<128x32xf32>
    %cst_101 = arith.constant dense<0.000000e+00> : vector<128x32xf32>
    %162 = tpu.matmul %161, %160, %cst_101 {dimension_numbers = #tpu.dot_dimension_numbers<[1], [0], [0], [1], [0, 0, 1, 1], [], []>} : vector<128x32xf32>, vector<32x32xf32>, vector<128x32xf32> -> vector<128x32xf32>
    %c1688 = arith.constant 1688 : index
    %c0_102 = arith.constant 0 : index
    %163 = vector.load %arg4[%c1688, %c0_102] : memref<1768x128xf32, #tpu.memory_space<vmem>>, vector<32x16xf32>
    %cst_103 = arith.constant dense<0.000000e+00> : vector<128x16xf32>
    %164 = tpu.matmul %162, %163, %cst_103 {dimension_numbers = #tpu.dot_dimension_numbers<[1], [0], [0], [1], [0, 0, 1, 1], [], []>} : vector<128x32xf32>, vector<32x16xf32>, vector<128x16xf32> -> vector<128x16xf32>
    %c1720 = arith.constant 1720 : index
    %c0_104 = arith.constant 0 : index
    %165 = vector.load %arg4[%c1720, %c0_104] : memref<1768x128xf32, #tpu.memory_space<vmem>>, vector<16x16xf32>
    %cst_105 = arith.constant dense<0.000000e+00> : vector<128x16xf32>
    %166 = tpu.matmul %31, %165, %cst_105 {dimension_numbers = #tpu.dot_dimension_numbers<[1], [0], [0], [1], [0, 0, 1, 1], [], []>} : vector<128x16xf32>, vector<16x16xf32>, vector<128x16xf32> -> vector<128x16xf32>
    %167 = arith.addf %164, %166 : vector<128x16xf32>
    %c1736 = arith.constant 1736 : index
    %c0_106 = arith.constant 0 : index
    %168 = vector.load %arg4[%c1736, %c0_106] : memref<1768x128xf32, #tpu.memory_space<vmem>>, vector<1x16xf32>
    %169 = vector.broadcast %168 : vector<1x16xf32> to vector<128x16xf32>
    %170 = arith.addf %167, %169 : vector<128x16xf32>
    %cst_107 = arith.constant 0.000000e+00 : f32
    %171 = vector.broadcast %cst_107 : f32 to vector<128x16xf32>
    %172 = arith.maximumf %170, %171 : vector<128x16xf32>
    %c1744 = arith.constant 1744 : index
    %c0_108 = arith.constant 0 : index
    %173 = vector.load %arg4[%c1744, %c0_108] : memref<1768x128xf32, #tpu.memory_space<vmem>>, vector<16x2xf32>
    %cst_109 = arith.constant dense<0.000000e+00> : vector<128x2xf32>
    %174 = tpu.matmul %172, %173, %cst_109 {dimension_numbers = #tpu.dot_dimension_numbers<[1], [0], [0], [1], [0, 0, 1, 1], [], []>} : vector<128x16xf32>, vector<16x2xf32>, vector<128x2xf32> -> vector<128x2xf32>
    %c1760 = arith.constant 1760 : index
    %c0_110 = arith.constant 0 : index
    %175 = vector.load %arg4[%c1760, %c0_110] : memref<1768x128xf32, #tpu.memory_space<vmem>>, vector<1x2xf32>
    %176 = vector.broadcast %175 : vector<1x2xf32> to vector<128x2xf32>
    %177 = arith.addf %174, %176 : vector<128x2xf32>
    %c0_111 = arith.constant 0 : index
    %c0_112 = arith.constant 0 : index
    %178 = vector.load %arg5[%c0_111, %c0_112] : memref<128x2048xf32, #tpu.memory_space<vmem>>, vector<128x2048xf32>
    %cst_113 = arith.constant dense<0.000000e+00> : vector<2x2048xf32>
    %179 = tpu.matmul %177, %178, %cst_113 {dimension_numbers = #tpu.dot_dimension_numbers<[0], [0], [1], [1], [0, 1, 1, 1], [], []>} : vector<128x2xf32>, vector<128x2048xf32>, vector<2x2048xf32> -> vector<2x2048xf32>
    %c0_114 = arith.constant 0 : index
    %c0_115 = arith.constant 0 : index
    %c0_116 = arith.constant 0 : index
    %180 = vector.load %arg6[%c0_114, %c0_115, %c0_116] : memref<1x2x2048xf32, #tpu.memory_space<vmem>>, vector<1x2x2048xf32>
    %181 = vector.shape_cast %180 : vector<1x2x2048xf32> to vector<2x2048xf32>
    %182 = vector.shape_cast %179 : vector<2x2048xf32> to vector<1x2x2048xf32>
    tpu.vector_store %arg6[%c0_114, %c0_115, %c0_116], %182 {strides = array<i32>} : memref<1x2x2048xf32, #tpu.memory_space<vmem>>, vector<1x2x2048xf32>,
    return
  }
  func.func @transform_0(%arg0: i32) -> (i32, i32, i32) {
    %c0_i32 = arith.constant 0 : i32
    %c0_i32_0 = arith.constant 0 : i32
    %c0_i32_1 = arith.constant 0 : i32
    return %arg0, %c0_i32, %c0_i32_0 : i32, i32, i32
  }
  func.func @transform_1(%arg0: i32) -> (i32, i32, i32) {
    %c0_i32 = arith.constant 0 : i32
    %c0_i32_0 = arith.constant 0 : i32
    %c0_i32_1 = arith.constant 0 : i32
    return %arg0, %c0_i32, %c0_i32_0 : i32, i32, i32
  }
  func.func @transform_2(%arg0: i32) -> (i32, i32, i32) {
    %c0_i32 = arith.constant 0 : i32
    %c0_i32_0 = arith.constant 0 : i32
    %c0_i32_1 = arith.constant 0 : i32
    return %arg0, %c0_i32, %c0_i32_0 : i32, i32, i32
  }
  func.func @transform_3(%arg0: i32) -> (i32, i32) {
    %c0_i32 = arith.constant 0 : i32
    %c0_i32_0 = arith.constant 0 : i32
    %c0_i32_1 = arith.constant 0 : i32
    return %c0_i32, %c0_i32_0 : i32, i32
  }
  func.func @transform_4(%arg0: i32) -> (i32, i32) {
    %c0_i32 = arith.constant 0 : i32
    %c0_i32_0 = arith.constant 0 : i32
    %c0_i32_1 = arith.constant 0 : i32
    return %c0_i32, %c0_i32_0 : i32, i32
  }
  func.func @transform_5(%arg0: i32) -> (i32, i32, i32) {
    %c0_i32 = arith.constant 0 : i32
    %c0_i32_0 = arith.constant 0 : i32
    %c0_i32_1 = arith.constant 0 : i32
    return %arg0, %c0_i32, %c0_i32_0 : i32, i32, i32
  }
}

</mosaic_0001>

<bundles_post_ra>
// kernel: lavt_forward.1
= control target key start
LH: loop header
LB: loop body
LE: loop exit
PB: predicated region body
PF: predicated region fallthrough
CT: control target
= control target key end

     0   :  { %10 = vsyncpa [#allocation3], 0  ;;  %s3734_s21 = smov [#allocation2]   ;;  %s3735_s23 = smov 2048   ;;  %s5210_s0 = inlined_call_operand.vmem [shape: f32[1,8,32], index: 0, kind: input, shape index: {}]   ;;  %s5211_s1 = inlined_call_operand.vmem [shape: f32[1,1,8], index: 1, kind: input, shape index: {}]   ;;  %s5212_s2 = inlined_call_operand.vmem [shape: f32[1,128,48], index: 2, kind: input, shape index: {}]   ;;  %s5213_s3 = inlined_call_operand.vmem [shape: f32[1768,128], index: 3, kind: input, shape index: {}]   ;;  %s5214_s4 = inlined_call_operand.hbm [shape: f32[128,2048], index: 4, kind: input, shape index: {}]   ;;  %s5215_s5 = inlined_call_operand.vmem [shape: f32[1,2,2048], index: 5, kind: output, shape index: {}]  }
   0x1   :  { %s23_s20 = sshll.u32 %s5214_s4, 4  ;;  %s25_s22 = sshll.u32 %s3734_s21, 4  ;;  %s24_s20 = int_to_ptr.hbm [resolvable:$true] %s23_s20  ;;  %s26_s22 = int_to_ptr.vmem [resolvable:$true] %s25_s22 }
   0x2   :  { %s3736_s24 = smov 128  }
   0x3   :  { %31 = dma.hbm_to_vmem [thread:$0]  %s24_s20, 32768, %s26_s22, [#allocation3], %s3735_s23, %s3735_s23, %s3736_s24  }
   0x4   :  { %3732 = dma.done.wait [#allocation3], 32768  }
   0x5   :  { %3733 = vsyncadd [#allocation3], 4294934528  ;;  %v59_v0 = vld [vmem:[%s5213_s3 + $0x28] sm:$0xff]  ;;  %v58_v1 = vld [vmem:[%s5213_s3 + $0x20] sm:$0xff]  ;;  %vm62_vm0 = vcmask 392192   ;;  %vm296_vm1 = vcmask 261120  }
   0x6   :  { %121 = vmatpush.msra.mxu0 %v59_v0  ;;  %3463 = vmatpush.msra.mxu1 %v59_v0  ;;  %v57_v2 = vld [vmem:[%s5213_s3 + $0x18] sm:$0xff]  ;;  %v56_v3 = vld [vmem:[%s5213_s3 + $0x10] sm:$0xff]  ;;  %v55_v4 = vld [vmem:[%s5213_s3 + $0x8] sm:$0xff]  ;;  %vm178_vm2 = vcmask 130048   ;;  %vm463_vm3 = vcmask 64512   ;;  %s3737_s21 = smov 16  }
   0x7   :  { %v54_v5 = vld [vmem:[%s5213_s3] sm:$0xff]  ;;  %v39_v7 = vld [vmem:[%s5212_s2 + $0x8] sm:$0xff]  ;;  %v40_v8 = vld [vmem:[%s5212_s2 + $0x10] sm:$0xff]  ;;  %s3738_s28 = smov 32   ;;  %s3739_s4 = smov 48   ;;  %vm971_vm4 = vcmask 523264  }
   0x8   :  { %122 = vmatpush.msra.mxu0 %v58_v1  ;;  %3464 = vmatpush.msra.mxu1 %v58_v1  ;;  %v38_v6 = vld [vmem:[%s5212_s2] sm:$0xff]  ;;  %v41_v9 = vld [vmem:[%s5212_s2 + $0x18] sm:$0xff]  ;;  %v43_v11 = vld [vmem:[%s5212_s2 + $0x28] sm:$0xff]  ;;  %s3740_s23 = smov 64   ;;  %s3741_s24 = smov 96   ;;  %vm1349_vm5 = vcmask 785408  }
   0x9   :  { %v42_v10 = vld [vmem:[%s5212_s2 + $0x20] sm:$0xff]  ;;  %v44_v12 = vld [vmem:[%s5212_s2 + $0x30] sm:$0xff]  ;;  %v45_v13 = vld [vmem:[%s5212_s2 + $0x38] sm:$0xff]  ;;  %vm1819_vm6 = vcmask 58368   ;;  %vm1860_vm7 = vcmask 1041408   ;;  %vm1856_vm8 = vcmask 15360  }
   0xa   :  { %123 = vmatpush.msra.mxu0 %v57_v2  ;;  %3465 = vmatpush.msra.mxu1 %v57_v2  ;;  %v46_v14 = vld [vmem:[%s5212_s2 + $0x40] sm:$0xff]  ;;  %v47_v15 = vld [vmem:[%s5212_s2 + $0x48] sm:$0xff]  ;;  %v48_v16 = vld [vmem:[%s5212_s2 + $0x50] sm:$0xff]  ;;  %vm3253_vm9 = vcmask 1045508   ;;  %vm3255_vm10 = vcmask 1043456  }
   0xb   :  { %v295_v17 = vld [vmem:[%s5213_s3 + $0x60] sm:$0xff]  ;;  %v294_v18 = vld [vmem:[%s5213_s3 + $0x58] sm:$0xff]  ;;  %v293_v19 = vld [vmem:[%s5213_s3 + $0x50] sm:$0xff] }
   0xc   :  { %124 = vmatpush.msra.mxu0 %v56_v3  ;;  %3466 = vmatpush.msra.mxu1 %v56_v3  ;;  %v53_v20 = vld [vmem:[%s5212_s2 + $0x78] sm:$0xff]  ;;  %v292_v21 = vld [vmem:[%s5213_s3 + $0x48] sm:$0xff]  ;;  %v3860_v22 = vld [vmem:[%s5210_s0] sm:$0xff] }
   0xd   :  { %312 = vmatpush.msra.mxu2 %v295_v17  ;;  %v49_v23 = vld [vmem:[%s5212_s2 + $0x58] sm:$0xff]  ;;  %v177_v24 = vld [vmem:[%s5213_s3 + $0x40] sm:$0xff]  ;;  %v51_v27 = vld [vmem:[%s5212_s2 + $0x68] sm:$0xff] }
   0xe   :  { %125 = vmatpush.msra.mxu0 %v55_v4  ;;  %3467 = vmatpush.msra.mxu1 %v55_v4  ;;  %v50_v25 = vld [vmem:[%s5212_s2 + $0x60] sm:$0xff]  ;;  %v176_v26 = vld [vmem:[%s5213_s3 + $0x38] sm:$0xff]  ;;  %v52_v28 = vld [vmem:[%s5212_s2 + $0x70] sm:$0xff] }
   0xf   :  { %313 = vmatpush.msra.mxu2 %v294_v18  ;;  %v3609_v29 = vld [vmem:[%s5213_s3 + $0x30] ss:$0 sm:$0xff] }
  0x10   :  { %126 = vmatpush.msra.mxu0 %v54_v5  ;;  %3468 = vmatpush.msra.mxu1 %v54_v5 }
  0x11   :  { %3279 = vmatmul.msk.f32.vlgmr.msra.gmra.mxu0 %vm62_vm0, %v38_v6  ;;  %3294 = vmatmul.msk.f32.vlgmr.msra.gmra.mxu1 %vm62_vm0, %v53_v20 }
  0x12   :  { %314 = vmatpush.msra.mxu2 %v293_v19  ;;  %241 = vmatpush.msra.mxu1 %v177_v24  ;;  %v3987_v19 = vld [vmem:[%s5211_s1] ss:$0 sm:$0xff] }
  0x14   :  { %315 = vmatpush.msra.mxu2 %v292_v21  ;;  %242 = vmatpush.msra.mxu1 %v176_v26 }
  0x15   :  { %3311 = vmatmul.msk.f32.vlgmr.msra.gmra.mxu2 %vm296_vm1, %v3860_v22 }
  0x19   :  { %3280 = vmatmul.msk.f32.gmra.mxu0 %vm62_vm0, %v39_v7 }
  0x21   :  { %3281 = vmatmul.msk.f32.gmra.mxu0 %vm62_vm0, %v40_v8 }
  0x29   :  { %3282 = vmatmul.msk.f32.gmra.mxu0 %vm62_vm0, %v41_v9 }
  0x31   :  { %3283 = vmatmul.msk.f32.gmra.mxu0 %vm62_vm0, %v42_v10 }
  0x39   :  { %3284 = vmatmul.msk.f32.gmra.mxu0 %vm62_vm0, %v43_v11  ;;  %v323_v11 = vld [vmem:[%s5213_s3 + $0x80] sm:$0xff] }
  0x3a   :  { %336 = vmatpush.msra.mxu3 %v323_v11 }
  0x41   :  { %3285 = vmatmul.msk.f32.gmra.mxu0 %vm62_vm0, %v44_v12  ;;  %v322_v12 = vld [vmem:[%s5213_s3 + $0x78] sm:$0xff] }
  0x42   :  { %337 = vmatpush.msra.mxu3 %v322_v12 }
  0x49   :  { %3286 = vmatmul.msk.f32.gmra.mxu0 %vm62_vm0, %v45_v13  ;;  %v321_v13 = vld [vmem:[%s5213_s3 + $0x70] sm:$0xff] }
  0x4a   :  { %338 = vmatpush.msra.mxu3 %v321_v13 }
  0x51   :  { %3287 = vmatmul.msk.f32.gmra.mxu0 %vm62_vm0, %v46_v14  ;;  %v320_v14 = vld [vmem:[%s5213_s3 + $0x68] sm:$0xff] }
  0x52   :  { %339 = vmatpush.msra.mxu3 %v320_v14 }
  0x53   :  { %3312 = vmatmul.msk.f32.vlgmr.msra.gmra.mxu3 %vm296_vm1, %v3860_v22 }
  0x59   :  { %3288 = vmatmul.msk.f32.gmra.mxu0 %vm62_vm0, %v47_v15 }
  0x61   :  { %3289 = vmatmul.msk.f32.gmra.mxu0 %vm62_vm0, %v48_v16 }
  0x69   :  { %3290 = vmatmul.msk.f32.gmra.mxu0 %vm62_vm0, %v49_v23 }
  0x71   :  { %3291 = vmatmul.msk.f32.gmra.mxu0 %vm62_vm0, %v50_v25 }
  0x79   :  { %3292 = vmatmul.msk.f32.gmra.mxu0 %vm62_vm0, %v51_v27 }
  0x81   :  { %3293 = vmatmul.msk.f32.gmra.mxu0 %vm62_vm0, %v52_v28 }
  0x8e   :  { %v128_v30 = vpop.f32.mrf.mxu0  ;;  %v173_v61 = vpop.f32.mrf.mxu1 }
  0x8f   :  { %v3889_v31 = vadd.f32 %v3609_v29, %v128_v30  ;;  %v3950_v62 = vadd.f32 %v3609_v29, %v173_v61 }
  0x91   :  { %3295 = vmatmul.msk.f32.vlgmr.msra.gmra.mxu1 %vm178_vm2, %v3889_v31 }
  0x96   :  { %v131_v32 = vpop.f32.mrf.mxu0 }
  0x97   :  { %v3893_v33 = vadd.f32 %v3609_v29, %v131_v32 }
  0x98   :  { %v317_v54 = vpop.f32.mrf.mxu2 }
  0x99   :  { %3296 = vmatmul.msk.f32.gmra.mxu1 %vm178_vm2, %v3893_v33  ;;  %3313 = vmatpush.xpose.msk.msra.mxu2 %vm296_vm1, %v317_v54 }
  0x9e   :  { %v134_v34 = vpop.f32.mrf.mxu0 }
  0x9f   :  { %v3897_v35 = vadd.f32 %v3609_v29, %v134_v34 }
  0xa1   :  { %3297 = vmatmul.msk.f32.gmra.mxu1 %vm178_vm2, %v3897_v35 }
  0xa6   :  { %v137_v36 = vpop.f32.mrf.mxu0 }
  0xa7   :  { %v3901_v37 = vadd.f32 %v3609_v29, %v137_v36 }
  0xa9   :  { %3298 = vmatmul.msk.f32.gmra.mxu1 %vm178_vm2, %v3901_v37 }
  0xae   :  { %v140_v38 = vpop.f32.mrf.mxu0 }
  0xaf   :  { %v3905_v39 = vadd.f32 %v3609_v29, %v140_v38 }
  0xb1   :  { %3299 = vmatmul.msk.f32.gmra.mxu1 %vm178_vm2, %v3905_v39 }
  0xb6   :  { %v143_v40 = vpop.f32.mrf.mxu0 }
  0xb7   :  { %v3909_v41 = vadd.f32 %v3609_v29, %v143_v40 }
  0xb9   :  { %3300 = vmatmul.msk.f32.gmra.mxu1 %vm178_vm2, %v3909_v41 }
  0xbe   :  { %v146_v42 = vpop.f32.mrf.mxu0 }
  0xbf   :  { %v3913_v43 = vadd.f32 %v3609_v29, %v146_v42 }
  0xc1   :  { %3301 = vmatmul.msk.f32.gmra.mxu1 %vm178_vm2, %v3913_v43 }
  0xc6   :  { %v149_v44 = vpop.f32.mrf.mxu0 }
  0xc7   :  { %v3917_v45 = vadd.f32 %v3609_v29, %v149_v44 }
  0xc9   :  { %3302 = vmatmul.msk.f32.gmra.mxu1 %vm178_vm2, %v3917_v45 }
  0xce   :  { %v152_v46 = vpop.f32.mrf.mxu0 }
  0xcf   :  { %v3921_v47 = vadd.f32 %v3609_v29, %v152_v46 }
  0xd1   :  { %3303 = vmatmul.msk.f32.gmra.mxu1 %vm178_vm2, %v3921_v47 }
  0xd6   :  { %v155_v48 = vpop.f32.mrf.mxu0 }
  0xd7   :  { %v3925_v49 = vadd.f32 %v3609_v29, %v155_v48 }
  0xd9   :  { %3304 = vmatmul.msk.f32.gmra.mxu1 %vm178_vm2, %v3925_v49 }
  0xde   :  { %v158_v50 = vpop.f32.mrf.mxu0 }
  0xdf   :  { %v3929_v51 = vadd.f32 %v3609_v29, %v158_v50 }
  0xe1   :  { %3305 = vmatmul.msk.f32.gmra.mxu1 %vm178_vm2, %v3929_v51 }
  0xe6   :  { %v161_v52 = vpop.f32.mrf.mxu0 }
  0xe7   :  { %v3933_v53 = vadd.f32 %v3609_v29, %v161_v52 }
  0xe9   :  { %3306 = vmatmul.msk.f32.gmra.mxu1 %vm178_vm2, %v3933_v53 }
  0xee   :  { %v164_v55 = vpop.f32.mrf.mxu0 }
  0xef   :  { %v3938_v56 = vadd.f32 %v3609_v29, %v164_v55 }
  0xf1   :  { %3307 = vmatmul.msk.f32.gmra.mxu1 %vm178_vm2, %v3938_v56 }
  0xf6   :  { %v167_v57 = vpop.f32.mrf.mxu0 }
  0xf7   :  { %v3942_v58 = vadd.f32 %v3609_v29, %v167_v57 }
  0xf9   :  { %3308 = vmatmul.msk.f32.gmra.mxu1 %vm178_vm2, %v3942_v58 }
  0xfe   :  { %v170_v59 = vpop.f32.mrf.mxu0 }
  0xff   :  { %v3946_v60 = vadd.f32 %v3609_v29, %v170_v59 }
 0x101   :  { %3309 = vmatmul.msk.f32.gmra.mxu1 %vm178_vm2, %v3946_v60 }
 0x109   :  { %3310 = vmatmul.msk.f32.gmra.mxu1 %vm178_vm2, %v3950_v62 }
 0x10e   :  { %v244_v63 = vpop.f32.mrf.mxu1 }
 0x10f   :  { %3314 = vmatmul.msk.f32.vlgmr.msra.gmra.mxu2 %vm296_vm1, %v244_v63 }
 0x116   :  { %v247_v0 = vpop.f32.mrf.mxu1 }
 0x117   :  { %3315 = vmatmul.msk.f32.gmra.mxu2 %vm296_vm1, %v247_v0 }
 0x11e   :  { %v250_v1 = vpop.f32.mrf.mxu1 }
 0x11f   :  { %3316 = vmatmul.msk.f32.gmra.mxu2 %vm296_vm1, %v250_v1 }
 0x126   :  { %v253_v2 = vpop.f32.mrf.mxu1 }
 0x127   :  { %3317 = vmatmul.msk.f32.gmra.mxu2 %vm296_vm1, %v253_v2 }
 0x12e   :  { %v256_v3 = vpop.f32.mrf.mxu1 }
 0x12f   :  { %3318 = vmatmul.msk.f32.gmra.mxu2 %vm296_vm1, %v256_v3 }
 0x136   :  { %v259_v4 = vpop.f32.mrf.mxu1 }
 0x137   :  { %3319 = vmatmul.msk.f32.gmra.mxu2 %vm296_vm1, %v259_v4 }
 0x13e   :  { %v262_v5 = vpop.f32.mrf.mxu1 }
 0x13f   :  { %3320 = vmatmul.msk.f32.gmra.mxu2 %vm296_vm1, %v262_v5 }
 0x146   :  { %v265_v6 = vpop.f32.mrf.mxu1 }
 0x147   :  { %3321 = vmatmul.msk.f32.gmra.mxu2 %vm296_vm1, %v265_v6 }
 0x14e   :  { %v268_v7 = vpop.f32.mrf.mxu1 }
 0x14f   :  { %3322 = vmatmul.msk.f32.gmra.mxu2 %vm296_vm1, %v268_v7 }
 0x156   :  { %v271_v8 = vpop.f32.mrf.mxu1 }
 0x157   :  { %3323 = vmatmul.msk.f32.gmra.mxu2 %vm296_vm1, %v271_v8 }
 0x15e   :  { %v274_v9 = vpop.f32.mrf.mxu1 }
 0x15f   :  { %3324 = vmatmul.msk.f32.gmra.mxu2 %vm296_vm1, %v274_v9 }
 0x166   :  { %v277_v10 = vpop.f32.mrf.mxu1 }
 0x167   :  { %3325 = vmatmul.msk.f32.gmra.mxu2 %vm296_vm1, %v277_v10  ;;  %v341_v10 = vpop.f32.mrf.mxu3 }
 0x168   :  { %671 = vmatpush.msra.mxu3 %v341_v10 }
 0x16e   :  { %v280_v15 = vpop.f32.mrf.mxu1 }
 0x16f   :  { %3326 = vmatmul.msk.f32.gmra.mxu2 %vm296_vm1, %v280_v15 }
 0x176   :  { %v283_v16 = vpop.f32.mrf.mxu1 }
 0x177   :  { %3327 = vmatmul.msk.f32.gmra.mxu2 %vm296_vm1, %v283_v16 }
 0x17e   :  { %v286_v17 = vpop.f32.mrf.mxu1 }
 0x17f   :  { %3328 = vmatmul.msk.f32.gmra.mxu2 %vm296_vm1, %v286_v17 }
 0x186   :  { %v289_v18 = vpop.f32.mrf.mxu1 }
 0x187   :  { %3329 = vmatmul.msk.f32.gmra.mxu2 %vm296_vm1, %v289_v18 }
 0x192   :  { %v415_v20 = vpop.f32.mrf.mxu2 }
 0x193   :  { %v3990_v21 = vadd.f32 %v3987_v19, %v415_v20 }
 0x195   :  { %v464_v22 = vsel %vm463_vm3, %v3990_v21, -inf }
 0x196   :  { %465 = vmax.xlane.f32.xlu0 %v464_v22 }
 0x19a   :  { %v418_v23 = vpop.f32.mrf.mxu2 }
 0x19b   :  { %v3995_v24 = vadd.f32 %v3987_v19, %v418_v23 }
 0x19d   :  { %v467_v25 = vsel %vm463_vm3, %v3995_v24, -inf }
 0x19e   :  { %468 = vmax.xlane.f32.xlu0 %v467_v25 }
 0x1a2   :  { %v421_v26 = vpop.f32.mrf.mxu2 }
 0x1a3   :  { %v4000_v27 = vadd.f32 %v3987_v19, %v421_v26 }
 0x1a5   :  { %v470_v28 = vsel %vm463_vm3, %v4000_v27, -inf }
 0x1a6   :  { %471 = vmax.xlane.f32.xlu1 %v470_v28 }
 0x1aa   :  { %v424_v29 = vpop.f32.mrf.mxu2 }
 0x1ab   :  { %v4005_v30 = vadd.f32 %v3987_v19, %v424_v29 }
 0x1ad   :  { %v473_v32 = vsel %vm463_vm3, %v4005_v30, -inf }
 0x1ae   :  { %474 = vmax.xlane.f32.xlu1 %v473_v32 }
 0x1b2   :  { %v427_v34 = vpop.f32.mrf.mxu2 }
 0x1b3   :  { %v4010_v36 = vadd.f32 %v3987_v19, %v427_v34 }
 0x1b5   :  { %v476_v38 = vsel %vm463_vm3, %v4010_v36, -inf }
 0x1b6   :  { %477 = vmax.xlane.f32.xlu2 %v476_v38 }
 0x1ba   :  { %v430_v40 = vpop.f32.mrf.mxu2 }
 0x1bb   :  { %v4015_v42 = vadd.f32 %v3987_v19, %v430_v40 }
 0x1bd   :  { %v479_v44 = vsel %vm463_vm3, %v4015_v42, -inf }
 0x1be   :  { %480 = vmax.xlane.f32.xlu2 %v479_v44 }
 0x1c2   :  { %v433_v46 = vpop.f32.mrf.mxu2 }
 0x1c3   :  { %v4020_v48 = vadd.f32 %v3987_v19, %v433_v46 }
 0x1c5   :  { %v482_v50 = vsel %vm463_vm3, %v4020_v48, -inf }
 0x1c6   :  { %483 = vmax.xlane.f32.xlu0 %v482_v50 }
 0x1ca   :  { %v436_v52 = vpop.f32.mrf.mxu2 }
 0x1cb   :  { %v4025_v54 = vadd.f32 %v3987_v19, %v436_v52 }
 0x1cd   :  { %v485_v55 = vsel %vm463_vm3, %v4025_v54, -inf }
 0x1ce   :  { %486 = vmax.xlane.f32.xlu1 %v485_v55 }
 0x1d2   :  { %v439_v57 = vpop.f32.mrf.mxu2 }
 0x1d3   :  { %v4030_v59 = vadd.f32 %v3987_v19, %v439_v57 }
 0x1d5   :  { %v488_v61 = vsel %vm463_vm3, %v4030_v59, -inf }
 0x1d6   :  { %489 = vmax.xlane.f32.xlu2 %v488_v61 }
 0x1da   :  { %v442_v63 = vpop.f32.mrf.mxu2 }
 0x1db   :  { %v4035_v0 = vadd.f32 %v3987_v19, %v442_v63 }
 0x1dd   :  { %v491_v1 = vsel %vm463_vm3, %v4035_v0, -inf }
 0x1de   :  { %492 = vmax.xlane.f32.xlu0 %v491_v1 }
 0x1e2   :  { %v445_v2 = vpop.f32.mrf.mxu2 }
 0x1e3   :  { %v4040_v3 = vadd.f32 %v3987_v19, %v445_v2 }
 0x1e5   :  { %v494_v4 = vsel %vm463_vm3, %v4040_v3, -inf }
 0x1e6   :  { %495 = vmax.xlane.f32.xlu1 %v494_v4 }
 0x1ea   :  { %v448_v5 = vpop.f32.mrf.mxu2 }
 0x1eb   :  { %v4045_v6 = vadd.f32 %v3987_v19, %v448_v5 }
 0x1ed   :  { %v497_v7 = vsel %vm463_vm3, %v4045_v6, -inf }
 0x1ee   :  { %498 = vmax.xlane.f32.xlu2 %v497_v7 }
 0x1f2   :  { %v451_v8 = vpop.f32.mrf.mxu2 }
 0x1f3   :  { %v4050_v9 = vadd.f32 %v3987_v19, %v451_v8 }
 0x1f5   :  { %v500_v11 = vsel %vm463_vm3, %v4050_v9, -inf }
 0x1f6   :  { %501 = vmax.xlane.f32.xlu0 %v500_v11 }
 0x1fa   :  { %v454_v12 = vpop.f32.mrf.mxu2 }
 0x1fb   :  { %v4055_v13 = vadd.f32 %v3987_v19, %v454_v12 }
 0x1fd   :  { %v503_v14 = vsel %vm463_vm3, %v4055_v13, -inf }
 0x1fe   :  { %504 = vmax.xlane.f32.xlu1 %v503_v14 }
 0x202   :  { %v457_v15 = vpop.f32.mrf.mxu2 }
 0x203   :  { %v4060_v16 = vadd.f32 %v3987_v19, %v457_v15 }
 0x205   :  { %v506_v17 = vsel %vm463_vm3, %v4060_v16, -inf }
 0x206   :  { %507 = vmax.xlane.f32.xlu2 %v506_v17 }
 0x209   :  { %v466_v18 = vpop.xlane.xlu0 %465 }
 0x20a   :  { %v512_v20 = vsub.f32 %v3990_v21, %v466_v18  ;;  %v460_v22 = vpop.f32.mrf.mxu2 }
 0x20b   :  { %v4066_v23 = vadd.f32 %v3987_v19, %v460_v22 }
 0x20c   :  { %v528_v25 = vmul.f32 1.442695, %v512_v20 }
 0x20d   :  { %v509_v26 = vsel %vm463_vm3, %v4066_v23, -inf }
 0x20e   :  { %3618 = vpow2.f32 %v528_v25  ;;  %510 = vmax.xlane.f32.xlu0 %v509_v26 }
 0x211   :  { %v469_v28 = vpop.xlane.xlu0 %468 }
 0x212   :  { %v513_v29 = vsub.f32 %v3995_v24, %v469_v28 }
 0x214   :  { %v4071_v32 = vpop.eup %3618  ;;  %v530_v34 = vmul.f32 1.442695, %v513_v29 }
 0x215   :  { %3330 = vmatmul.msk.f32.vlgmr.msra.gmra.mxu3 %vm463_vm3, %v4071_v32 }
 0x216   :  { %3620 = vpow2.f32 %v530_v34 }
 0x219   :  { %v472_v21 = vpop.xlane.xlu1 %471 }
 0x21a   :  { %v514_v19 = vsub.f32 %v4000_v27, %v472_v21 }
 0x21c   :  { %v4076_v38 = vpop.eup %3620  ;;  %v532_v40 = vmul.f32 1.442695, %v514_v19 }
 0x21d   :  { %3331 = vmatmul.msk.f32.gmra.mxu3 %vm463_vm3, %v4076_v38 }
 0x21e   :  { %3622 = vpow2.f32 %v532_v40 }
 0x221   :  { %v475_v44 = vpop.xlane.xlu1 %474 }
 0x222   :  { %v515_v24 = vsub.f32 %v4005_v30, %v475_v44 }
 0x224   :  { %v4081_v46 = vpop.eup %3622  ;;  %v534_v50 = vmul.f32 1.442695, %v515_v24 }
 0x225   :  { %3332 = vmatmul.msk.f32.gmra.mxu3 %vm463_vm3, %v4081_v46 }
 0x226   :  { %3624 = vpow2.f32 %v534_v50 }
 0x229   :  { %v478_v52 = vpop.xlane.xlu2 %477 }
 0x22a   :  { %v516_v27 = vsub.f32 %v4010_v36, %v478_v52 }
 0x22c   :  { %v4086_v55 = vpop.eup %3624  ;;  %v536_v57 = vmul.f32 1.442695, %v516_v27 }
 0x22d   :  { %3333 = vmatmul.msk.f32.gmra.mxu3 %vm463_vm3, %v4086_v55 }
 0x22e   :  { %3626 = vpow2.f32 %v536_v57 }
 0x231   :  { %v481_v61 = vpop.xlane.xlu2 %480 }
 0x232   :  { %v517_v30 = vsub.f32 %v4015_v42, %v481_v61 }
 0x234   :  { %v4091_v63 = vpop.eup %3626  ;;  %v538_v1 = vmul.f32 1.442695, %v517_v30 }
 0x235   :  { %3334 = vmatmul.msk.f32.gmra.mxu3 %vm463_vm3, %v4091_v63 }
 0x236   :  { %3628 = vpow2.f32 %v538_v1 }
 0x239   :  { %v484_v2 = vpop.xlane.xlu0 %483 }
 0x23a   :  { %v518_v36 = vsub.f32 %v4020_v48, %v484_v2 }
 0x23c   :  { %v4096_v4 = vpop.eup %3628  ;;  %v540_v5 = vmul.f32 1.442695, %v518_v36 }
 0x23d   :  { %3335 = vmatmul.msk.f32.gmra.mxu3 %vm463_vm3, %v4096_v4 }
 0x23e   :  { %3630 = vpow2.f32 %v540_v5 }
 0x241   :  { %v487_v7 = vpop.xlane.xlu1 %486 }
 0x242   :  { %v519_v42 = vsub.f32 %v4025_v54, %v487_v7 }
 0x244   :  { %v4101_v8 = vpop.eup %3630  ;;  %v542_v10 = vmul.f32 1.442695, %v519_v42 }
 0x245   :  { %3336 = vmatmul.msk.f32.gmra.mxu3 %vm463_vm3, %v4101_v8 }
 0x246   :  { %3632 = vpow2.f32 %v542_v10 }
 0x249   :  { %v490_v11 = vpop.xlane.xlu2 %489 }
 0x24a   :  { %v520_v48 = vsub.f32 %v4030_v59, %v490_v11  ;;  %v572_v11 = vsel %vm463_vm3, %v4091_v63, 0.0  ;;  %v566_v63 = vsel %vm463_vm3, %v4081_v46, 0.0 }
 0x24c   :  { %v3633_v12 = vpop.eup %3632  ;;  %v544_v14 = vmul.f32 1.442695, %v520_v48  ;;  %v575_v48 = vsel %vm463_vm3, %v4096_v4, 0.0 }
 0x24d   :  { %3337 = vmatmul.msk.f32.gmra.mxu3 %vm463_vm3, %v3633_v12  ;;  %v581_v42 = vsel %vm463_vm3, %v3633_v12, 0.0  ;;  %v563_v12 = vsel %vm463_vm3, %v4076_v38, 0.0  ;;  %v569_v38 = vsel %vm463_vm3, %v4086_v55, 0.0 }
 0x24e   :  { %3634 = vpow2.f32 %v544_v14 }
 0x251   :  { %v493_v15 = vpop.xlane.xlu0 %492 }
 0x252   :  { %v521_v17 = vsub.f32 %v4035_v0, %v493_v15 }
 0x254   :  { %v3635_v18 = vpop.eup %3634  ;;  %v546_v54 = vmul.f32 1.442695, %v521_v17  ;;  %v578_v17 = vsel %vm463_vm3, %v4101_v8, 0.0 }
 0x255   :  { %3338 = vmatmul.msk.f32.gmra.mxu3 %vm463_vm3, %v3635_v18  ;;  %v584_v10 = vsel %vm463_vm3, %v3635_v18, 0.0 }
 0x256   :  { %3636 = vpow2.f32 %v546_v54  ;;  %v560_v54 = vsel %vm463_vm3, %v4071_v32, 0.0 }
 0x259   :  { %v496_v20 = vpop.xlane.xlu1 %495 }
 0x25a   :  { %v522_v22 = vsub.f32 %v4040_v3, %v496_v20 }
 0x25c   :  { %v3637_v25 = vpop.eup %3636  ;;  %v548_v26 = vmul.f32 1.442695, %v522_v22 }
 0x25d   :  { %3339 = vmatmul.msk.f32.gmra.mxu3 %vm463_vm3, %v3637_v25  ;;  %v587_v14 = vsel %vm463_vm3, %v3637_v25, 0.0 }
 0x25e   :  { %3638 = vpow2.f32 %v548_v26 }
 0x261   :  { %v499_v59 = vpop.xlane.xlu2 %498 }
 0x262   :  { %v523_v28 = vsub.f32 %v4045_v6, %v499_v59 }
 0x264   :  { %v3639_v29 = vpop.eup %3638  ;;  %v550_v34 = vmul.f32 1.442695, %v523_v28 }
 0x265   :  { %3340 = vmatmul.msk.f32.gmra.mxu3 %vm463_vm3, %v3639_v29  ;;  %v590_v0 = vsel %vm463_vm3, %v3639_v29, 0.0 }
 0x266   :  { %3640 = vpow2.f32 %v550_v34  ;;  %591 = vadd.xlane.f32.xlu0 %v590_v0 }
 0x269   :  { %v502_v21 = vpop.xlane.xlu0 %501 }
 0x26a   :  { %v524_v19 = vsub.f32 %v4050_v9, %v502_v21 }
 0x26c   :  { %v3641_v3 = vpop.eup %3640  ;;  %v552_v40 = vmul.f32 1.442695, %v524_v19 }
 0x26d   :  { %3341 = vmatmul.msk.f32.gmra.mxu3 %vm463_vm3, %v3641_v3  ;;  %v593_v44 = vsel %vm463_vm3, %v3641_v3, 0.0 }
 0x26e   :  { %3642 = vpow2.f32 %v552_v40  ;;  %594 = vadd.xlane.f32.xlu2 %v593_v44 }
 0x271   :  { %v505_v6 = vpop.xlane.xlu1 %504 }
 0x272   :  { %v525_v24 = vsub.f32 %v4055_v13, %v505_v6 }
 0x274   :  { %v3643_v50 = vpop.eup %3642  ;;  %v554_v52 = vmul.f32 1.442695, %v525_v24 }
 0x275   :  { %3342 = vmatmul.msk.f32.gmra.mxu3 %vm463_vm3, %v3643_v50  ;;  %v596_v27 = vsel %vm463_vm3, %v3643_v50, 0.0 }
 0x276   :  { %3644 = vpow2.f32 %v554_v52  ;;  %597 = vadd.xlane.f32.xlu1 %v596_v27 }
 0x279   :  { %v508_v9 = vpop.xlane.xlu2 %507 }
 0x27a   :  { %v526_v57 = vsub.f32 %v4060_v16, %v508_v9 }
 0x27c   :  { %v3645_v61 = vpop.eup %3644  ;;  %v556_v30 = vmul.f32 1.442695, %v526_v57 }
 0x27d   :  { %3343 = vmatmul.msk.f32.gmra.mxu3 %vm463_vm3, %v3645_v61  ;;  %v599_v1 = vsel %vm463_vm3, %v3645_v61, 0.0 }
 0x27e   :  { %3646 = vpow2.f32 %v556_v30  ;;  %600 = vadd.xlane.f32.xlu0 %v599_v1 }
 0x281   :  { %v511_v13 = vpop.xlane.xlu0 %510 }
 0x282   :  { %v527_v2 = vsub.f32 %v4066_v23, %v511_v13 }
 0x284   :  { %v3647_v36 = vpop.eup %3646  ;;  %v558_v5 = vmul.f32 1.442695, %v527_v2 }
 0x285   :  { %3344 = vmatmul.msk.f32.gmra.mxu3 %vm463_vm3, %v3647_v36  ;;  %v602_v7 = vsel %vm463_vm3, %v3647_v36, 0.0 }
 0x286   :  { %3648 = vpow2.f32 %v558_v5  ;;  %603 = vadd.xlane.f32.xlu2 %v602_v7  ;;  %582 = vadd.xlane.f32.xlu0 %v581_v42 }
 0x28c   :  { %v3649_v16 = vpop.eup %3648 }
 0x28d   :  { %3345 = vmatmul.msk.f32.gmra.mxu3 %vm463_vm3, %v3649_v16  ;;  %v605_v23 = vsel %vm463_vm3, %v3649_v16, 0.0 }
 0x28e   :  { %585 = vadd.xlane.f32.xlu2 %v584_v10  ;;  %573 = vadd.xlane.f32.xlu0 %v572_v11 }
 0x28f   :  { %606 = vadd.xlane.f32.xlu1 %v605_v23 }
 0x296   :  { %576 = vadd.xlane.f32.xlu2 %v575_v48  ;;  %564 = vadd.xlane.f32.xlu0 %v563_v12 }
 0x297   :  { %588 = vadd.xlane.f32.xlu1 %v587_v14 }
 0x298   :  { %v4137_v15 = vpop.f32.mrf.mxu3 }
 0x29e   :  { %567 = vadd.xlane.f32.xlu2 %v566_v63 }
 0x29f   :  { %579 = vadd.xlane.f32.xlu1 %v578_v17 }
 0x2a0   :  { %v4143_v18 = vpop.f32.mrf.mxu3 }
 0x2a7   :  { %570 = vadd.xlane.f32.xlu1 %v569_v38 }
 0x2a8   :  { %v4147_v4 = vpop.f32.mrf.mxu3 }
 0x2af   :  { %561 = vadd.xlane.f32.xlu1 %v560_v54 }
 0x2b0   :  { %v4151_v20 = vpop.f32.mrf.mxu3 }
 0x2b8   :  { %v4153_v46 = vpop.f32.mrf.mxu3 }
 0x2c0   :  { %v4155_v22 = vpop.f32.mrf.mxu3 }
 0x2c8   :  { %v4157_v8 = vpop.f32.mrf.mxu3 }
 0x2d0   :  { %v4159_v25 = vpop.f32.mrf.mxu3 }
 0x2d8   :  { %v4161_v26 = vpop.f32.mrf.mxu3 }
 0x2d9   :  { %v592_v0 = vpop.xlane.xlu0 %591 }
 0x2e0   :  { %v700_v55 = vpop.f32.mrf.mxu3 }
 0x2e1   :  { %v595_v29 = vpop.xlane.xlu2 %594 }
 0x2e8   :  { %v703_v59 = vpop.f32.mrf.mxu3 }
 0x2e9   :  { %v598_v32 = vpop.xlane.xlu1 %597 }
 0x2f0   :  { %v706_v28 = vpop.f32.mrf.mxu3 }
 0x2f1   :  { %v601_v3 = vpop.xlane.xlu0 %600 }
 0x2f8   :  { %v709_v34 = vpop.f32.mrf.mxu3 }
 0x2f9   :  { %v604_v21 = vpop.xlane.xlu2 %603  ;;  %v583_v50 = vpop.xlane.xlu0 %582 }
 0x2fa   :  { %3650 = vrcp.f32 %v604_v21 }
 0x300   :  { %v712_v19 = vpop.f32.mrf.mxu3  ;;  %v3651_v52 = vpop.eup %3650 }
 0x301   :  { %v586_v6 = vpop.xlane.xlu2 %585  ;;  %v574_v42 = vpop.xlane.xlu0 %573 }
 0x302   :  { %v607_v40 = vpop.xlane.xlu1 %606 }
 0x303   :  { %3652 = vrcp.f32 %v607_v40 }
 0x304   :  { %3654 = vrcp.f32 %v601_v3 }
 0x305   :  { %3656 = vrcp.f32 %v598_v32 }
 0x306   :  { %3658 = vrcp.f32 %v595_v29 }
 0x307   :  { %3660 = vrcp.f32 %v592_v0 }
 0x308   :  { %v715_v44 = vpop.f32.mrf.mxu3 }
 0x309   :  { %v3653_v27 = vpop.eup %3652  ;;  %v751_v57 = vmul.f32 %v3651_v52, %v715_v44  ;;  %v577_v2 = vpop.xlane.xlu2 %576  ;;  %v836_v44 = vld [vmem:[%s5213_s3 + $0x270] sm:$0xff]  ;;  %v837_v52 = vld [vmem:[%s5213_s3 + $0x278] sm:$0xff] }
 0x30a   :  { %v589_v24 = vpop.xlane.xlu1 %588  ;;  %v3655_v30 = vpop.eup %3654 }
 0x30b   :  { %3662 = vrcp.f32 %v589_v24  ;;  %v750_v13 = vmul.f32 %v3655_v30, %v712_v19  ;;  %v3657_v5 = vpop.eup %3656  ;;  %v4167_v16 = vadd.f32 %v751_v57, %v3946_v60  ;;  %v803_v24 = vld [vmem:[%s5213_s3 + $0x250] sm:$0xff]  ;;  %v838_v57 = vld [vmem:[%s5213_s3 + $0x280] sm:$0xff] }
 0x30c   :  { %3664 = vrcp.f32 %v586_v6  ;;  %v749_v7 = vmul.f32 %v3657_v5, %v709_v34  ;;  %v3659_v10 = vpop.eup %3658  ;;  %v869_v6 = vld [vmem:[%s5213_s3 + $0x290] sm:$0xff]  ;;  %v805_v30 = vld [vmem:[%s5213_s3 + $0x260] sm:$0xff] }
 0x30d   :  { %3666 = vrcp.f32 %v583_v50  ;;  %v3661_v11 = vpop.eup %3660  ;;  %v4174_v23 = vadd.f32 %v750_v13, %v3942_v58  ;;  %v770_v50 = vld [vmem:[%s5213_s3 + $0x230] sm:$0xff]  ;;  %v772_v13 = vld [vmem:[%s5213_s3 + $0x240] sm:$0xff] }
 0x30e   :  { %v747_v48 = vmul.f32 %v3661_v11, %v703_v59  ;;  %v4181_v12 = vadd.f32 %v749_v7, %v3938_v56  ;;  %v968_v5 = vld [vmem:[%s5213_s3 + $0x2e0] sm:$0xff]  ;;  %v967_v7 = vld [vmem:[%s5213_s3 + $0x2d8] sm:$0xff] }
 0x310   :  { %v718_v9 = vpop.f32.mrf.mxu3  ;;  %v4195_v38 = vadd.f32 %v747_v48, %v3929_v51  ;;  %v565_v51 = vpop.xlane.xlu0 %564 }
 0x311   :  { %v752_v61 = vmul.f32 %v3653_v27, %v718_v9  ;;  %v3663_v60 = vpop.eup %3662  ;;  %v568_v59 = vpop.xlane.xlu2 %567  ;;  %v870_v27 = vld [vmem:[%s5213_s3 + $0x298] sm:$0xff] }
 0x312   :  { %v580_v1 = vpop.xlane.xlu1 %579  ;;  %v3665_v58 = vpop.eup %3664  ;;  %v746_v17 = vmul.f32 %v3663_v60, %v700_v55  ;;  %v804_v9 = vld [vmem:[%s5213_s3 + $0x258] sm:$0xff] }
 0x313   :  { %v4164_v36 = vadd.f32 %v752_v61, %v3950_v62  ;;  %v748_v62 = vmul.f32 %v3659_v10, %v706_v28  ;;  %3668 = vrcp.f32 %v580_v1  ;;  %v3667_v56 = vpop.eup %3666  ;;  %v745_v54 = vmul.f32 %v3665_v58, %v4161_v26  ;;  %v871_v61 = vld [vmem:[%s5213_s3 + $0x2a0] sm:$0xff]  ;;  %v771_v1 = vld [vmem:[%s5213_s3 + $0x238] sm:$0xff] }
 0x314   :  { %3670 = vrcp.f32 %v577_v2  ;;  %v744_v55 = vmul.f32 %v3667_v56, %v4159_v25  ;;  %v4204_v28 = vadd.f32 %v746_v17, %v3925_v49 }
 0x315   :  { %773 = vmatpush.msra.mxu1 %v4164_v36  ;;  %806 = vmatpush.msra.mxu0 %v4164_v36  ;;  %v4188_v63 = vadd.f32 %v748_v62, %v3933_v53  ;;  %3672 = vrcp.f32 %v574_v42  ;;  %v4211_v29 = vadd.f32 %v745_v54, %v3921_v47  ;;  %v966_v42 = vld [vmem:[%s5213_s3 + $0x2d0] sm:$0xff] }
 0x316   :  { %839 = vmatpush.msra.mxu2 %v4164_v36  ;;  %872 = vmatpush.msra.mxu3 %v4164_v36  ;;  %v4219_v0 = vadd.f32 %v744_v55, %v3917_v45  ;;  %v964_v55 = vld [vmem:[%s5213_s3 + $0x2c0] sm:$0xff] }
 0x317   :  { %774 = vmatpush.msra.mxu1 %v4167_v16  ;;  %807 = vmatpush.msra.mxu0 %v4167_v16 }
 0x318   :  { %840 = vmatpush.msra.mxu2 %v4167_v16  ;;  %873 = vmatpush.msra.mxu3 %v4167_v16 }
 0x319   :  { %775 = vmatpush.msra.mxu1 %v4174_v23  ;;  %808 = vmatpush.msra.mxu0 %v4174_v23  ;;  %v3669_v53 = vpop.eup %3668 }
 0x31a   :  { %v571_v14 = vpop.xlane.xlu1 %570  ;;  %841 = vmatpush.msra.mxu2 %v4174_v23  ;;  %874 = vmatpush.msra.mxu3 %v4174_v23  ;;  %v3671_v26 = vpop.eup %3670  ;;  %v743_v34 = vmul.f32 %v3669_v53, %v4157_v8  ;;  %v965_v53 = vld [vmem:[%s5213_s3 + $0x2c8] sm:$0xff] }
 0x31b   :  { %776 = vmatpush.msra.mxu1 %v4181_v12  ;;  %809 = vmatpush.msra.mxu0 %v4181_v12  ;;  %3674 = vrcp.f32 %v571_v14  ;;  %v3673_v49 = vpop.eup %3672  ;;  %v742_v32 = vmul.f32 %v3671_v26, %v4155_v22  ;;  %v962_v26 = vld [vmem:[%s5213_s3 + $0x2b0] sm:$0xff] }
 0x31c   :  { %842 = vmatpush.msra.mxu2 %v4181_v12  ;;  %875 = vmatpush.msra.mxu3 %v4181_v12  ;;  %3676 = vrcp.f32 %v568_v59  ;;  %v741_v8 = vmul.f32 %v3673_v49, %v4153_v46  ;;  %v4228_v21 = vadd.f32 %v743_v34, %v3913_v43  ;;  %v961_v34 = vld [vmem:[%s5213_s3 + $0x2a8] sm:$0xff] }
 0x31d   :  { %777 = vmatpush.msra.mxu1 %v4188_v63  ;;  %810 = vmatpush.msra.mxu0 %v4188_v63  ;;  %3678 = vrcp.f32 %v565_v51  ;;  %v4235_v22 = vadd.f32 %v742_v32, %v3909_v41  ;;  %v963_v51 = vld [vmem:[%s5213_s3 + $0x2b8] sm:$0xff] }
 0x31e   :  { %843 = vmatpush.msra.mxu2 %v4188_v63  ;;  %876 = vmatpush.msra.mxu3 %v4188_v63  ;;  %v4243_v46 = vadd.f32 %v741_v8, %v3905_v39  ;;  %v1060_v8 = vld [vmem:[%s5213_s3 + $0xb8] sm:$0xff] }
 0x31f   :  { %778 = vmatpush.msra.mxu1 %v4195_v38  ;;  %811 = vmatpush.msra.mxu0 %v4195_v38 }
 0x320   :  { %844 = vmatpush.msra.mxu2 %v4195_v38  ;;  %877 = vmatpush.msra.mxu3 %v4195_v38 }
 0x321   :  { %779 = vmatpush.msra.mxu1 %v4204_v28  ;;  %812 = vmatpush.msra.mxu0 %v4204_v28  ;;  %v3675_v47 = vpop.eup %3674 }
 0x322   :  { %v562_v25 = vpop.xlane.xlu1 %561  ;;  %845 = vmatpush.msra.mxu2 %v4204_v28  ;;  %878 = vmatpush.msra.mxu3 %v4204_v28  ;;  %v3677_v45 = vpop.eup %3676  ;;  %v740_v19 = vmul.f32 %v3675_v47, %v4151_v20  ;;  %v1061_v47 = vld [vmem:[%s5213_s3 + $0xc0] sm:$0xff] }
 0x323   :  { %780 = vmatpush.msra.mxu1 %v4211_v29  ;;  %813 = vmatpush.msra.mxu0 %v4211_v29  ;;  %3680 = vrcp.f32 %v562_v25  ;;  %v3679_v43 = vpop.eup %3678  ;;  %v739_v3 = vmul.f32 %v3677_v45, %v4147_v4  ;;  %v1016_v45 = vld [vmem:[%s5213_s3 + $0xa0] sm:$0xff] }
 0x324   :  { %846 = vmatpush.msra.mxu2 %v4211_v29  ;;  %879 = vmatpush.msra.mxu3 %v4211_v29  ;;  %v738_v20 = vmul.f32 %v3679_v43, %v4143_v18  ;;  %v4252_v40 = vadd.f32 %v740_v19, %v3901_v37  ;;  %v769_v18 = vld [vmem:[%s5213_s3 + $0x228] sm:$0xff]  ;;  %v1015_v19 = vld [vmem:[%s5213_s3 + $0x98] sm:$0xff]  ;;  %v1059_v43 = vld [vmem:[%s5213_s3 + $0xb0] sm:$0xff] }
 0x325   :  { %781 = vmatpush.msra.mxu1 %v4219_v0  ;;  %814 = vmatpush.msra.mxu0 %v4219_v0  ;;  %v4259_v39 = vadd.f32 %v739_v3, %v3897_v35  ;;  %v1058_v3 = vld [vmem:[%s5213_s3 + $0xa8] sm:$0xff] }
 0x326   :  { %847 = vmatpush.msra.mxu2 %v4219_v0  ;;  %880 = vmatpush.msra.mxu3 %v4219_v0  ;;  %v4267_v37 = vadd.f32 %v738_v20, %v3893_v33  ;;  %v835_v33 = vld [vmem:[%s5213_s3 + $0x268] sm:$0xff] }
 0x327   :  { %782 = vmatpush.msra.mxu1 %v4228_v21  ;;  %815 = vmatpush.msra.mxu0 %v4228_v21 }
 0x328   :  { %848 = vmatpush.msra.mxu2 %v4228_v21  ;;  %881 = vmatpush.msra.mxu3 %v4228_v21 }
 0x329   :  { %783 = vmatpush.msra.mxu1 %v4235_v22  ;;  %816 = vmatpush.msra.mxu0 %v4235_v22  ;;  %v3681_v41 = vpop.eup %3680 }
 0x32a   :  { %849 = vmatpush.msra.mxu2 %v4235_v22  ;;  %882 = vmatpush.msra.mxu3 %v4235_v22  ;;  %v737_v4 = vmul.f32 %v3681_v41, %v4137_v15  ;;  %v868_v15 = vld [vmem:[%s5213_s3 + $0x288] sm:$0xff] }
 0x32b   :  { %784 = vmatpush.msra.mxu1 %v4243_v46  ;;  %817 = vmatpush.msra.mxu0 %v4243_v46 }
 0x32c   :  { %850 = vmatpush.msra.mxu2 %v4243_v46  ;;  %883 = vmatpush.msra.mxu3 %v4243_v46  ;;  %v4274_v35 = vadd.f32 %v737_v4, %v3889_v31  ;;  %v802_v31 = vld [vmem:[%s5213_s3 + $0x248] sm:$0xff] }
 0x32d   :  { %785 = vmatpush.msra.mxu1 %v4252_v40  ;;  %818 = vmatpush.msra.mxu0 %v4252_v40 }
 0x32e   :  { %851 = vmatpush.msra.mxu2 %v4252_v40  ;;  %884 = vmatpush.msra.mxu3 %v4252_v40 }
 0x32f   :  { %786 = vmatpush.msra.mxu1 %v4259_v39  ;;  %819 = vmatpush.msra.mxu0 %v4259_v39 }
 0x330   :  { %852 = vmatpush.msra.mxu2 %v4259_v39  ;;  %885 = vmatpush.msra.mxu3 %v4259_v39 }
 0x331   :  { %787 = vmatpush.msra.mxu1 %v4267_v37  ;;  %820 = vmatpush.msra.mxu0 %v4267_v37 }
 0x332   :  { %853 = vmatpush.msra.mxu2 %v4267_v37  ;;  %886 = vmatpush.msra.mxu3 %v4267_v37 }
 0x333   :  { %788 = vmatpush.msra.mxu1 %v4274_v35  ;;  %821 = vmatpush.msra.mxu0 %v4274_v35 }
 0x334   :  { %854 = vmatpush.msra.mxu2 %v4274_v35  ;;  %887 = vmatpush.msra.mxu3 %v4274_v35 }
 0x335   :  { %855 = vmatmul.f32.vlgmr.msra.gmra.mxu2 %v835_v33  ;;  %888 = vmatmul.f32.vlgmr.msra.gmra.mxu3 %v868_v15 }
 0x336   :  { %822 = vmatmul.f32.vlgmr.msra.gmra.mxu0 %v802_v31  ;;  %789 = vmatmul.f32.vlgmr.msra.gmra.mxu1 %v769_v18 }
 0x337   :  { %992 = vmatpush.msra.mxu1 %v968_v5  ;;  %1074 = vmatpush.msra.mxu2 %v1061_v47 }
 0x338   :  { %1041 = vmatpush.msra.mxu0 %v1016_v45 }
 0x339   :  { %993 = vmatpush.msra.mxu1 %v967_v7  ;;  %1075 = vmatpush.msra.mxu2 %v1060_v8 }
 0x33a   :  { %1042 = vmatpush.msra.mxu0 %v1015_v19 }
 0x33b   :  { %994 = vmatpush.msra.mxu1 %v966_v42  ;;  %1076 = vmatpush.msra.mxu2 %v1059_v43 }
 0x33d   :  { %858 = vmatmul.f32.gmra.mxu2 %v836_v44  ;;  %891 = vmatmul.f32.gmra.mxu3 %v869_v6  ;;  %v4385_v44 = vld [vmem:[%s5210_s0] sm:$0xff] }
 0x33e   :  { %825 = vmatmul.f32.gmra.mxu0 %v803_v24  ;;  %792 = vmatmul.f32.gmra.mxu1 %v770_v50 }
 0x33f   :  { %995 = vmatpush.msra.mxu1 %v965_v53  ;;  %1077 = vmatpush.msra.mxu2 %v1058_v3  ;;  %v4448_v3 = vld [vmem:[%s5211_s1] ss:$0 sm:$0xff] }
 0x341   :  { %996 = vmatpush.msra.mxu1 %v964_v55 }
 0x343   :  { %997 = vmatpush.msra.mxu1 %v963_v51 }
 0x345   :  { %861 = vmatmul.f32.gmra.mxu2 %v837_v52  ;;  %894 = vmatmul.f32.gmra.mxu3 %v870_v27 }
 0x346   :  { %828 = vmatmul.f32.gmra.mxu0 %v804_v9  ;;  %795 = vmatmul.f32.gmra.mxu1 %v771_v1 }
 0x347   :  { %998 = vmatpush.msra.mxu1 %v962_v26 }
 0x349   :  { %999 = vmatpush.msra.mxu1 %v961_v34  ;;  %v1085_v34 = vld [vmem:[%s5213_s3 + $0xe0] sm:$0xff] }
 0x34a   :  { %1098 = vmatpush.msra.mxu3 %v1085_v34 }
 0x34d   :  { %864 = vmatmul.f32.gmra.mxu2 %v838_v57  ;;  %897 = vmatmul.f32.gmra.mxu3 %v871_v61 }
 0x34e   :  { %831 = vmatmul.f32.gmra.mxu0 %v805_v30  ;;  %798 = vmatmul.f32.gmra.mxu1 %v772_v13 }
 0x355   :  { %3354 = vmatmul.msk.f32.vlgmr.msra.gmra.mxu2 %vm296_vm1, %v4385_v44 }
 0x3b3   :  { %v823_v2 = vpop.f32.mrf.mxu0  ;;  %v790_v25 = vpop.f32.mrf.mxu1 }
 0x3b4   :  { %905 = vrot.lane.b32.xlu2 %v823_v2, %s3737_s21 }
 0x3b8   :  { %v856_v10 = vpop.f32.mrf.mxu2  ;;  %v889_v11 = vpop.f32.mrf.mxu3 }
 0x3b9   :  { %921 = vrot.lane.b32.xlu0 %v856_v10, %s3738_s28  ;;  %937 = vrot.lane.b32.xlu1 %v889_v11, %s3739_s4 }
 0x3bb   :  { %v826_v62 = vpop.f32.mrf.mxu0  ;;  %v793_v15 = vpop.f32.mrf.mxu1 }
 0x3bc   :  { %907 = vrot.lane.b32.xlu2 %v826_v62, %s3737_s21 }
 0x3c0   :  { %v859_v60 = vpop.f32.mrf.mxu2  ;;  %v892_v48 = vpop.f32.mrf.mxu3 }
 0x3c1   :  { %923 = vrot.lane.b32.xlu0 %v859_v60, %s3738_s28  ;;  %v1014_v60 = vld [vmem:[%s5213_s3 + $0x90] sm:$0xff] }
 0x3c2   :  { %1043 = vmatpush.msra.mxu0 %v1014_v60 }
 0x3c3   :  { %v829_v58 = vpop.f32.mrf.mxu0  ;;  %v796_v52 = vpop.f32.mrf.mxu1 }
 0x3c4   :  { %909 = vrot.lane.b32.xlu1 %v829_v58, %s3737_s21  ;;  %939 = vrot.lane.b32.xlu2 %v892_v48, %s3739_s4  ;;  %v1013_v48 = vld [vmem:[%s5213_s3 + $0x88] sm:$0xff] }
 0x3c5   :  { %1044 = vmatpush.msra.mxu0 %v1013_v48  ;;  %v3611_v58 = vld [vmem:[%s5213_s3 + $0x2e8] ss:$0 sm:$0xff] }
 0x3c8   :  { %v862_v14 = vpop.f32.mrf.mxu2  ;;  %v895_v17 = vpop.f32.mrf.mxu3 }
 0x3c9   :  { %925 = vrot.lane.b32.xlu0 %v862_v14, %s3738_s28 }
 0x3cb   :  { %v832_v56 = vpop.f32.mrf.mxu0  ;;  %v799_v5 = vpop.f32.mrf.mxu1 }
 0x3cc   :  { %911 = vrot.lane.b32.xlu1 %v832_v56, %s3737_s21  ;;  %941 = vrot.lane.b32.xlu2 %v895_v17, %s3739_s4 }
 0x3d0   :  { %v865_v54 = vpop.f32.mrf.mxu2  ;;  %v898_v59 = vpop.f32.mrf.mxu3 }
 0x3d1   :  { %927 = vrot.lane.b32.xlu0 %v865_v54, %s3738_s28 }
 0x3d4   :  { %943 = vrot.lane.b32.xlu2 %v898_v59, %s3739_s4 }
 0x3d8   :  { %v1079_v56 = vpop.f32.mrf.mxu2 }
 0x3d9   :  { %3356 = vmatpush.xpose.msk.msra.mxu2 %vm296_vm1, %v1079_v56 }
 0x40e   :  { %v906_v49 = vpop.permute.xlu2 %905 }
 0x40f   :  { %v949_v41 = vsel %vm178_vm2, %v790_v25, %v906_v49  ;;  %v1084_v49 = vld [vmem:[%s5213_s3 + $0xd8] sm:$0xff]  ;;  %v1083_v25 = vld [vmem:[%s5213_s3 + $0xd0] sm:$0xff] }
 0x410   :  { %1099 = vmatpush.msra.mxu3 %v1084_v49 }
 0x412   :  { %1100 = vmatpush.msra.mxu3 %v1083_v25 }
 0x416   :  { %v908_v32 = vpop.permute.xlu2 %907 }
 0x417   :  { %v950_v6 = vsel %vm178_vm2, %v793_v15, %v908_v32  ;;  %v1082_v32 = vld [vmem:[%s5213_s3 + $0xc8] sm:$0xff] }
 0x418   :  { %1101 = vmatpush.msra.mxu3 %v1082_v32 }
 0x419   :  { %3355 = vmatmul.msk.f32.vlgmr.msra.gmra.mxu3 %vm296_vm1, %v4385_v44 }
 0x41e   :  { %v940_v18 = vpop.permute.xlu2 %939 }
 0x426   :  { %v942_v57 = vpop.permute.xlu2 %941 }
 0x42b   :  { %v922_v20 = vpop.permute.xlu0 %921  ;;  %v938_v4 = vpop.permute.xlu1 %937 }
 0x42c   :  { %v953_v33 = vsel %vm296_vm1, %v949_v41, %v922_v20 }
 0x42d   :  { %v957_v31 = vsel %vm62_vm0, %v953_v33, %v938_v4 }
 0x42e   :  { %3346 = vmatmul.msk.f32.vlgmr.msra.gmra.mxu1 %vm971_vm4, %v957_v31  ;;  %v944_v42 = vpop.permute.xlu2 %943 }
 0x433   :  { %v924_v24 = vpop.permute.xlu0 %923 }
 0x434   :  { %v954_v50 = vsel %vm296_vm1, %v950_v6, %v924_v24 }
 0x435   :  { %v958_v27 = vsel %vm62_vm0, %v954_v50, %v940_v18 }
 0x436   :  { %3347 = vmatmul.msk.f32.gmra.mxu1 %vm971_vm4, %v958_v27  ;;  %v910_v9 = vpop.permute.xlu1 %909 }
 0x437   :  { %v951_v61 = vsel %vm178_vm2, %v796_v52, %v910_v9 }
 0x43b   :  { %v926_v30 = vpop.permute.xlu0 %925 }
 0x43c   :  { %v955_v1 = vsel %vm296_vm1, %v951_v61, %v926_v30 }
 0x43d   :  { %v959_v13 = vsel %vm62_vm0, %v955_v1, %v942_v57 }
 0x43e   :  { %3348 = vmatmul.msk.f32.gmra.mxu1 %vm971_vm4, %v959_v13  ;;  %v912_v2 = vpop.permute.xlu1 %911 }
 0x43f   :  { %v952_v7 = vsel %vm178_vm2, %v799_v5, %v912_v2 }
 0x443   :  { %v928_v10 = vpop.permute.xlu0 %927 }
 0x444   :  { %v956_v11 = vsel %vm296_vm1, %v952_v7, %v928_v10 }
 0x445   :  { %v960_v62 = vsel %vm62_vm0, %v956_v11, %v944_v42 }
 0x446   :  { %3349 = vmatmul.msk.f32.gmra.mxu1 %vm971_vm4, %v960_v62 }
 0x49c   :  { %v1103_v27 = vpop.f32.mrf.mxu3 }
 0x49d   :  { %1213 = vmatpush.msra.mxu3 %v1103_v27 }
 0x4ab   :  { %v1001_v14 = vpop.f32.mrf.mxu1 }
 0x4ac   :  { %v4410_v17 = vadd.f32 %v3611_v58, %v1001_v14 }
 0x4ae   :  { %3350 = vmatmul.msk.f32.vlgmr.msra.gmra.mxu0 %vm296_vm1, %v4410_v17 }
 0x4b3   :  { %v1004_v54 = vpop.f32.mrf.mxu1 }
 0x4b4   :  { %v4415_v59 = vadd.f32 %v3611_v58, %v1004_v54 }
 0x4b6   :  { %3351 = vmatmul.msk.f32.gmra.mxu0 %vm296_vm1, %v4415_v59 }
 0x4bb   :  { %v1007_v53 = vpop.f32.mrf.mxu1 }
 0x4bc   :  { %v4419_v55 = vadd.f32 %v3611_v58, %v1007_v53 }
 0x4be   :  { %3352 = vmatmul.msk.f32.gmra.mxu0 %vm296_vm1, %v4419_v55 }
 0x4c3   :  { %v1010_v51 = vpop.f32.mrf.mxu1 }
 0x4c4   :  { %v4423_v26 = vadd.f32 %v3611_v58, %v1010_v51 }
 0x4c6   :  { %3353 = vmatmul.msk.f32.gmra.mxu0 %vm296_vm1, %v4423_v26 }
 0x52b   :  { %v1046_v47 = vpop.f32.mrf.mxu0 }
 0x52c   :  { %3357 = vmatmul.msk.f32.vlgmr.msra.gmra.mxu2 %vm296_vm1, %v1046_v47 }
 0x533   :  { %v1049_v8 = vpop.f32.mrf.mxu0 }
 0x534   :  { %3358 = vmatmul.msk.f32.gmra.mxu2 %vm296_vm1, %v1049_v8 }
 0x53b   :  { %v1052_v45 = vpop.f32.mrf.mxu0 }
 0x53c   :  { %3359 = vmatmul.msk.f32.gmra.mxu2 %vm296_vm1, %v1052_v45 }
 0x543   :  { %v1055_v19 = vpop.f32.mrf.mxu0 }
 0x544   :  { %3360 = vmatmul.msk.f32.gmra.mxu2 %vm296_vm1, %v1055_v19 }
 0x5af   :  { %v1138_v43 = vpop.f32.mrf.mxu2 }
 0x5b0   :  { %v1139_v41 = vadd.f32 %v4448_v3, %v1138_v43 }
 0x5b2   :  { %v1150_v20 = vsel %vm463_vm3, %v1139_v41, -inf }
 0x5b3   :  { %1151 = vmax.xlane.f32.xlu1 %v1150_v20 }
 0x5b7   :  { %v1141_v4 = vpop.f32.mrf.mxu2 }
 0x5b8   :  { %v1142_v33 = vadd.f32 %v4448_v3, %v1141_v4 }
 0x5ba   :  { %v1153_v15 = vsel %vm463_vm3, %v1142_v33, -inf }
 0x5bb   :  { %1154 = vmax.xlane.f32.xlu0 %v1153_v15 }
 0x5bf   :  { %v1144_v31 = vpop.f32.mrf.mxu2 }
 0x5c0   :  { %v1145_v18 = vadd.f32 %v4448_v3, %v1144_v31 }
 0x5c2   :  { %v1156_v6 = vsel %vm463_vm3, %v1145_v18, -inf }
 0x5c3   :  { %1157 = vmax.xlane.f32.xlu2 %v1156_v6 }
 0x5c7   :  { %v1147_v24 = vpop.f32.mrf.mxu2 }
 0x5c8   :  { %v1148_v50 = vadd.f32 %v4448_v3, %v1147_v24 }
 0x5ca   :  { %v1159_v52 = vsel %vm463_vm3, %v1148_v50, -inf }
 0x5cb   :  { %1160 = vmax.xlane.f32.xlu1 %v1159_v52 }
 0x626   :  { %v1152_v9 = vpop.xlane.xlu1 %1151 }
 0x627   :  { %v1162_v57 = vsub.f32 %v1139_v41, %v1152_v9 }
 0x629   :  { %v1166_v61 = vmul.f32 1.442695, %v1162_v57 }
 0x62b   :  { %3682 = vpow2.f32 %v1166_v61  ;;  %v1366_v61 = vld [vmem:[%s5213_s3 + $0x388] sm:$0xff] }
 0x62c   :  { %1369 = vmatpush.msra.mxu2 %v1366_v61 }
 0x62e   :  { %v1155_v30 = vpop.xlane.xlu0 %1154 }
 0x62f   :  { %v1163_v1 = vsub.f32 %v1142_v33, %v1155_v30  ;;  %v1365_v30 = vld [vmem:[%s5213_s3 + $0x380] sm:$0xff] }
 0x630   :  { %1370 = vmatpush.msra.mxu2 %v1365_v30 }
 0x631   :  { %v3683_v13 = vpop.eup %3682  ;;  %v1168_v2 = vmul.f32 1.442695, %v1163_v1  ;;  %v1364_v1 = vld [vmem:[%s5213_s3 + $0x378] sm:$0xff] }
 0x632   :  { %3361 = vmatmul.msk.f32.vlgmr.msra.gmra.mxu3 %vm463_vm3, %v3683_v13  ;;  %v1174_v53 = vsel %vm463_vm3, %v3683_v13, 0.0  ;;  %v1363_v13 = vld [vmem:[%s5213_s3 + $0x370] sm:$0xff]  ;;  %1371 = vmatpush.msra.mxu2 %v1364_v1 }
 0x633   :  { %3684 = vpow2.f32 %v1168_v2  ;;  %v1362_v2 = vld [vmem:[%s5213_s3 + $0x368] sm:$0xff] }
 0x634   :  { %1372 = vmatpush.msra.mxu2 %v1363_v13 }
 0x636   :  { %v1158_v5 = vpop.xlane.xlu2 %1157  ;;  %1373 = vmatpush.msra.mxu2 %v1362_v2 }
 0x637   :  { %v1164_v7 = vsub.f32 %v1145_v18, %v1158_v5  ;;  %v1361_v5 = vld [vmem:[%s5213_s3 + $0x360] sm:$0xff] }
 0x638   :  { %1374 = vmatpush.msra.mxu2 %v1361_v5 }
 0x639   :  { %v3685_v42 = vpop.eup %3684  ;;  %v1170_v10 = vmul.f32 1.442695, %v1164_v7  ;;  %v1360_v7 = vld [vmem:[%s5213_s3 + $0x358] sm:$0xff] }
 0x63a   :  { %3362 = vmatmul.msk.f32.gmra.mxu3 %vm463_vm3, %v3685_v42  ;;  %v1177_v11 = vsel %vm463_vm3, %v3685_v42, 0.0  ;;  %v1359_v42 = vld [vmem:[%s5213_s3 + $0x350] sm:$0xff]  ;;  %1375 = vmatpush.msra.mxu2 %v1360_v7 }
 0x63b   :  { %3686 = vpow2.f32 %v1170_v10  ;;  %1178 = vadd.xlane.f32.xlu1 %v1177_v11  ;;  %v1358_v10 = vld [vmem:[%s5213_s3 + $0x348] sm:$0xff]  ;;  %v1357_v11 = vld [vmem:[%s5213_s3 + $0x340] sm:$0xff] }
 0x63c   :  { %1376 = vmatpush.msra.mxu2 %v1359_v42 }
 0x63e   :  { %v1161_v62 = vpop.xlane.xlu1 %1160  ;;  %1377 = vmatpush.msra.mxu2 %v1358_v10 }
 0x63f   :  { %v1165_v60 = vsub.f32 %v1148_v50, %v1161_v62  ;;  %v1356_v62 = vld [vmem:[%s5213_s3 + $0x338] sm:$0xff] }
 0x640   :  { %1378 = vmatpush.msra.mxu2 %v1357_v11 }
 0x641   :  { %v3687_v48 = vpop.eup %3686  ;;  %v1172_v58 = vmul.f32 1.442695, %v1165_v60  ;;  %v1355_v60 = vld [vmem:[%s5213_s3 + $0x330] sm:$0xff] }
 0x642   :  { %3363 = vmatmul.msk.f32.gmra.mxu3 %vm463_vm3, %v3687_v48  ;;  %v1180_v14 = vsel %vm463_vm3, %v3687_v48, 0.0  ;;  %1379 = vmatpush.msra.mxu2 %v1356_v62  ;;  %v1354_v48 = vld [vmem:[%s5213_s3 + $0x328] sm:$0xff] }
 0x643   :  { %3688 = vpow2.f32 %v1172_v58  ;;  %1181 = vadd.xlane.f32.xlu2 %v1180_v14  ;;  %v1353_v58 = vld [vmem:[%s5213_s3 + $0x320] sm:$0xff]  ;;  %v1352_v14 = vld [vmem:[%s5213_s3 + $0x318] sm:$0xff] }
 0x644   :  { %1380 = vmatpush.msra.mxu2 %v1355_v60 }
 0x646   :  { %1381 = vmatpush.msra.mxu2 %v1354_v48 }
 0x648   :  { %1382 = vmatpush.msra.mxu2 %v1353_v58 }
 0x649   :  { %v3689_v56 = vpop.eup %3688 }
 0x64a   :  { %3364 = vmatmul.msk.f32.gmra.mxu3 %vm463_vm3, %v3689_v56  ;;  %v1183_v54 = vsel %vm463_vm3, %v3689_v56, 0.0  ;;  %1383 = vmatpush.msra.mxu2 %v1352_v14  ;;  %v1351_v56 = vld [vmem:[%s5213_s3 + $0x310] sm:$0xff] }
 0x64b   :  { %1184 = vadd.xlane.f32.xlu0 %v1183_v54  ;;  %v1396_v54 = vld [vmem:[%s5213_s3 + $0x120] sm:$0xff] }
 0x64c   :  { %1384 = vmatpush.msra.mxu2 %v1351_v56  ;;  %1408 = vmatpush.msra.mxu3 %v1396_v54  ;;  %v1553_v56 = vld [vmem:[%s5213_s3 + $0x3a0] sm:$0x3]  ;;  %v1601_v54 = vld [vmem:[%s5213_s3 + $0x3b0] sm:$0x3] }
 0x653   :  { %1175 = vadd.xlane.f32.xlu0 %v1174_v53  ;;  %v1395_v53 = vld [vmem:[%s5213_s3 + $0x118] sm:$0xff] }
 0x654   :  { %1409 = vmatpush.msra.mxu3 %v1395_v53  ;;  %v1529_v53 = vld [vmem:[%s5213_s3 + $0x398] sm:$0x3] }
 0x6ae   :  { %v1179_v32 = vpop.xlane.xlu1 %1178 }
 0x6b5   :  { %v1215_v51 = vpop.f32.mrf.mxu3 }
 0x6b6   :  { %v1182_v25 = vpop.xlane.xlu2 %1181 }
 0x6b7   :  { %3690 = vrcp.f32 %v1182_v25  ;;  %v1391_v25 = vld [vmem:[%s5213_s3 + $0xf8] sm:$0xff] }
 0x6bd   :  { %v1218_v34 = vpop.f32.mrf.mxu3  ;;  %v3691_v45 = vpop.eup %3690 }
 0x6be   :  { %v1185_v49 = vpop.xlane.xlu0 %1184 }
 0x6bf   :  { %3692 = vrcp.f32 %v1185_v49  ;;  %v1392_v49 = vld [vmem:[%s5213_s3 + $0x100] sm:$0xff] }
 0x6c0   :  { %3694 = vrcp.f32 %v1179_v32 }
 0x6c5   :  { %v1221_v47 = vpop.f32.mrf.mxu3  ;;  %v3693_v19 = vpop.eup %3692 }
 0x6c6   :  { %v1176_v8 = vpop.xlane.xlu0 %1175  ;;  %v3695_v41 = vpop.eup %3694  ;;  %v1233_v20 = vmul.f32 %v3691_v45, %v1221_v47 }
 0x6c7   :  { %3696 = vrcp.f32 %v1176_v8  ;;  %v1232_v15 = vmul.f32 %v3695_v41, %v1218_v34  ;;  %v1393_v34 = vld [vmem:[%s5213_s3 + $0x108] sm:$0xff]  ;;  %v1390_v41 = vld [vmem:[%s5213_s3 + $0xf0] sm:$0xff] }
 0x6c8   :  { %v4470_v18 = vadd.f32 %v1233_v20, %v4419_v55  ;;  %v1239_v55 = vld [vmem:[%s5213_s3 + $0x2f0] sm:$0xff]  ;;  %v1389_v20 = vld [vmem:[%s5213_s3 + $0xe8] sm:$0xff] }
 0x6c9   :  { %v4475_v24 = vadd.f32 %v1232_v15, %v4415_v59  ;;  %v1263_v59 = vld [vmem:[%s5213_s3 + $0x2f8] sm:$0xff] }
 0x6cd   :  { %v1224_v43 = vpop.f32.mrf.mxu3  ;;  %v3697_v33 = vpop.eup %3696 }
 0x6ce   :  { %v1234_v4 = vmul.f32 %v3693_v19, %v1224_v43  ;;  %v1231_v6 = vmul.f32 %v3697_v33, %v1215_v51  ;;  %v1394_v51 = vld [vmem:[%s5213_s3 + $0x110] sm:$0xff] }
 0x6cf   :  { %1410 = vmatpush.msra.mxu3 %v1394_v51  ;;  %v1577_v51 = vld [vmem:[%s5213_s3 + $0x3a8] sm:$0x3] }
 0x6d0   :  { %v4467_v31 = vadd.f32 %v1234_v4, %v4423_v26  ;;  %v4480_v50 = vadd.f32 %v1231_v6, %v4410_v17  ;;  %v1287_v17 = vld [vmem:[%s5213_s3 + $0x300] sm:$0xff]  ;;  %v1311_v26 = vld [vmem:[%s5213_s3 + $0x308] sm:$0xff]  ;;  %v3612_v4 = vld [vmem:[%s5213_s3 + $0x390] ss:$0 sm:$0xff] }
 0x6d1   :  { %1411 = vmatpush.msra.mxu3 %v1393_v34  ;;  %v1423_v6 = vld [vmem:[%s5213_s3 + $0x140] sm:$0xff]  ;;  %v1650_v34 = vld [vmem:[%s5213_s3 + $0x430] sm:$0xff] }
 0x6d2   :  { %1255 = vmatpush.msra.mxu1 %v4467_v31  ;;  %1279 = vmatpush.msra.mxu0 %v4467_v31 }
 0x6d3   :  { %1412 = vmatpush.msra.mxu3 %v1392_v49  ;;  %v1649_v49 = vld [vmem:[%s5213_s3 + $0x428] sm:$0xff] }
 0x6d4   :  { %1256 = vmatpush.msra.mxu1 %v4470_v18  ;;  %1280 = vmatpush.msra.mxu0 %v4470_v18 }
 0x6d5   :  { %1413 = vmatpush.msra.mxu3 %v1391_v25  ;;  %v1666_v25 = vld [vmem:[%s5213_s3 + $0x4b0] sm:$0xff] }
 0x6d6   :  { %1257 = vmatpush.msra.mxu1 %v4475_v24  ;;  %1281 = vmatpush.msra.mxu0 %v4475_v24 }
 0x6d7   :  { %1414 = vmatpush.msra.mxu3 %v1390_v41  ;;  %v1662_v41 = vld [vmem:[%s5213_s3 + $0x490] sm:$0xff] }
 0x6d8   :  { %1258 = vmatpush.msra.mxu1 %v4480_v50  ;;  %1282 = vmatpush.msra.mxu0 %v4480_v50 }
 0x6d9   :  { %3365 = vmatmul.msk.f32.vlgmr.msra.gmra.mxu1 %vm296_vm1, %v1239_v55  ;;  %3366 = vmatmul.msk.f32.vlgmr.msra.gmra.mxu0 %vm296_vm1, %v1263_v59  ;;  %v1422_v55 = vld [vmem:[%s5213_s3 + $0x138] sm:$0xff]  ;;  %v1421_v59 = vld [vmem:[%s5213_s3 + $0x130] sm:$0xff] }
 0x6da   :  { %1303 = vmatpush.msra.mxu1 %v4467_v31  ;;  %1327 = vmatpush.msra.mxu0 %v4467_v31 }
 0x6db   :  { %1415 = vmatpush.msra.mxu3 %v1389_v20  ;;  %v1645_v20 = vld [vmem:[%s5213_s3 + $0x408] sm:$0xff] }
 0x6dc   :  { %1304 = vmatpush.msra.mxu1 %v4470_v18  ;;  %1328 = vmatpush.msra.mxu0 %v4470_v18 }
 0x6de   :  { %1305 = vmatpush.msra.mxu1 %v4475_v24  ;;  %1329 = vmatpush.msra.mxu0 %v4475_v24 }
 0x6e0   :  { %1306 = vmatpush.msra.mxu1 %v4480_v50  ;;  %1330 = vmatpush.msra.mxu0 %v4480_v50 }
 0x6e1   :  { %3367 = vmatmul.msk.f32.vlgmr.msra.gmra.mxu1 %vm296_vm1, %v1287_v17  ;;  %3368 = vmatmul.msk.f32.vlgmr.msra.gmra.mxu0 %vm296_vm1, %v1311_v26  ;;  %v1420_v17 = vld [vmem:[%s5213_s3 + $0x128] sm:$0xff]  ;;  %v1447_v26 = vld [vmem:[%s5213_s3 + $0x160] sm:$0xff] }
 0x756   :  { %v1260_v52 = vpop.f32.mrf.mxu1  ;;  %v1284_v27 = vpop.f32.mrf.mxu0 }
 0x757   :  { %1336 = vrot.lane.b32.xlu2 %v1284_v27, %s3738_s28  ;;  %v1445_v27 = vld [vmem:[%s5213_s3 + $0x150] sm:$0xff] }
 0x75e   :  { %v1308_v9 = vpop.f32.mrf.mxu1  ;;  %v1332_v57 = vpop.f32.mrf.mxu0 }
 0x75f   :  { %1340 = vrot.lane.b32.xlu1 %v1308_v9, %s3740_s23  ;;  %1344 = vrot.lane.b32.xlu0 %v1332_v57, %s3741_s24  ;;  %v1444_v9 = vld [vmem:[%s5213_s3 + $0x148] sm:$0xff] }
 0x7b1   :  { %v1337_v32 = vpop.permute.xlu2 %1336 }
 0x7b2   :  { %v1347_v47 = vsel %vm296_vm1, %v1260_v52, %v1337_v32  ;;  %v1446_v52 = vld [vmem:[%s5213_s3 + $0x158] sm:$0xff]  ;;  %v1648_v32 = vld [vmem:[%s5213_s3 + $0x420] sm:$0xff] }
 0x7d1   :  { %v1341_v8 = vpop.permute.xlu1 %1340  ;;  %v1345_v45 = vpop.permute.xlu0 %1344 }
 0x7d2   :  { %v1348_v19 = vsel %vm971_vm4, %v1347_v47, %v1341_v8  ;;  %v1665_v47 = vld [vmem:[%s5213_s3 + $0x4a8] sm:$0xff]  ;;  %v1664_v8 = vld [vmem:[%s5213_s3 + $0x4a0] sm:$0xff] }
 0x7d3   :  { %v1350_v43 = vsel %vm1349_vm5, %v1348_v19, %v1345_v45  ;;  %v1647_v45 = vld [vmem:[%s5213_s3 + $0x418] sm:$0xff] }
 0x7d4   :  { %1385 = vmatmul.f32.vlgmr.msra.gmra.mxu2 %v1350_v43  ;;  %v1663_v19 = vld [vmem:[%s5213_s3 + $0x498] sm:$0xff]  ;;  %v1646_v43 = vld [vmem:[%s5213_s3 + $0x410] sm:$0xff] }
 0x7d5   :  { %1460 = vmatpush.msra.mxu2 %v1447_v26  ;;  %v1641_v26 = vld [vmem:[%s5213_s3 + $0x3e8] sm:$0xff] }
 0x7d7   :  { %1461 = vmatpush.msra.mxu2 %v1446_v52  ;;  %v1657_v52 = vld [vmem:[%s5213_s3 + $0x468] sm:$0xff] }
 0x7d9   :  { %1462 = vmatpush.msra.mxu2 %v1445_v27  ;;  %v1640_v27 = vld [vmem:[%s5213_s3 + $0x3e0] sm:$0xff] }
 0x7db   :  { %1463 = vmatpush.msra.mxu2 %v1444_v9  ;;  %v1656_v9 = vld [vmem:[%s5213_s3 + $0x460] sm:$0xff] }
 0x7dc   :  { %3371 = vmatmul.msk.f32.vlgmr.msra.gmra.mxu2 %vm296_vm1, %v4385_v44 }
 0x857   :  { %v1386_v33 = vpop.f32.mrf.mxu2 }
 0x858   :  { %v1387_v15 = vadd.f32 %v3612_v4, %v1386_v33  ;;  %v1661_v4 = vld [vmem:[%s5213_s3 + $0x488] sm:$0xff]  ;;  %v1644_v33 = vld [vmem:[%s5213_s3 + $0x400] sm:$0xff] }
 0x85a   :  { %3369 = vmatmul.msk.f32.vlgmr.msra.gmra.mxu3 %vm971_vm4, %v1387_v15 }
 0x85b   :  { %1436 = vmatpush.msra.mxu3 %v1423_v6  ;;  %v1643_v6 = vld [vmem:[%s5213_s3 + $0x3f8] sm:$0xff] }
 0x85d   :  { %1437 = vmatpush.msra.mxu3 %v1422_v55  ;;  %v1659_v55 = vld [vmem:[%s5213_s3 + $0x478] sm:$0xff] }
 0x85f   :  { %1438 = vmatpush.msra.mxu3 %v1421_v59  ;;  %v1465_v2 = vpop.f32.mrf.mxu2  ;;  %v1642_v59 = vld [vmem:[%s5213_s3 + $0x3f0] sm:$0xff] }
 0x860   :  { %1521 = vmatpush.msra.mxu2 %v1465_v2  ;;  %v1636_v2 = vld [vmem:[%s5213_s3 + $0x3c0] sm:$0xff] }
 0x861   :  { %1439 = vmatpush.msra.mxu3 %v1420_v17  ;;  %v1658_v17 = vld [vmem:[%s5213_s3 + $0x470] sm:$0xff] }
 0x862   :  { %3370 = vmatmul.msk.f32.vlgmr.msra.gmra.mxu3 %vm296_vm1, %v4385_v44 }
 0x8dd   :  { %v1417_v57 = vpop.f32.mrf.mxu3 }
 0x8e5   :  { %v1441_v61 = vpop.f32.mrf.mxu3 }
 0x8e6   :  { %3372 = vmatpush.xpose.msk.msra.mxu1 %vm296_vm1, %v1441_v61  ;;  %v1655_v61 = vld [vmem:[%s5213_s3 + $0x458] sm:$0xff] }
 0x8e9   :  { %3373 = vmatmul.msk.f32.vlgmr.msra.gmra.mxu1 %vm296_vm1, %v1417_v57  ;;  %v1639_v57 = vld [vmem:[%s5213_s3 + $0x3d8] sm:$0xff] }
 0x966   :  { %v1491_v30 = vpop.f32.mrf.mxu1 }
 0x967   :  { %v1492_v1 = vadd.f32 %v4448_v3, %v1491_v30  ;;  %v1638_v30 = vld [vmem:[%s5213_s3 + $0x3d0] sm:$0xff] }
 0x969   :  { %v1494_v13 = vsel %vm463_vm3, %v1492_v1, -inf }
 0x96a   :  { %1495 = vmax.xlane.f32.xlu2 %v1494_v13  ;;  %v1637_v13 = vld [vmem:[%s5213_s3 + $0x3c8] sm:$0xff] }
 0x9dd   :  { %v1496_v5 = vpop.xlane.xlu2 %1495 }
 0x9de   :  { %v1497_v7 = vsub.f32 %v1492_v1, %v1496_v5 }
 0x9e0   :  { %v1498_v42 = vmul.f32 1.442695, %v1497_v7  ;;  %v1635_v7 = vld [vmem:[%s5213_s3 + $0x3b8] sm:$0xff] }
 0x9e2   :  { %3698 = vpow2.f32 %v1498_v42  ;;  %v1654_v42 = vld [vmem:[%s5213_s3 + $0x450] sm:$0xff] }
 0x9e8   :  { %v3699_v10 = vpop.eup %3698 }
 0x9e9   :  { %3374 = vmatmul.msk.f32.vlgmr.msra.gmra.mxu2 %vm463_vm3, %v3699_v10  ;;  %v1500_v11 = vsel %vm463_vm3, %v3699_v10, 0.0  ;;  %v1653_v10 = vld [vmem:[%s5213_s3 + $0x448] sm:$0xff] }
 0x9ea   :  { %1501 = vadd.xlane.f32.xlu0 %v1500_v11  ;;  %v1652_v11 = vld [vmem:[%s5213_s3 + $0x440] sm:$0xff] }
 0xa5d   :  { %v1502_v62 = vpop.xlane.xlu0 %1501 }
 0xa5e   :  { %3700 = vrcp.f32 %v1502_v62  ;;  %v1651_v62 = vld [vmem:[%s5213_s3 + $0x438] sm:$0xff] }
 0xa64   :  { %v3701_v60 = vpop.eup %3700 }
 0xa6c   :  { %v1523_v48 = vpop.f32.mrf.mxu2 }
 0xa6d   :  { %v1527_v58 = vmul.f32 %v3701_v60, %v1523_v48  ;;  %v1724_v60 = vld [vmem:[%s5213_s3 + $0x1e0] sm:$0xff]  ;;  %v1723_v48 = vld [vmem:[%s5213_s3 + $0x1d8] sm:$0xff] }
 0xa6f   :  { %v4624_v14 = vadd.f32 %v1527_v58, %v1387_v15  ;;  %v1660_v15 = vld [vmem:[%s5213_s3 + $0x480] sm:$0xff]  ;;  %v1722_v58 = vld [vmem:[%s5213_s3 + $0x1d0] sm:$0xff] }
 0xa71   :  { %1548 = vmatpush.msra.mxu3 %v4624_v14  ;;  %1572 = vmatpush.msra.mxu0 %v4624_v14 }
 0xa72   :  { %1596 = vmatpush.msra.mxu1 %v4624_v14  ;;  %1620 = vmatpush.msra.mxu2 %v4624_v14 }
 0xa73   :  { %3376 = vmatmul.msk.f32.vlgmr.msra.gmra.mxu0 %vm463_vm3, %v1553_v56  ;;  %3378 = vmatmul.msk.f32.vlgmr.msra.gmra.mxu2 %vm463_vm3, %v1601_v54  ;;  %v1748_v56 = vld [vmem:[%s5213_s3 + $0x200] sm:$0xff]  ;;  %v1747_v54 = vld [vmem:[%s5213_s3 + $0x1f8] sm:$0xff] }
 0xa74   :  { %3375 = vmatmul.msk.f32.vlgmr.msra.gmra.mxu3 %vm463_vm3, %v1529_v53  ;;  %3377 = vmatmul.msk.f32.vlgmr.msra.gmra.mxu1 %vm463_vm3, %v1577_v51  ;;  %v1721_v51 = vld [vmem:[%s5213_s3 + $0x1c8] sm:$0xff] }
 0xa75   :  { %1669 = vmatpush.msra.mxu3 %v1650_v34  ;;  %1689 = vmatpush.msra.mxu0 %v1666_v25  ;;  %v1746_v34 = vld [vmem:[%s5213_s3 + $0x1f0] sm:$0xff]  ;;  %v1720_v25 = vld [vmem:[%s5213_s3 + $0x1c0] sm:$0xff] }
 0xa76   :  { %1725 = vmatpush.msra.mxu1 %v1724_v60  ;;  %1761 = vmatpush.msra.mxu2 %v1748_v56 }
 0xa77   :  { %1670 = vmatpush.msra.mxu3 %v1649_v49  ;;  %1690 = vmatpush.msra.mxu0 %v1665_v47 }
 0xa78   :  { %1726 = vmatpush.msra.mxu1 %v1723_v48  ;;  %1762 = vmatpush.msra.mxu2 %v1747_v54 }
 0xa79   :  { %1671 = vmatpush.msra.mxu3 %v1648_v32  ;;  %1691 = vmatpush.msra.mxu0 %v1664_v8  ;;  %v1745_v32 = vld [vmem:[%s5213_s3 + $0x1e8] sm:$0xff]  ;;  %v1719_v8 = vld [vmem:[%s5213_s3 + $0x1b8] sm:$0xff] }
 0xa7a   :  { %1727 = vmatpush.msra.mxu1 %v1722_v58  ;;  %1763 = vmatpush.msra.mxu2 %v1746_v34 }
 0xa7b   :  { %1672 = vmatpush.msra.mxu3 %v1647_v45  ;;  %1692 = vmatpush.msra.mxu0 %v1663_v19  ;;  %v1718_v45 = vld [vmem:[%s5213_s3 + $0x1b0] sm:$0xff] }
 0xa7c   :  { %1728 = vmatpush.msra.mxu1 %v1721_v51  ;;  %1764 = vmatpush.msra.mxu2 %v1745_v32 }
 0xa7d   :  { %1673 = vmatpush.msra.mxu3 %v1646_v43  ;;  %1693 = vmatpush.msra.mxu0 %v1662_v41  ;;  %v1717_v43 = vld [vmem:[%s5213_s3 + $0x1a8] sm:$0xff] }
 0xa7e   :  { %1729 = vmatpush.msra.mxu1 %v1720_v25  ;;  %3379 = vmatmul.msk.f32.vlgmr.msra.gmra.mxu2 %vm296_vm1, %v4385_v44 }
 0xa7f   :  { %1674 = vmatpush.msra.mxu3 %v1645_v20  ;;  %1694 = vmatpush.msra.mxu0 %v1661_v4  ;;  %v1907_v20 = vld [vmem:[%s5213_s3 + $0x580] sm:$0xff] }
 0xa80   :  { %1730 = vmatpush.msra.mxu1 %v1719_v8  ;;  %v1716_v4 = vld [vmem:[%s5213_s3 + $0x1a0] sm:$0xff] }
 0xa81   :  { %1675 = vmatpush.msra.mxu3 %v1644_v33  ;;  %1695 = vmatpush.msra.mxu0 %v1660_v15  ;;  %v1906_v15 = vld [vmem:[%s5213_s3 + $0x578] sm:$0xff] }
 0xa82   :  { %1731 = vmatpush.msra.mxu1 %v1718_v45 }
 0xa83   :  { %1676 = vmatpush.msra.mxu3 %v1643_v6  ;;  %1696 = vmatpush.msra.mxu0 %v1659_v55  ;;  %v1715_v6 = vld [vmem:[%s5213_s3 + $0x198] sm:$0xff]  ;;  %v1905_v55 = vld [vmem:[%s5213_s3 + $0x570] sm:$0xff] }
 0xa84   :  { %1732 = vmatpush.msra.mxu1 %v1717_v43 }
 0xa85   :  { %1677 = vmatpush.msra.mxu3 %v1642_v59  ;;  %1697 = vmatpush.msra.mxu0 %v1658_v17  ;;  %v1714_v59 = vld [vmem:[%s5213_s3 + $0x190] sm:$0xff]  ;;  %v1904_v17 = vld [vmem:[%s5213_s3 + $0x568] sm:$0xff] }
 0xa86   :  { %1733 = vmatpush.msra.mxu1 %v1716_v4  ;;  %v1899_v4 = vld [vmem:[%s5213_s3 + $0x540] sm:$0xff] }
 0xa87   :  { %1678 = vmatpush.msra.mxu3 %v1641_v26  ;;  %1698 = vmatpush.msra.mxu0 %v1657_v52  ;;  %v1713_v26 = vld [vmem:[%s5213_s3 + $0x188] sm:$0xff]  ;;  %v1903_v52 = vld [vmem:[%s5213_s3 + $0x560] sm:$0xff] }
 0xa88   :  { %1734 = vmatpush.msra.mxu1 %v1715_v6  ;;  %v1897_v6 = vld [vmem:[%s5213_s3 + $0x530] sm:$0xff] }
 0xa89   :  { %1679 = vmatpush.msra.mxu3 %v1640_v27  ;;  %1699 = vmatpush.msra.mxu0 %v1656_v9  ;;  %v1712_v27 = vld [vmem:[%s5213_s3 + $0x180] sm:$0xff]  ;;  %v1902_v9 = vld [vmem:[%s5213_s3 + $0x558] sm:$0xff] }
 0xa8a   :  { %1735 = vmatpush.msra.mxu1 %v1714_v59  ;;  %v1896_v59 = vld [vmem:[%s5213_s3 + $0x528] sm:$0xff] }
 0xa8b   :  { %1680 = vmatpush.msra.mxu3 %v1639_v57  ;;  %1700 = vmatpush.msra.mxu0 %v1655_v61  ;;  %v1901_v57 = vld [vmem:[%s5213_s3 + $0x550] sm:$0xff]  ;;  %v1900_v61 = vld [vmem:[%s5213_s3 + $0x548] sm:$0xff] }
 0xa8c   :  { %1736 = vmatpush.msra.mxu1 %v1713_v26  ;;  %v1894_v26 = vld [vmem:[%s5213_s3 + $0x518] sm:$0xff] }
 0xa8d   :  { %1681 = vmatpush.msra.mxu3 %v1638_v30  ;;  %1701 = vmatpush.msra.mxu0 %v1654_v42  ;;  %v1711_v30 = vld [vmem:[%s5213_s3 + $0x178] sm:$0xff] }
 0xa8e   :  { %1737 = vmatpush.msra.mxu1 %v1712_v27  ;;  %v3613_v42 = vld [vmem:[%s5213_s3 + $0x4b8] ss:$0 sm:$0xff]  ;;  %v1892_v27 = vld [vmem:[%s5213_s3 + $0x508] sm:$0xff] }
 0xa8f   :  { %1682 = vmatpush.msra.mxu3 %v1637_v13  ;;  %1702 = vmatpush.msra.mxu0 %v1653_v10  ;;  %v1709_v13 = vld [vmem:[%s5213_s3 + $0x168] sm:$0xff] }
 0xa90   :  { %1738 = vmatpush.msra.mxu1 %v1711_v30  ;;  %v1887_v30 = vld [vmem:[%s5213_s3 + $0x4e0] sm:$0xff] }
 0xa91   :  { %1683 = vmatpush.msra.mxu3 %v1636_v2  ;;  %1703 = vmatpush.msra.mxu0 %v1652_v11  ;;  %v1772_v2 = vld [vmem:[%s5213_s3 + $0x220] sm:$0xff] }
 0xa92   :  { %1785 = vmatpush.msra.mxu2 %v1772_v2  ;;  %v3614_v2 = vld [vmem:[%s5213_s3 + $0x588] ss:$0 sm:$0xff] }
 0xa93   :  { %1684 = vmatpush.msra.mxu3 %v1635_v7  ;;  %1704 = vmatpush.msra.mxu0 %v1651_v62  ;;  %v1769_v7 = vld [vmem:[%s5213_s3 + $0x208] sm:$0xff] }
 0xaf0   :  { %v1574_v1 = vpop.f32.mrf.mxu0 }
 0xaf1   :  { %1626 = vrot.lane.b32.xlu1 %v1574_v1, %s3740_s23  ;;  %v1598_v19 = vpop.f32.mrf.mxu1  ;;  %v1710_v1 = vld [vmem:[%s5213_s3 + $0x170] sm:$0xff] }
 0xaf2   :  { %1739 = vmatpush.msra.mxu1 %v1710_v1  ;;  %v1885_v1 = vld [vmem:[%s5213_s3 + $0x4d0] sm:$0xff] }
 0xaf4   :  { %1740 = vmatpush.msra.mxu1 %v1709_v13  ;;  %v1884_v13 = vld [vmem:[%s5213_s3 + $0x4c8] sm:$0xff] }
 0xaf6   :  { %v1622_v5 = vpop.f32.mrf.mxu2 }
 0xaf7   :  { %v1550_v53 = vpop.f32.mrf.mxu3 }
 0xaf9   :  { %1630 = vrot.lane.b32.xlu1 %v1622_v5, %s3740_s23  ;;  %v1770_v5 = vld [vmem:[%s5213_s3 + $0x210] sm:$0xff] }
 0xb01   :  { %v1766_v60 = vpop.f32.mrf.mxu2 }
 0xb63   :  { %v1627_v49 = vpop.permute.xlu1 %1626 }
 0xb64   :  { %v1633_v47 = vsel %vm971_vm4, %v1550_v53, %v1627_v49 }
 0xb65   :  { %1685 = vmatmul.f32.vlgmr.msra.gmra.mxu3 %v1633_v47 }
 0xb6b   :  { %v1631_v41 = vpop.permute.xlu1 %1630 }
 0xb6c   :  { %v1634_v33 = vsel %vm971_vm4, %v1598_v19, %v1631_v41  ;;  %v2011_v41 = vld [vmem:[%s5213_s3 + $0x608] sm:$0xff] }
 0xb6d   :  { %1705 = vmatmul.f32.vlgmr.msra.gmra.mxu0 %v1634_v33  ;;  %v1898_v33 = vld [vmem:[%s5213_s3 + $0x538] sm:$0xff] }
 0xb6e   :  { %1919 = vmatpush.msra.mxu0 %v1907_v20  ;;  %v2010_v20 = vld [vmem:[%s5213_s3 + $0x600] sm:$0xff] }
 0xb70   :  { %1920 = vmatpush.msra.mxu0 %v1906_v15  ;;  %v2009_v15 = vld [vmem:[%s5213_s3 + $0x5f8] sm:$0xff] }
 0xb72   :  { %1921 = vmatpush.msra.mxu0 %v1905_v55  ;;  %v2008_v55 = vld [vmem:[%s5213_s3 + $0x5f0] sm:$0xff] }
 0xb74   :  { %1922 = vmatpush.msra.mxu0 %v1904_v17  ;;  %v1895_v17 = vld [vmem:[%s5213_s3 + $0x520] sm:$0xff] }
 0xb76   :  { %1923 = vmatpush.msra.mxu0 %v1903_v52  ;;  %v1893_v52 = vld [vmem:[%s5213_s3 + $0x510] sm:$0xff] }
 0xb78   :  { %1924 = vmatpush.msra.mxu0 %v1902_v9  ;;  %v1891_v9 = vld [vmem:[%s5213_s3 + $0x500] sm:$0xff] }
 0xb7a   :  { %1925 = vmatpush.msra.mxu0 %v1901_v57  ;;  %v1889_v57 = vld [vmem:[%s5213_s3 + $0x4f0] sm:$0xff] }
 0xb7c   :  { %1926 = vmatpush.msra.mxu0 %v1900_v61  ;;  %v1888_v61 = vld [vmem:[%s5213_s3 + $0x4e8] sm:$0xff] }
 0xb7d   :  { %3386 = vmatmul.msk.f32.vlgmr.msra.gmra.mxu0 %vm971_vm4, %v4624_v14  ;;  %v1771_v14 = vld [vmem:[%s5213_s3 + $0x218] sm:$0xff] }
 0xb7e   :  { %1786 = vmatpush.msra.mxu2 %v1771_v14 }
 0xb80   :  { %1787 = vmatpush.msra.mxu2 %v1770_v5 }
 0xb82   :  { %1788 = vmatpush.msra.mxu2 %v1769_v7 }
 0xb83   :  { %3380 = vmatmul.msk.f32.vlgmr.msra.gmra.mxu2 %vm296_vm1, %v4385_v44 }
 0xb84   :  { %3381 = vmatpush.xpose.msk.msra.mxu2 %vm296_vm1, %v1766_v60  ;;  %v1956_v60 = vld [vmem:[%s5213_s3 + $0x598] sm:$0xff] }
 0xbe8   :  { %v1686_v10 = vpop.f32.mrf.mxu3 }
 0xbe9   :  { %v1687_v11 = vadd.f32 %v3613_v42, %v1686_v10 }
 0xbea   :  { %v1706_v62 = vpop.f32.mrf.mxu0 }
 0xbeb   :  { %v1707_v48 = vadd.f32 %v1706_v62, %v1687_v11  ;;  %v2238_v11 = vld [vmem:[%s5213_s3 + $0x6c0] sm:$0xff]  ;;  %v2237_v62 = vld [vmem:[%s5213_s3 + $0x6b8] sm:$0xff] }
 0xbed   :  { %1741 = vmatmul.f32.vlgmr.msra.gmra.mxu1 %v1707_v48 }
 0xbee   :  { %1931 = vmatpush.msra.mxu1 %v1899_v4  ;;  %v2104_v4 = vld [vmem:[%s5213_s3 + $0x618] sm:$0xff] }
 0xbf0   :  { %1932 = vmatpush.msra.mxu1 %v1898_v33  ;;  %v2105_v33 = vld [vmem:[%s5213_s3 + $0x620] sm:$0xff] }
 0xbf2   :  { %1933 = vmatpush.msra.mxu1 %v1897_v6  ;;  %v2107_v6 = vld [vmem:[%s5213_s3 + $0x630] sm:$0xff] }
 0xbf4   :  { %1934 = vmatpush.msra.mxu1 %v1896_v59  ;;  %v2109_v59 = vld [vmem:[%s5213_s3 + $0x640] sm:$0xff] }
 0xbf6   :  { %1935 = vmatpush.msra.mxu1 %v1895_v17  ;;  %v2110_v17 = vld [vmem:[%s5213_s3 + $0x648] sm:$0xff] }
 0xbf8   :  { %1936 = vmatpush.msra.mxu1 %v1894_v26  ;;  %v2111_v26 = vld [vmem:[%s5213_s3 + $0x650] sm:$0xff] }
 0xbfa   :  { %1937 = vmatpush.msra.mxu1 %v1893_v52  ;;  %v1928_v14 = vpop.f32.mrf.mxu0  ;;  %v2112_v52 = vld [vmem:[%s5213_s3 + $0x658] sm:$0xff] }
 0xbfc   :  { %1938 = vmatpush.msra.mxu1 %v1892_v27  ;;  %v2113_v27 = vld [vmem:[%s5213_s3 + $0x660] sm:$0xff] }
 0xbfe   :  { %1939 = vmatpush.msra.mxu1 %v1891_v9  ;;  %v2114_v9 = vld [vmem:[%s5213_s3 + $0x668] sm:$0xff] }
 0xc06   :  { %v1790_v58 = vpop.f32.mrf.mxu2 }
 0xc6a   :  { %v1742_v56 = vpop.f32.mrf.mxu1 }
 0xc6b   :  { %3382 = vmatmul.msk.f32.vlgmr.msra.gmra.mxu2 %vm296_vm1, %v1742_v56 }
 0xc6c   :  { %1847 = vmatpush.msra.mxu2 %v1790_v58  ;;  %v1958_v58 = vld [vmem:[%s5213_s3 + $0x5a8] sm:$0xff] }
 0xcee   :  { %v1816_v54 = vpop.f32.mrf.mxu2 }
 0xcef   :  { %v1817_v44 = vadd.f32 %v4448_v3, %v1816_v54  ;;  %v1855_v3 = vld [vmem:[%s5213_s3 + $0x4c0] sm:$0xff] }
 0xcf1   :  { %v1820_v53 = vsel %vm1819_vm6, %v1817_v44, -inf }
 0xcf2   :  { %1821 = vmax.xlane.f32.xlu1 %v1820_v53 }
 0xd65   :  { %v1822_v51 = vpop.xlane.xlu1 %1821 }
 0xd66   :  { %v1823_v34 = vsub.f32 %v1817_v44, %v1822_v51 }
 0xd68   :  { %v1824_v49 = vmul.f32 1.442695, %v1823_v34 }
 0xd6a   :  { %3702 = vpow2.f32 %v1824_v49 }
 0xd70   :  { %v3703_v25 = vpop.eup %3702 }
 0xd71   :  { %3383 = vmatmul.msk.f32.vlgmr.msra.gmra.mxu2 %vm463_vm3, %v3703_v25  ;;  %v1826_v32 = vsel %vm1819_vm6, %v3703_v25, 0.0 }
 0xd72   :  { %1827 = vadd.xlane.f32.xlu2 %v1826_v32 }
 0xde5   :  { %v1828_v47 = vpop.xlane.xlu2 %1827 }
 0xde6   :  { %3704 = vrcp.f32 %v1828_v47 }
 0xdec   :  { %v3705_v8 = vpop.eup %3704 }
 0xdf4   :  { %v1849_v45 = vpop.f32.mrf.mxu2 }
 0xdf5   :  { %v1853_v19 = vmul.f32 %v3705_v8, %v1849_v45 }
 0xdf7   :  { %v1854_v43 = vadd.f32 %v1853_v19, %v1707_v48  ;;  %v1957_v48 = vld [vmem:[%s5213_s3 + $0x5a0] sm:$0xff] }
 0xdf9   :  { %3384 = vmatpush.msk.msra.mxu3 %vm1860_vm7, %v1854_v43 }
 0xdfa   :  { %3385 = vmatmul.msk.f32.vlgmr.msra.gmra.mxu3 %vm1856_vm8, %v1855_v3 }
 0xdfb   :  { %2036 = vmatpush.msra.mxu3 %v2011_v41 }
 0xdfd   :  { %2037 = vmatpush.msra.mxu3 %v2010_v20 }
 0xdff   :  { %2038 = vmatpush.msra.mxu3 %v2009_v15  ;;  %v2106_v15 = vld [vmem:[%s5213_s3 + $0x628] sm:$0xff] }
 0xe01   :  { %2039 = vmatpush.msra.mxu3 %v2008_v55  ;;  %v2108_v55 = vld [vmem:[%s5213_s3 + $0x638] sm:$0xff] }
 0xe02   :  { %3391 = vmatmul.msk.f32.vlgmr.msra.gmra.mxu3 %vm296_vm1, %v4480_v50  ;;  %v1890_v50 = vld [vmem:[%s5213_s3 + $0x4f8] sm:$0xff] }
 0xe03   :  { %1940 = vmatpush.msra.mxu1 %v1890_v50  ;;  %v2236_v50 = vld [vmem:[%s5213_s3 + $0x6b0] sm:$0xff] }
 0xe04   :  { %2412 = vmatpush.msra.mxu3 %v2236_v50 }
 0xe05   :  { %1941 = vmatpush.msra.mxu1 %v1889_v57  ;;  %v2115_v57 = vld [vmem:[%s5213_s3 + $0x670] sm:$0xff] }
 0xe07   :  { %1942 = vmatpush.msra.mxu1 %v1888_v61  ;;  %v2235_v61 = vld [vmem:[%s5213_s3 + $0x6a8] sm:$0xff] }
 0xe08   :  { %2413 = vmatpush.msra.mxu3 %v2235_v61 }
 0xe09   :  { %1943 = vmatpush.msra.mxu1 %v1887_v30  ;;  %v2234_v30 = vld [vmem:[%s5213_s3 + $0x6a0] sm:$0xff] }
 0xe0a   :  { %3392 = vmatmul.msk.f32.gmra.mxu3 %vm296_vm1, %v4475_v24  ;;  %v1886_v24 = vld [vmem:[%s5213_s3 + $0x4d8] sm:$0xff] }
 0xe0b   :  { %1944 = vmatpush.msra.mxu1 %v1886_v24  ;;  %2414 = vmatpush.msra.mxu3 %v2234_v30  ;;  %v2116_v24 = vld [vmem:[%s5213_s3 + $0x678] sm:$0xff] }
 0xe0d   :  { %1945 = vmatpush.msra.mxu1 %v1885_v1  ;;  %v2233_v1 = vld [vmem:[%s5213_s3 + $0x698] sm:$0xff] }
 0xe0e   :  { %2415 = vmatpush.msra.mxu3 %v2233_v1 }
 0xe0f   :  { %1946 = vmatpush.msra.mxu1 %v1884_v13  ;;  %v2117_v13 = vld [vmem:[%s5213_s3 + $0x680] sm:$0xff] }
 0xe12   :  { %3393 = vmatmul.msk.f32.gmra.mxu3 %vm296_vm1, %v4470_v18 }
 0xe1a   :  { %3394 = vmatmul.msk.f32.gmra.mxu3 %vm296_vm1, %v4467_v31  ;;  %v1955_v31 = vld [vmem:[%s5213_s3 + $0x590] sm:$0xff] }
 0xe7d   :  { %v1881_v18 = vpop.f32.mrf.mxu3 }
 0xe7e   :  { %1947 = vmatmul.f32.vlgmr.msra.gmra.mxu1 %v1881_v18  ;;  %v2118_v18 = vld [vmem:[%s5213_s3 + $0x688] sm:$0xff] }
 0xefb   :  { %v1948_v5 = vpop.f32.mrf.mxu1 }
 0xefc   :  { %v1949_v7 = vadd.f32 %v1948_v5, %v1928_v14 }
 0xefe   :  { %v1953_v42 = vadd.f32 %v3614_v2, %v1949_v7  ;;  %v2119_v2 = vld [vmem:[%s5213_s3 + $0x690] sm:$0xff] }
 0xf00   :  { %v1954_v10 = vmax.f32 %v1953_v42, 0.0 }
 0xf02   :  { %1986 = vmatpush.msra.mxu2 %v1954_v10 }
 0xf03   :  { %3387 = vmatmul.msk.f32.vlgmr.msra.gmra.mxu2 %vm463_vm3, %v1955_v31 }
 0xf04   :  { %2301 = vmatpush.msra.mxu2 %v2238_v11 }
 0xf06   :  { %2302 = vmatpush.msra.mxu2 %v2237_v62 }
 0xf0b   :  { %3388 = vmatmul.msk.f32.gmra.mxu2 %vm463_vm3, %v1956_v60 }
 0xf13   :  { %3389 = vmatmul.msk.f32.gmra.mxu2 %vm463_vm3, %v1957_v48 }
 0xf1b   :  { %3390 = vmatmul.msk.f32.gmra.mxu2 %vm463_vm3, %v1958_v58 }
 0xf23   :  { %3415 = vmatmul.msk.f32.vlgmr.msra.gmra.mxu2 %vm178_vm2, %v4274_v35  ;;  %v2007_v35 = vld [vmem:[%s5213_s3 + $0x5e8] sm:$0xff] }
 0xf24   :  { %2073 = vmatpush.msra.mxu0 %v2007_v35 }
 0xf2b   :  { %3416 = vmatmul.msk.f32.gmra.mxu2 %vm178_vm2, %v4267_v37  ;;  %v2000_v37 = vld [vmem:[%s5213_s3 + $0x5b0] sm:$0xff] }
 0xf33   :  { %3417 = vmatmul.msk.f32.gmra.mxu2 %vm178_vm2, %v4259_v39  ;;  %v2006_v39 = vld [vmem:[%s5213_s3 + $0x5e0] sm:$0xff] }
 0xf34   :  { %2074 = vmatpush.msra.mxu0 %v2006_v39 }
 0xf3b   :  { %3418 = vmatmul.msk.f32.gmra.mxu2 %vm178_vm2, %v4252_v40  ;;  %v2002_v40 = vld [vmem:[%s5213_s3 + $0x5c0] sm:$0xff] }
 0xf43   :  { %3419 = vmatmul.msk.f32.gmra.mxu2 %vm178_vm2, %v4243_v46  ;;  %v2003_v46 = vld [vmem:[%s5213_s3 + $0x5c8] sm:$0xff] }
 0xf4b   :  { %3420 = vmatmul.msk.f32.gmra.mxu2 %vm178_vm2, %v4235_v22  ;;  %v2005_v22 = vld [vmem:[%s5213_s3 + $0x5d8] sm:$0xff] }
 0xf4c   :  { %2075 = vmatpush.msra.mxu0 %v2005_v22 }
 0xf53   :  { %3421 = vmatmul.msk.f32.gmra.mxu2 %vm178_vm2, %v4228_v21  ;;  %v2004_v21 = vld [vmem:[%s5213_s3 + $0x5d0] sm:$0xff] }
 0xf54   :  { %2076 = vmatpush.msra.mxu0 %v2004_v21 }
 0xf56   :  { %2077 = vmatpush.msra.mxu0 %v2003_v46  ;;  %v2500_v46 = vld [vmem:[%s5213_s3 + $0x6d8] sm:$0xff] }
 0xf58   :  { %2078 = vmatpush.msra.mxu0 %v2002_v40  ;;  %v2499_v40 = vld [vmem:[%s5213_s3 + $0x6d0] sm:$0xff] }
 0xf5b   :  { %3422 = vmatmul.msk.f32.gmra.mxu2 %vm178_vm2, %v4219_v0  ;;  %v2001_v0 = vld [vmem:[%s5213_s3 + $0x5b8] sm:$0xff] }
 0xf5c   :  { %2079 = vmatpush.msra.mxu0 %v2001_v0 }
 0xf5e   :  { %2080 = vmatpush.msra.mxu0 %v2000_v37 }
 0xf63   :  { %3423 = vmatmul.msk.f32.gmra.mxu2 %vm178_vm2, %v4211_v29 }
 0xf6b   :  { %3424 = vmatmul.msk.f32.gmra.mxu2 %vm178_vm2, %v4204_v28 }
 0xf73   :  { %3425 = vmatmul.msk.f32.gmra.mxu2 %vm178_vm2, %v4195_v38 }
 0xf7b   :  { %3426 = vmatmul.msk.f32.gmra.mxu2 %vm178_vm2, %v4188_v63 }
 0xf83   :  { %3427 = vmatmul.msk.f32.gmra.mxu2 %vm178_vm2, %v4181_v12  ;;  %v2041_v12 = vpop.f32.mrf.mxu3 }
 0xf86   :  { %v1988_v29 = vpop.f32.mrf.mxu2 }
 0xf87   :  { %3395 = vmatmul.msk.f32.vlgmr.msra.gmra.mxu0 %vm971_vm4, %v1988_v29 }
 0xf88   :  { %2565 = vmatpush.msra.mxu0 %v2500_v46 }
 0xf8a   :  { %2566 = vmatpush.msra.mxu0 %v2499_v40 }
 0xf8b   :  { %3428 = vmatmul.msk.f32.gmra.mxu2 %vm178_vm2, %v4174_v23  ;;  %v2044_v54 = vpop.f32.mrf.mxu3 }
 0xf8e   :  { %v1991_v56 = vpop.f32.mrf.mxu2 }
 0xf8f   :  { %3396 = vmatmul.msk.f32.gmra.mxu0 %vm971_vm4, %v1991_v56 }
 0xf93   :  { %3429 = vmatmul.msk.f32.gmra.mxu2 %vm178_vm2, %v4167_v16  ;;  %v2047_v23 = vpop.f32.mrf.mxu3  ;;  %v3615_v16 = vld [vmem:[%s5213_s3 + $0x610] ss:$0 sm:$0xff] }
 0xf96   :  { %v1994_v28 = vpop.f32.mrf.mxu2 }
 0xf97   :  { %3397 = vmatmul.msk.f32.gmra.mxu0 %vm971_vm4, %v1994_v28  ;;  %v5116_v28 = vld [vmem:[%s5213_s3 + $0x6c8] ss:$0 sm:$0xff] }
 0xf9b   :  { %3430 = vmatmul.msk.f32.gmra.mxu2 %vm178_vm2, %v4164_v36  ;;  %v2050_v34 = vpop.f32.mrf.mxu3 }
 0xf9e   :  { %v1997_v63 = vpop.f32.mrf.mxu2 }
 0xf9f   :  { %3398 = vmatmul.msk.f32.gmra.mxu0 %vm971_vm4, %v1997_v63 }
 0xfa6   :  { %v2304_v22 = vpop.f32.mrf.mxu2 }
 0xfae   :  { %v2307_v0 = vpop.f32.mrf.mxu2 }
 0xfb6   :  { %v2310_v56 = vpop.f32.mrf.mxu2 }
 0xfbe   :  { %v2313_v63 = vpop.f32.mrf.mxu2 }
0x1004   :  { %v2082_v38 = vpop.f32.mrf.mxu0 }
0x1005   :  { %v2083_v47 = vadd.f32 %v2082_v38, %v2041_v12 }
0x1007   :  { %v2096_v43 = vadd.f32 %v3615_v16, %v2083_v47 }
0x1009   :  { %v2100_v20 = vmax.f32 %v2096_v43, 0.0 }
0x100c   :  { %v2085_v44 = vpop.f32.mrf.mxu0 }
0x100d   :  { %v2086_v25 = vadd.f32 %v2085_v44, %v2044_v54 }
0x100f   :  { %v2097_v45 = vadd.f32 %v3615_v16, %v2086_v25 }
0x1011   :  { %v2101_v41 = vmax.f32 %v2097_v45, 0.0 }
0x1014   :  { %v2088_v53 = vpop.f32.mrf.mxu0 }
0x1015   :  { %v2089_v51 = vadd.f32 %v2088_v53, %v2047_v23 }
0x1017   :  { %v2098_v36 = vadd.f32 %v3615_v16, %v2089_v51  ;;  %v2316_v51 = vpop.f32.mrf.mxu2 }
0x1019   :  { %v2102_v3 = vmax.f32 %v2098_v36, 0.0 }
0x101c   :  { %v2091_v49 = vpop.f32.mrf.mxu0 }
0x101d   :  { %v2092_v32 = vadd.f32 %v2091_v49, %v2050_v34 }
0x101f   :  { %v2099_v8 = vadd.f32 %v3615_v16, %v2092_v32  ;;  %v2319_v47 = vpop.f32.mrf.mxu2 }
0x1021   :  { %v2103_v19 = vmax.f32 %v2099_v8, 0.0 }
0x1023   :  { %2180 = vmatpush.msra.mxu1 %v2103_v19 }
0x1025   :  { %2181 = vmatpush.msra.mxu1 %v2102_v3 }
0x1027   :  { %2182 = vmatpush.msra.mxu1 %v2101_v41  ;;  %v2322_v3 = vpop.f32.mrf.mxu2 }
0x1029   :  { %2183 = vmatpush.msra.mxu1 %v2100_v20 }
0x102a   :  { %3399 = vmatmul.msk.f32.vlgmr.msra.gmra.mxu1 %vm296_vm1, %v2104_v4 }
0x1032   :  { %3400 = vmatmul.msk.f32.gmra.mxu1 %vm296_vm1, %v2105_v33 }
0x103a   :  { %3401 = vmatmul.msk.f32.gmra.mxu1 %vm296_vm1, %v2106_v15  ;;  %v2325_v15 = vpop.f32.mrf.mxu2 }
0x1042   :  { %3402 = vmatmul.msk.f32.gmra.mxu1 %vm296_vm1, %v2107_v6 }
0x104a   :  { %3403 = vmatmul.msk.f32.gmra.mxu1 %vm296_vm1, %v2108_v55 }
0x1052   :  { %3404 = vmatmul.msk.f32.gmra.mxu1 %vm296_vm1, %v2109_v59 }
0x105a   :  { %3405 = vmatmul.msk.f32.gmra.mxu1 %vm296_vm1, %v2110_v17 }
0x1062   :  { %3406 = vmatmul.msk.f32.gmra.mxu1 %vm296_vm1, %v2111_v26 }
0x106a   :  { %3407 = vmatmul.msk.f32.gmra.mxu1 %vm296_vm1, %v2112_v52 }
0x1072   :  { %3408 = vmatmul.msk.f32.gmra.mxu1 %vm296_vm1, %v2113_v27  ;;  %v2328_v27 = vpop.f32.mrf.mxu2 }
0x107a   :  { %3409 = vmatmul.msk.f32.gmra.mxu1 %vm296_vm1, %v2114_v9 }
0x1082   :  { %3410 = vmatmul.msk.f32.gmra.mxu1 %vm296_vm1, %v2115_v57 }
0x108a   :  { %3411 = vmatmul.msk.f32.gmra.mxu1 %vm296_vm1, %v2116_v24  ;;  %v2331_v24 = vpop.f32.mrf.mxu2 }
0x1092   :  { %3412 = vmatmul.msk.f32.gmra.mxu1 %vm296_vm1, %v2117_v13 }
0x109a   :  { %3413 = vmatmul.msk.f32.gmra.mxu1 %vm296_vm1, %v2118_v18 }
0x10a2   :  { %3414 = vmatmul.msk.f32.gmra.mxu1 %vm296_vm1, %v2119_v2 }
0x10a7   :  { %v2185_v14 = vpop.f32.mrf.mxu1 }
0x10a8   :  { %3431 = vmatmul.msk.f32.vlgmr.msra.gmra.mxu3 %vm296_vm1, %v2185_v14 }
0x10af   :  { %v2188_v5 = vpop.f32.mrf.mxu1 }
0x10b0   :  { %3432 = vmatmul.msk.f32.gmra.mxu3 %vm296_vm1, %v2188_v5  ;;  %v2334_v5 = vpop.f32.mrf.mxu2 }
0x10b7   :  { %v2191_v7 = vpop.f32.mrf.mxu1 }
0x10b8   :  { %3433 = vmatmul.msk.f32.gmra.mxu3 %vm296_vm1, %v2191_v7 }
0x10bf   :  { %v2194_v42 = vpop.f32.mrf.mxu1 }
0x10c0   :  { %3434 = vmatmul.msk.f32.gmra.mxu3 %vm296_vm1, %v2194_v42 }
0x10c7   :  { %v2197_v10 = vpop.f32.mrf.mxu1 }
0x10c8   :  { %3435 = vmatmul.msk.f32.gmra.mxu3 %vm296_vm1, %v2197_v10 }
0x10cf   :  { %v2200_v31 = vpop.f32.mrf.mxu1 }
0x10d0   :  { %3436 = vmatmul.msk.f32.gmra.mxu3 %vm296_vm1, %v2200_v31 }
0x10d7   :  { %v2203_v11 = vpop.f32.mrf.mxu1 }
0x10d8   :  { %3437 = vmatmul.msk.f32.gmra.mxu3 %vm296_vm1, %v2203_v11  ;;  %v2337_v11 = vpop.f32.mrf.mxu2 }
0x10df   :  { %v2206_v62 = vpop.f32.mrf.mxu1 }
0x10e0   :  { %3438 = vmatmul.msk.f32.gmra.mxu3 %vm296_vm1, %v2206_v62 }
0x10e7   :  { %v2209_v60 = vpop.f32.mrf.mxu1 }
0x10e8   :  { %3439 = vmatmul.msk.f32.gmra.mxu3 %vm296_vm1, %v2209_v60 }
0x10ef   :  { %v2212_v48 = vpop.f32.mrf.mxu1 }
0x10f0   :  { %3440 = vmatmul.msk.f32.gmra.mxu3 %vm296_vm1, %v2212_v48 }
0x10f7   :  { %v2215_v58 = vpop.f32.mrf.mxu1 }
0x10f8   :  { %3441 = vmatmul.msk.f32.gmra.mxu3 %vm296_vm1, %v2215_v58 }
0x10ff   :  { %v2218_v35 = vpop.f32.mrf.mxu1 }
0x1100   :  { %3442 = vmatmul.msk.f32.gmra.mxu3 %vm296_vm1, %v2218_v35 }
0x1107   :  { %v2221_v39 = vpop.f32.mrf.mxu1 }
0x1108   :  { %3443 = vmatmul.msk.f32.gmra.mxu3 %vm296_vm1, %v2221_v39 }
0x110f   :  { %v2224_v21 = vpop.f32.mrf.mxu1 }
0x1110   :  { %3444 = vmatmul.msk.f32.gmra.mxu3 %vm296_vm1, %v2224_v21 }
0x1117   :  { %v2227_v37 = vpop.f32.mrf.mxu1 }
0x1118   :  { %3445 = vmatmul.msk.f32.gmra.mxu3 %vm296_vm1, %v2227_v37 }
0x111f   :  { %v2230_v29 = vpop.f32.mrf.mxu1 }
0x1120   :  { %3446 = vmatmul.msk.f32.gmra.mxu3 %vm296_vm1, %v2230_v29 }
0x112b   :  { %v2417_v12 = vpop.f32.mrf.mxu3 }
0x112c   :  { %v2418_v38 = vadd.f32 %v2417_v12, %v2304_v22  ;;  %v2340_v22 = vpop.f32.mrf.mxu2 }
0x112e   :  { %v2467_v54 = vadd.f32 %v5116_v28, %v2418_v38 }
0x1130   :  { %v2483_v44 = vmax.f32 %v2467_v54, 0.0 }
0x1132   :  { %3447 = vmatmul.msk.f32.vlgmr.msra.gmra.mxu0 %vm178_vm2, %v2483_v44 }
0x1133   :  { %v2420_v23 = vpop.f32.mrf.mxu3 }
0x1134   :  { %v2421_v53 = vadd.f32 %v2420_v23, %v2307_v0  ;;  %v2343_v29 = vpop.f32.mrf.mxu2 }
0x1136   :  { %v2468_v34 = vadd.f32 %v5116_v28, %v2421_v53 }
0x1138   :  { %v2484_v49 = vmax.f32 %v2468_v34, 0.0 }
0x113a   :  { %3448 = vmatmul.msk.f32.gmra.mxu0 %vm178_vm2, %v2484_v49 }
0x113b   :  { %v2423_v16 = vpop.f32.mrf.mxu3 }
0x113c   :  { %v2424_v25 = vadd.f32 %v2423_v16, %v2310_v56  ;;  %v2346_v44 = vpop.f32.mrf.mxu2 }
0x113e   :  { %v2469_v32 = vadd.f32 %v5116_v28, %v2424_v25 }
0x1140   :  { %v2485_v36 = vmax.f32 %v2469_v32, 0.0 }
0x1142   :  { %3449 = vmatmul.msk.f32.gmra.mxu0 %vm178_vm2, %v2485_v36 }
0x1143   :  { %v2426_v8 = vpop.f32.mrf.mxu3 }
0x1144   :  { %v2427_v45 = vadd.f32 %v2426_v8, %v2313_v63  ;;  %v2349_v49 = vpop.f32.mrf.mxu2 }
0x1146   :  { %v2470_v19 = vadd.f32 %v5116_v28, %v2427_v45 }
0x1148   :  { %v2486_v43 = vmax.f32 %v2470_v19, 0.0 }
0x114a   :  { %3450 = vmatmul.msk.f32.gmra.mxu0 %vm178_vm2, %v2486_v43 }
0x114b   :  { %v2429_v41 = vpop.f32.mrf.mxu3 }
0x114c   :  { %v2430_v20 = vadd.f32 %v2429_v41, %v2316_v51 }
0x114e   :  { %v2471_v4 = vadd.f32 %v5116_v28, %v2430_v20 }
0x1150   :  { %v2487_v33 = vmax.f32 %v2471_v4, 0.0 }
0x1152   :  { %3451 = vmatmul.msk.f32.gmra.mxu0 %vm178_vm2, %v2487_v33 }
0x1153   :  { %v2432_v6 = vpop.f32.mrf.mxu3 }
0x1154   :  { %v2433_v55 = vadd.f32 %v2432_v6, %v2319_v47 }
0x1156   :  { %v2472_v59 = vadd.f32 %v5116_v28, %v2433_v55 }
0x1158   :  { %v2488_v17 = vmax.f32 %v2472_v59, 0.0 }
0x115a   :  { %3452 = vmatmul.msk.f32.gmra.mxu0 %vm178_vm2, %v2488_v17  ;;  %v5163_v17 = vld [vmem:[%s5213_s3 + $0x6e0] ss:$0 sm:$0xff] }
0x115b   :  { %v2435_v26 = vpop.f32.mrf.mxu3 }
0x115c   :  { %v2436_v52 = vadd.f32 %v2435_v26, %v2322_v3 }
0x115e   :  { %v2473_v9 = vadd.f32 %v5116_v28, %v2436_v52 }
0x1160   :  { %v2489_v50 = vmax.f32 %v2473_v9, 0.0 }
0x1162   :  { %3453 = vmatmul.msk.f32.gmra.mxu0 %vm178_vm2, %v2489_v50 }
0x1163   :  { %v2438_v57 = vpop.f32.mrf.mxu3 }
0x1164   :  { %v2439_v61 = vadd.f32 %v2438_v57, %v2325_v15 }
0x1166   :  { %v2474_v30 = vadd.f32 %v5116_v28, %v2439_v61 }
0x1168   :  { %v2490_v1 = vmax.f32 %v2474_v30, 0.0 }
0x116a   :  { %3454 = vmatmul.msk.f32.gmra.mxu0 %vm178_vm2, %v2490_v1 }
0x116b   :  { %v2441_v13 = vpop.f32.mrf.mxu3 }
0x116c   :  { %v2442_v18 = vadd.f32 %v2441_v13, %v2328_v27 }
0x116e   :  { %v2475_v2 = vadd.f32 %v5116_v28, %v2442_v18 }
0x1170   :  { %v2491_v14 = vmax.f32 %v2475_v2, 0.0 }
0x1172   :  { %3455 = vmatmul.msk.f32.gmra.mxu0 %vm178_vm2, %v2491_v14 }
0x1173   :  { %v2444_v7 = vpop.f32.mrf.mxu3 }
0x1174   :  { %v2445_v42 = vadd.f32 %v2444_v7, %v2331_v24 }
0x1176   :  { %v2476_v10 = vadd.f32 %v5116_v28, %v2445_v42 }
0x1178   :  { %v2492_v31 = vmax.f32 %v2476_v10, 0.0  ;;  %v2857_v10 = vld [vmem:[#allocation2 + $0x788] sm:$0xff] }
0x117a   :  { %3456 = vmatmul.msk.f32.gmra.mxu0 %vm178_vm2, %v2492_v31  ;;  %v2858_v31 = vld [vmem:[#allocation2 + $0x790] sm:$0xff] }
0x117b   :  { %v2447_v62 = vpop.f32.mrf.mxu3 }
0x117c   :  { %v2448_v60 = vadd.f32 %v2447_v62, %v2334_v5  ;;  %v2856_v62 = vld [vmem:[#allocation2 + $0x780] sm:$0xff] }
0x117e   :  { %v2477_v48 = vadd.f32 %v5116_v28, %v2448_v60  ;;  %v2841_v60 = vld [vmem:[#allocation2 + $0x708] sm:$0xff] }
0x1180   :  { %v2493_v58 = vmax.f32 %v2477_v48, 0.0  ;;  %v2842_v48 = vld [vmem:[#allocation2 + $0x710] sm:$0xff] }
0x1182   :  { %3457 = vmatmul.msk.f32.gmra.mxu0 %vm178_vm2, %v2493_v58  ;;  %v2843_v58 = vld [vmem:[#allocation2 + $0x718] sm:$0xff] }
0x1183   :  { %v2450_v35 = vpop.f32.mrf.mxu3 }
0x1184   :  { %v2451_v39 = vadd.f32 %v2450_v35, %v2337_v11  ;;  %v2859_v11 = vld [vmem:[#allocation2 + $0x798] sm:$0xff]  ;;  %v2840_v35 = vld [vmem:[#allocation2 + $0x700] sm:$0xff] }
0x1186   :  { %v2478_v21 = vadd.f32 %v5116_v28, %v2451_v39  ;;  %v2825_v39 = vld [vmem:[#allocation2 + $0x688] sm:$0xff] }
0x1188   :  { %v2494_v46 = vmax.f32 %v2478_v21, 0.0  ;;  %v2827_v21 = vld [vmem:[#allocation2 + $0x698] sm:$0xff] }
0x118a   :  { %3458 = vmatmul.msk.f32.gmra.mxu0 %vm178_vm2, %v2494_v46  ;;  %v2824_v46 = vld [vmem:[#allocation2 + $0x680] sm:$0xff] }
0x118b   :  { %v2453_v40 = vpop.f32.mrf.mxu3 }
0x118c   :  { %v2454_v0 = vadd.f32 %v2453_v40, %v2340_v22  ;;  %v2826_v22 = vld [vmem:[#allocation2 + $0x690] sm:$0xff]  ;;  %v2809_v40 = vld [vmem:[#allocation2 + $0x608] sm:$0xff] }
0x118e   :  { %v2479_v37 = vadd.f32 %v5116_v28, %v2454_v0  ;;  %v2810_v0 = vld [vmem:[#allocation2 + $0x610] sm:$0xff] }
0x1190   :  { %v2495_v56 = vmax.f32 %v2479_v37, 0.0  ;;  %v2811_v37 = vld [vmem:[#allocation2 + $0x618] sm:$0xff] }
0x1192   :  { %3459 = vmatmul.msk.f32.gmra.mxu0 %vm178_vm2, %v2495_v56  ;;  %v2793_v56 = vld [vmem:[#allocation2 + $0x588] sm:$0xff] }
0x1193   :  { %v2456_v63 = vpop.f32.mrf.mxu3 }
0x1194   :  { %v2457_v12 = vadd.f32 %v2456_v63, %v2343_v29  ;;  %v2808_v29 = vld [vmem:[#allocation2 + $0x600] sm:$0xff]  ;;  %v2794_v63 = vld [vmem:[#allocation2 + $0x590] sm:$0xff] }
0x1196   :  { %v2480_v38 = vadd.f32 %v5116_v28, %v2457_v12  ;;  %v2795_v12 = vld [vmem:[#allocation2 + $0x598] sm:$0xff] }
0x1198   :  { %v2496_v54 = vmax.f32 %v2480_v38, 0.0  ;;  %v2792_v38 = vld [vmem:[#allocation2 + $0x580] sm:$0xff] }
0x119a   :  { %3460 = vmatmul.msk.f32.gmra.mxu0 %vm178_vm2, %v2496_v54  ;;  %v2777_v54 = vld [vmem:[#allocation2 + $0x508] sm:$0xff] }
0x119b   :  { %v2459_v23 = vpop.f32.mrf.mxu3 }
0x119c   :  { %v2460_v53 = vadd.f32 %v2459_v23, %v2346_v44  ;;  %v2778_v44 = vld [vmem:[#allocation2 + $0x510] sm:$0xff]  ;;  %v2779_v23 = vld [vmem:[#allocation2 + $0x518] sm:$0xff] }
0x119e   :  { %v2481_v51 = vadd.f32 %v5116_v28, %v2460_v53  ;;  %v2776_v53 = vld [vmem:[#allocation2 + $0x500] sm:$0xff] }
0x11a0   :  { %v2497_v34 = vmax.f32 %v2481_v51, 0.0  ;;  %v2761_v51 = vld [vmem:[#allocation2 + $0x488] sm:$0xff] }
0x11a2   :  { %3461 = vmatmul.msk.f32.gmra.mxu0 %vm178_vm2, %v2497_v34  ;;  %v2762_v34 = vld [vmem:[#allocation2 + $0x490] sm:$0xff] }
0x11a3   :  { %v2462_v16 = vpop.f32.mrf.mxu3 }
0x11a4   :  { %v2463_v25 = vadd.f32 %v2462_v16, %v2349_v49  ;;  %v2763_v49 = vld [vmem:[#allocation2 + $0x498] sm:$0xff]  ;;  %v2760_v16 = vld [vmem:[#allocation2 + $0x480] sm:$0xff] }
0x11a6   :  { %v2482_v32 = vadd.f32 %v5116_v28, %v2463_v25  ;;  %v2745_v25 = vld [vmem:[#allocation2 + $0x408] sm:$0xff] }
0x11a8   :  { %v2498_v47 = vmax.f32 %v2482_v32, 0.0  ;;  %v2746_v32 = vld [vmem:[#allocation2 + $0x410] sm:$0xff] }
0x11aa   :  { %3462 = vmatmul.msk.f32.gmra.mxu0 %vm178_vm2, %v2498_v47  ;;  %v2747_v47 = vld [vmem:[#allocation2 + $0x418] sm:$0xff] }
0x11af   :  { %v5150_v36 = vpop.f32.mrf.mxu0 }
0x11b0   :  { %v2569_v42 = vadd.f32 %v5163_v17, %v5150_v36  ;;  %v2744_v36 = vld [vmem:[#allocation2 + $0x400] sm:$0xff] }
0x11b7   :  { %v5152_v8 = vpop.f32.mrf.mxu0 }
0x11b8   :  { %v2572_v7 = vadd.f32 %v5163_v17, %v5152_v8  ;;  %v2729_v8 = vld [vmem:[#allocation2 + $0x388] sm:$0xff] }
0x11bf   :  { %v5154_v45 = vpop.f32.mrf.mxu0 }
0x11c0   :  { %v2575_v5 = vadd.f32 %v5163_v17, %v5154_v45  ;;  %v2730_v45 = vld [vmem:[#allocation2 + $0x390] sm:$0xff] }
0x11c7   :  { %v5156_v19 = vpop.f32.mrf.mxu0 }
0x11c8   :  { %v2578_v14 = vadd.f32 %v5163_v17, %v5156_v19  ;;  %v2731_v19 = vld [vmem:[#allocation2 + $0x398] sm:$0xff] }
0x11cf   :  { %v5158_v43 = vpop.f32.mrf.mxu0 }
0x11d0   :  { %v2581_v2 = vadd.f32 %v5163_v17, %v5158_v43  ;;  %v2728_v43 = vld [vmem:[#allocation2 + $0x380] sm:$0xff] }
0x11d7   :  { %v2583_v3 = vpop.f32.mrf.mxu0 }
0x11d8   :  { %v2584_v18 = vadd.f32 %v5163_v17, %v2583_v3  ;;  %v2713_v3 = vld [vmem:[#allocation2 + $0x308] sm:$0xff] }
0x11df   :  { %v2586_v41 = vpop.f32.mrf.mxu0 }
0x11e0   :  { %v2587_v13 = vadd.f32 %v5163_v17, %v2586_v41  ;;  %v2714_v41 = vld [vmem:[#allocation2 + $0x310] sm:$0xff] }
0x11e7   :  { %v2589_v20 = vpop.f32.mrf.mxu0 }
0x11e8   :  { %v2590_v1 = vadd.f32 %v5163_v17, %v2589_v20  ;;  %v2715_v20 = vld [vmem:[#allocation2 + $0x318] sm:$0xff] }
0x11ef   :  { %v2592_v4 = vpop.f32.mrf.mxu0 }
0x11f0   :  { %v2593_v24 = vadd.f32 %v5163_v17, %v2592_v4  ;;  %v2712_v4 = vld [vmem:[#allocation2 + $0x300] sm:$0xff] }
0x11f7   :  { %v2595_v33 = vpop.f32.mrf.mxu0 }
0x11f8   :  { %v2596_v30 = vadd.f32 %v5163_v17, %v2595_v33  ;;  %v2697_v33 = vld [vmem:[#allocation2 + $0x288] sm:$0xff] }
0x11ff   :  { %v2598_v15 = vpop.f32.mrf.mxu0 }
0x1200   :  { %v2599_v61 = vadd.f32 %v5163_v17, %v2598_v15  ;;  %v2698_v15 = vld [vmem:[#allocation2 + $0x290] sm:$0xff] }
0x1207   :  { %v2601_v28 = vpop.f32.mrf.mxu0 }
0x1208   :  { %v2602_v57 = vadd.f32 %v5163_v17, %v2601_v28  ;;  %v2699_v28 = vld [vmem:[#allocation2 + $0x298] sm:$0xff] }
0x120f   :  { %v2604_v6 = vpop.f32.mrf.mxu0 }
0x1210   :  { %v2605_v50 = vadd.f32 %v5163_v17, %v2604_v6  ;;  %v2696_v6 = vld [vmem:[#allocation2 + $0x280] sm:$0xff] }
0x1217   :  { %v2607_v55 = vpop.f32.mrf.mxu0 }
0x1218   :  { %v2608_v9 = vadd.f32 %v5163_v17, %v2607_v55  ;;  %v2681_v55 = vld [vmem:[#allocation2 + $0x208] sm:$0xff] }
0x121f   :  { %v2610_v59 = vpop.f32.mrf.mxu0 }
0x1220   :  { %v2611_v27 = vadd.f32 %v5163_v17, %v2610_v59  ;;  %v2682_v59 = vld [vmem:[#allocation2 + $0x210] sm:$0xff] }
0x1227   :  { %v2613_v26 = vpop.f32.mrf.mxu0 }
0x1228   :  { %v2614_v52 = vadd.f32 %v5163_v17, %v2613_v26  ;;  %v2683_v17 = vld [vmem:[#allocation2 + $0x218] sm:$0xff]  ;;  %v2680_v26 = vld [vmem:[#allocation2 + $0x200] sm:$0xff] }
0x122a   :  { %3514 = vmatpush.lsf.msrb.mxu1 %v2614_v52  ;;  %3547 = vmatpush.lsf.msrb.mxu2 %v2614_v52 }
0x122b   :  { %3580 = vmatpush.lsf.msrb.mxu3 %v2614_v52  ;;  %3481 = vmatpush.lsf.msrb.mxu0 %v2614_v52  ;;  %v2665_v52 = vld [vmem:[#allocation2 + $0x188] sm:$0xff] }
0x122c   :  { %3515 = vmatpush.lsf.msrb.mxu1 %v2611_v27  ;;  %3548 = vmatpush.lsf.msrb.mxu2 %v2611_v27 }
0x122d   :  { %3581 = vmatpush.lsf.msrb.mxu3 %v2611_v27  ;;  %3482 = vmatpush.lsf.msrb.mxu0 %v2611_v27  ;;  %v2666_v27 = vld [vmem:[#allocation2 + $0x190] sm:$0xff] }
0x122e   :  { %3516 = vmatpush.lsf.msrb.mxu1 %v2608_v9  ;;  %3549 = vmatpush.lsf.msrb.mxu2 %v2608_v9 }
0x122f   :  { %3582 = vmatpush.lsf.msrb.mxu3 %v2608_v9  ;;  %3483 = vmatpush.lsf.msrb.mxu0 %v2608_v9  ;;  %v2667_v9 = vld [vmem:[#allocation2 + $0x198] sm:$0xff] }
0x1230   :  { %3517 = vmatpush.lsf.msrb.mxu1 %v2605_v50  ;;  %3550 = vmatpush.lsf.msrb.mxu2 %v2605_v50 }
0x1231   :  { %3583 = vmatpush.lsf.msrb.mxu3 %v2605_v50  ;;  %3484 = vmatpush.lsf.msrb.mxu0 %v2605_v50  ;;  %v2664_v50 = vld [vmem:[#allocation2 + $0x180] sm:$0xff] }
0x1232   :  { %3518 = vmatpush.lsf.msrb.mxu1 %v2602_v57  ;;  %3551 = vmatpush.lsf.msrb.mxu2 %v2602_v57 }
0x1233   :  { %3584 = vmatpush.lsf.msrb.mxu3 %v2602_v57  ;;  %3485 = vmatpush.lsf.msrb.mxu0 %v2602_v57  ;;  %v2649_v57 = vld [vmem:[#allocation2 + $0x108] sm:$0xff] }
0x1234   :  { %3519 = vmatpush.lsf.msrb.mxu1 %v2599_v61  ;;  %3552 = vmatpush.lsf.msrb.mxu2 %v2599_v61 }
0x1235   :  { %3585 = vmatpush.lsf.msrb.mxu3 %v2599_v61  ;;  %3486 = vmatpush.lsf.msrb.mxu0 %v2599_v61  ;;  %v2650_v61 = vld [vmem:[#allocation2 + $0x110] sm:$0xff] }
0x1236   :  { %3520 = vmatpush.lsf.msrb.mxu1 %v2596_v30  ;;  %3553 = vmatpush.lsf.msrb.mxu2 %v2596_v30 }
0x1237   :  { %3586 = vmatpush.lsf.msrb.mxu3 %v2596_v30  ;;  %3487 = vmatpush.lsf.msrb.mxu0 %v2596_v30  ;;  %v2651_v30 = vld [vmem:[#allocation2 + $0x118] sm:$0xff] }
0x1238   :  { %3521 = vmatpush.lsf.msrb.mxu1 %v2593_v24  ;;  %3554 = vmatpush.lsf.msrb.mxu2 %v2593_v24 }
0x1239   :  { %3587 = vmatpush.lsf.msrb.mxu3 %v2593_v24  ;;  %3488 = vmatpush.lsf.msrb.mxu0 %v2593_v24  ;;  %v2648_v24 = vld [vmem:[#allocation2 + $0x100] sm:$0xff] }
0x123a   :  { %3522 = vmatpush.lsf.msrb.mxu1 %v2590_v1  ;;  %3555 = vmatpush.lsf.msrb.mxu2 %v2590_v1 }
0x123b   :  { %3588 = vmatpush.lsf.msrb.mxu3 %v2590_v1  ;;  %3489 = vmatpush.lsf.msrb.mxu0 %v2590_v1  ;;  %v2633_v1 = vld [vmem:[#allocation2 + $0x88] sm:$0xff] }
0x123c   :  { %3523 = vmatpush.lsf.msrb.mxu1 %v2587_v13  ;;  %3556 = vmatpush.lsf.msrb.mxu2 %v2587_v13 }
0x123d   :  { %3589 = vmatpush.lsf.msrb.mxu3 %v2587_v13  ;;  %3490 = vmatpush.lsf.msrb.mxu0 %v2587_v13  ;;  %v2634_v13 = vld [vmem:[#allocation2 + $0x90] sm:$0xff] }
0x123e   :  { %3524 = vmatpush.lsf.msrb.mxu1 %v2584_v18  ;;  %3557 = vmatpush.lsf.msrb.mxu2 %v2584_v18 }
0x123f   :  { %3590 = vmatpush.lsf.msrb.mxu3 %v2584_v18  ;;  %3491 = vmatpush.lsf.msrb.mxu0 %v2584_v18  ;;  %v2635_v18 = vld [vmem:[#allocation2 + $0x98] sm:$0xff] }
0x1240   :  { %3525 = vmatpush.lsf.msrb.mxu1 %v2581_v2  ;;  %3558 = vmatpush.lsf.msrb.mxu2 %v2581_v2 }
0x1241   :  { %3591 = vmatpush.lsf.msrb.mxu3 %v2581_v2  ;;  %3492 = vmatpush.lsf.msrb.mxu0 %v2581_v2  ;;  %v2632_v2 = vld [vmem:[#allocation2 + $0x80] sm:$0xff] }
0x1242   :  { %3526 = vmatpush.lsf.msrb.mxu1 %v2578_v14  ;;  %3559 = vmatpush.lsf.msrb.mxu2 %v2578_v14 }
0x1243   :  { %3592 = vmatpush.lsf.msrb.mxu3 %v2578_v14  ;;  %3493 = vmatpush.lsf.msrb.mxu0 %v2578_v14  ;;  %v2617_v14 = vld [vmem:[#allocation2 + $0x8] sm:$0xff] }
0x1244   :  { %3527 = vmatpush.lsf.msrb.mxu1 %v2575_v5  ;;  %3560 = vmatpush.lsf.msrb.mxu2 %v2575_v5 }
0x1245   :  { %3593 = vmatpush.lsf.msrb.mxu3 %v2575_v5  ;;  %3494 = vmatpush.lsf.msrb.mxu0 %v2575_v5  ;;  %v2618_v5 = vld [vmem:[#allocation2 + $0x10] sm:$0xff] }
0x1246   :  { %3528 = vmatpush.lsf.msrb.mxu1 %v2572_v7  ;;  %3561 = vmatpush.lsf.msrb.mxu2 %v2572_v7 }
0x1247   :  { %3594 = vmatpush.lsf.msrb.mxu3 %v2572_v7  ;;  %3495 = vmatpush.lsf.msrb.mxu0 %v2572_v7  ;;  %v2619_v7 = vld [vmem:[#allocation2 + $0x18] sm:$0xff] }
0x1248   :  { %3529 = vmatpush.lsf.msrb.mxu1 %v2569_v42  ;;  %3562 = vmatpush.lsf.msrb.mxu2 %v2569_v42 }
0x1249   :  { %3595 = vmatpush.lsf.msrb.mxu3 %v2569_v42  ;;  %3496 = vmatpush.lsf.msrb.mxu0 %v2569_v42  ;;  %v2616_v42 = vld [vmem:[#allocation2] sm:$0xff] }
0x124a   :  { %2924 = vmatpush.msra.mxu2 %v2857_v10  ;;  %2904 = vmatpush.msra.mxu1 %v2856_v62  ;;  %v2861_v10 = vld [vmem:[#allocation2 + $0x7a8] sm:$0xff]  ;;  %v2846_v62 = vld [vmem:[#allocation2 + $0x730] sm:$0xff] }
0x124b   :  { %2944 = vmatpush.msra.mxu3 %v2858_v31  ;;  %2964 = vmatpush.msra.mxu0 %v2859_v11  ;;  %v2862_v31 = vld [vmem:[#allocation2 + $0x7b0] sm:$0xff]  ;;  %v2845_v11 = vld [vmem:[#allocation2 + $0x728] sm:$0xff] }
0x124c   :  { %2925 = vmatpush.msra.mxu2 %v2841_v60  ;;  %2905 = vmatpush.msra.mxu1 %v2840_v35  ;;  %v2863_v60 = vld [vmem:[#allocation2 + $0x7b8] sm:$0xff]  ;;  %v2860_v35 = vld [vmem:[#allocation2 + $0x7a0] sm:$0xff] }
0x124d   :  { %2945 = vmatpush.msra.mxu3 %v2842_v48  ;;  %2965 = vmatpush.msra.mxu0 %v2843_v58  ;;  %v2829_v48 = vld [vmem:[#allocation2 + $0x6a8] sm:$0xff]  ;;  %v2830_v58 = vld [vmem:[#allocation2 + $0x6b0] sm:$0xff] }
0x124e   :  { %2926 = vmatpush.msra.mxu2 %v2825_v39  ;;  %2906 = vmatpush.msra.mxu1 %v2824_v46  ;;  %v2813_v39 = vld [vmem:[#allocation2 + $0x628] sm:$0xff]  ;;  %v2844_v46 = vld [vmem:[#allocation2 + $0x720] sm:$0xff] }
0x124f   :  { %2946 = vmatpush.msra.mxu3 %v2826_v22  ;;  %2966 = vmatpush.msra.mxu0 %v2827_v21  ;;  %v2847_v22 = vld [vmem:[#allocation2 + $0x738] sm:$0xff]  ;;  %v2814_v21 = vld [vmem:[#allocation2 + $0x630] sm:$0xff] }
0x1250   :  { %2927 = vmatpush.msra.mxu2 %v2809_v40  ;;  %2907 = vmatpush.msra.mxu1 %v2808_v29  ;;  %v2797_v40 = vld [vmem:[#allocation2 + $0x5a8] sm:$0xff]  ;;  %v2828_v29 = vld [vmem:[#allocation2 + $0x6a0] sm:$0xff] }
0x1251   :  { %2947 = vmatpush.msra.mxu3 %v2810_v0  ;;  %2967 = vmatpush.msra.mxu0 %v2811_v37  ;;  %v2831_v0 = vld [vmem:[#allocation2 + $0x6b8] sm:$0xff]  ;;  %v2798_v37 = vld [vmem:[#allocation2 + $0x5b0] sm:$0xff] }
0x1252   :  { %2928 = vmatpush.msra.mxu2 %v2793_v56  ;;  %2908 = vmatpush.msra.mxu1 %v2792_v38  ;;  %v2781_v56 = vld [vmem:[#allocation2 + $0x528] sm:$0xff]  ;;  %v2812_v38 = vld [vmem:[#allocation2 + $0x620] sm:$0xff] }
0x1253   :  { %2948 = vmatpush.msra.mxu3 %v2794_v63  ;;  %2968 = vmatpush.msra.mxu0 %v2795_v12  ;;  %v2815_v63 = vld [vmem:[#allocation2 + $0x638] sm:$0xff]  ;;  %v2782_v12 = vld [vmem:[#allocation2 + $0x530] sm:$0xff] }
0x1254   :  { %2929 = vmatpush.msra.mxu2 %v2777_v54  ;;  %2909 = vmatpush.msra.mxu1 %v2776_v53  ;;  %v2765_v54 = vld [vmem:[#allocation2 + $0x4a8] sm:$0xff]  ;;  %v2796_v53 = vld [vmem:[#allocation2 + $0x5a0] sm:$0xff] }
0x1255   :  { %2949 = vmatpush.msra.mxu3 %v2778_v44  ;;  %2969 = vmatpush.msra.mxu0 %v2779_v23  ;;  %v2799_v44 = vld [vmem:[#allocation2 + $0x5b8] sm:$0xff]  ;;  %v2766_v23 = vld [vmem:[#allocation2 + $0x4b0] sm:$0xff] }
0x1256   :  { %2930 = vmatpush.msra.mxu2 %v2761_v51  ;;  %2910 = vmatpush.msra.mxu1 %v2760_v16  ;;  %v2749_v51 = vld [vmem:[#allocation2 + $0x428] sm:$0xff]  ;;  %v2780_v16 = vld [vmem:[#allocation2 + $0x520] sm:$0xff] }
0x1257   :  { %2950 = vmatpush.msra.mxu3 %v2762_v34  ;;  %2970 = vmatpush.msra.mxu0 %v2763_v49  ;;  %v2783_v34 = vld [vmem:[#allocation2 + $0x538] sm:$0xff]  ;;  %v2750_v49 = vld [vmem:[#allocation2 + $0x430] sm:$0xff] }
0x1258   :  { %2931 = vmatpush.msra.mxu2 %v2745_v25  ;;  %2911 = vmatpush.msra.mxu1 %v2744_v36  ;;  %v2733_v25 = vld [vmem:[#allocation2 + $0x3a8] sm:$0xff]  ;;  %v2764_v36 = vld [vmem:[#allocation2 + $0x4a0] sm:$0xff] }
0x1259   :  { %2951 = vmatpush.msra.mxu3 %v2746_v32  ;;  %2971 = vmatpush.msra.mxu0 %v2747_v47  ;;  %v2767_v32 = vld [vmem:[#allocation2 + $0x4b8] sm:$0xff]  ;;  %v2734_v47 = vld [vmem:[#allocation2 + $0x3b0] sm:$0xff] }
0x125a   :  { %2932 = vmatpush.msra.mxu2 %v2729_v8  ;;  %2912 = vmatpush.msra.mxu1 %v2728_v43  ;;  %v2717_v8 = vld [vmem:[#allocation2 + $0x328] sm:$0xff]  ;;  %v2748_v43 = vld [vmem:[#allocation2 + $0x420] sm:$0xff] }
0x125b   :  { %2952 = vmatpush.msra.mxu3 %v2730_v45  ;;  %2972 = vmatpush.msra.mxu0 %v2731_v19  ;;  %v2751_v45 = vld [vmem:[#allocation2 + $0x438] sm:$0xff]  ;;  %v2718_v19 = vld [vmem:[#allocation2 + $0x330] sm:$0xff] }
0x125c   :  { %2933 = vmatpush.msra.mxu2 %v2713_v3  ;;  %2913 = vmatpush.msra.mxu1 %v2712_v4  ;;  %v2701_v3 = vld [vmem:[#allocation2 + $0x2a8] sm:$0xff]  ;;  %v2732_v4 = vld [vmem:[#allocation2 + $0x3a0] sm:$0xff] }
0x125d   :  { %2953 = vmatpush.msra.mxu3 %v2714_v41  ;;  %2973 = vmatpush.msra.mxu0 %v2715_v20  ;;  %v2735_v41 = vld [vmem:[#allocation2 + $0x3b8] sm:$0xff]  ;;  %v2702_v20 = vld [vmem:[#allocation2 + $0x2b0] sm:$0xff] }
0x125e   :  { %2934 = vmatpush.msra.mxu2 %v2697_v33  ;;  %2914 = vmatpush.msra.mxu1 %v2696_v6  ;;  %v2685_v33 = vld [vmem:[#allocation2 + $0x228] sm:$0xff]  ;;  %v2716_v6 = vld [vmem:[#allocation2 + $0x320] sm:$0xff] }
0x125f   :  { %2954 = vmatpush.msra.mxu3 %v2698_v15  ;;  %2974 = vmatpush.msra.mxu0 %v2699_v28  ;;  %v2719_v15 = vld [vmem:[#allocation2 + $0x338] sm:$0xff]  ;;  %v2686_v28 = vld [vmem:[#allocation2 + $0x230] sm:$0xff] }
0x1260   :  { %2935 = vmatpush.msra.mxu2 %v2681_v55  ;;  %3596 = vllmr.1.mxu3  ;;  %v2669_v55 = vld [vmem:[#allocation2 + $0x1a8] sm:$0xff] }
0x1261   :  { %2955 = vmatpush.msra.mxu3 %v2682_v59  ;;  %2975 = vmatpush.msra.mxu0 %v2683_v17  ;;  %v2703_v59 = vld [vmem:[#allocation2 + $0x2b8] sm:$0xff]  ;;  %v2670_v17 = vld [vmem:[#allocation2 + $0x1b0] sm:$0xff] }
0x1262   :  { %3563 = vllmr.1.mxu2  ;;  %2915 = vmatpush.msra.mxu1 %v2680_v26  ;;  %v2700_v26 = vld [vmem:[#allocation2 + $0x2a0] sm:$0xff] }
0x1263   :  { %2936 = vmatpush.msra.mxu2 %v2665_v52  ;;  %2956 = vmatpush.msra.mxu3 %v2666_v27  ;;  %v2653_v52 = vld [vmem:[#allocation2 + $0x128] sm:$0xff]  ;;  %v2687_v27 = vld [vmem:[#allocation2 + $0x238] sm:$0xff] }
0x1264   :  { %3497 = vllmr.1.mxu0  ;;  %3530 = vllmr.1.mxu1 }
0x1265   :  { %2976 = vmatpush.msra.mxu0 %v2667_v9  ;;  %2916 = vmatpush.msra.mxu1 %v2664_v50  ;;  %v2654_v9 = vld [vmem:[#allocation2 + $0x130] sm:$0xff]  ;;  %v2684_v50 = vld [vmem:[#allocation2 + $0x220] sm:$0xff] }
0x1266   :  { %2937 = vmatpush.msra.mxu2 %v2649_v57  ;;  %2957 = vmatpush.msra.mxu3 %v2650_v61  ;;  %v2637_v57 = vld [vmem:[#allocation2 + $0xa8] sm:$0xff]  ;;  %v2671_v61 = vld [vmem:[#allocation2 + $0x1b8] sm:$0xff] }
0x1267   :  { %2977 = vmatpush.msra.mxu0 %v2651_v30  ;;  %2917 = vmatpush.msra.mxu1 %v2648_v24  ;;  %v2638_v30 = vld [vmem:[#allocation2 + $0xb0] sm:$0xff]  ;;  %v2668_v24 = vld [vmem:[#allocation2 + $0x1a0] sm:$0xff] }
0x1268   :  { %2938 = vmatpush.msra.mxu2 %v2633_v1  ;;  %2958 = vmatpush.msra.mxu3 %v2634_v13  ;;  %v2621_v1 = vld [vmem:[#allocation2 + $0x28] sm:$0xff]  ;;  %v2655_v13 = vld [vmem:[#allocation2 + $0x138] sm:$0xff] }
0x1269   :  { %2978 = vmatpush.msra.mxu0 %v2635_v18  ;;  %2918 = vmatpush.msra.mxu1 %v2632_v2  ;;  %v2622_v18 = vld [vmem:[#allocation2 + $0x30] sm:$0xff]  ;;  %v2865_v2 = vld [vmem:[#allocation2 + $0x7c8] sm:$0xff] }
0x126a   :  { %2939 = vmatpush.msra.mxu2 %v2617_v14  ;;  %2959 = vmatpush.msra.mxu3 %v2618_v5  ;;  %v2866_v14 = vld [vmem:[#allocation2 + $0x7d0] sm:$0xff]  ;;  %v2652_v5 = vld [vmem:[#allocation2 + $0x120] sm:$0xff] }
0x126b   :  { %2979 = vmatpush.msra.mxu0 %v2619_v7  ;;  %2919 = vmatpush.msra.mxu1 %v2616_v42  ;;  %v2639_v7 = vld [vmem:[#allocation2 + $0xb8] sm:$0xff]  ;;  %v2849_v42 = vld [vmem:[#allocation2 + $0x748] sm:$0xff] }
0x1281   :  { %3597 = vmatmul.lmr.bf16.vlgmr.msra.gmra.1.mxu3 }
0x1282   :  { %3024 = vmatpush.msra.mxu3 %v2862_v31  ;;  %v2636_v31 = vld [vmem:[#allocation2 + $0xa0] sm:$0xff] }
0x1283   :  { %3564 = vmatmul.lmr.bf16.vlgmr.msra.gmra.1.mxu2 }
0x1284   :  { %3004 = vmatpush.msra.mxu2 %v2861_v10  ;;  %3025 = vmatpush.msra.mxu3 %v2846_v62  ;;  %v2850_v10 = vld [vmem:[#allocation2 + $0x750] sm:$0xff]  ;;  %v2833_v62 = vld [vmem:[#allocation2 + $0x6c8] sm:$0xff] }
0x1285   :  { %3498 = vmatmul.lmr.bf16.vlgmr.msra.gmra.1.mxu0  ;;  %3531 = vmatmul.lmr.bf16.vlgmr.msra.gmra.1.mxu1 }
0x1286   :  { %3005 = vmatpush.msra.mxu2 %v2845_v11  ;;  %3044 = vmatpush.msra.mxu0 %v2863_v60  ;;  %v2623_v11 = vld [vmem:[#allocation2 + $0x38] sm:$0xff]  ;;  %v2834_v60 = vld [vmem:[#allocation2 + $0x6d0] sm:$0xff] }
0x1287   :  { %3026 = vmatpush.msra.mxu3 %v2830_v58  ;;  %2984 = vmatpush.msra.mxu1 %v2860_v35  ;;  %v2817_v58 = vld [vmem:[#allocation2 + $0x648] sm:$0xff]  ;;  %v2818_v35 = vld [vmem:[#allocation2 + $0x650] sm:$0xff] }
0x1288   :  { %3006 = vmatpush.msra.mxu2 %v2829_v48  ;;  %3045 = vmatpush.msra.mxu0 %v2847_v22  ;;  %v2620_v48 = vld [vmem:[#allocation2 + $0x20] sm:$0xff]  ;;  %v2801_v22 = vld [vmem:[#allocation2 + $0x5c8] sm:$0xff] }
0x1289   :  { %3027 = vmatpush.msra.mxu3 %v2814_v21  ;;  %2985 = vmatpush.msra.mxu1 %v2844_v46  ;;  %v2864_v21 = vld [vmem:[#allocation2 + $0x7c0] sm:$0xff]  ;;  %v2802_v46 = vld [vmem:[#allocation2 + $0x5d0] sm:$0xff] }
0x128a   :  { %3007 = vmatpush.msra.mxu2 %v2813_v39  ;;  %3046 = vmatpush.msra.mxu0 %v2831_v0  ;;  %v2867_v39 = vld [vmem:[#allocation2 + $0x7d8] sm:$0xff]  ;;  %v2785_v0 = vld [vmem:[#allocation2 + $0x548] sm:$0xff] }
0x128b   :  { %3028 = vmatpush.msra.mxu3 %v2798_v37  ;;  %2986 = vmatpush.msra.mxu1 %v2828_v29  ;;  %v2848_v37 = vld [vmem:[#allocation2 + $0x740] sm:$0xff]  ;;  %v2786_v29 = vld [vmem:[#allocation2 + $0x550] sm:$0xff] }
0x128c   :  { %3008 = vmatpush.msra.mxu2 %v2797_v40  ;;  %3047 = vmatpush.msra.mxu0 %v2815_v63  ;;  %v2851_v40 = vld [vmem:[#allocation2 + $0x758] sm:$0xff]  ;;  %v2769_v63 = vld [vmem:[#allocation2 + $0x4c8] sm:$0xff] }
0x128d   :  { %3029 = vmatpush.msra.mxu3 %v2782_v12  ;;  %2987 = vmatpush.msra.mxu1 %v2812_v38  ;;  %v2832_v12 = vld [vmem:[#allocation2 + $0x6c0] sm:$0xff]  ;;  %v2770_v38 = vld [vmem:[#allocation2 + $0x4d0] sm:$0xff] }
0x128e   :  { %3009 = vmatpush.msra.mxu2 %v2781_v56  ;;  %3048 = vmatpush.msra.mxu0 %v2799_v44  ;;  %v2835_v56 = vld [vmem:[#allocation2 + $0x6d8] sm:$0xff]  ;;  %v2753_v44 = vld [vmem:[#allocation2 + $0x448] sm:$0xff] }
0x128f   :  { %3030 = vmatpush.msra.mxu3 %v2766_v23  ;;  %2988 = vmatpush.msra.mxu1 %v2796_v53  ;;  %v2816_v23 = vld [vmem:[#allocation2 + $0x640] sm:$0xff]  ;;  %v2754_v53 = vld [vmem:[#allocation2 + $0x450] sm:$0xff] }
0x1290   :  { %3010 = vmatpush.msra.mxu2 %v2765_v54  ;;  %3049 = vmatpush.msra.mxu0 %v2783_v34  ;;  %v2819_v54 = vld [vmem:[#allocation2 + $0x658] sm:$0xff]  ;;  %v2737_v34 = vld [vmem:[#allocation2 + $0x3c8] sm:$0xff] }
0x1291   :  { %3031 = vmatpush.msra.mxu3 %v2750_v49  ;;  %2989 = vmatpush.msra.mxu1 %v2780_v16  ;;  %v2800_v49 = vld [vmem:[#allocation2 + $0x5c0] sm:$0xff]  ;;  %v2738_v16 = vld [vmem:[#allocation2 + $0x3d0] sm:$0xff] }
0x1292   :  { %3011 = vmatpush.msra.mxu2 %v2749_v51  ;;  %3050 = vmatpush.msra.mxu0 %v2767_v32  ;;  %v2803_v51 = vld [vmem:[#allocation2 + $0x5d8] sm:$0xff]  ;;  %v2721_v32 = vld [vmem:[#allocation2 + $0x348] sm:$0xff] }
0x1293   :  { %3032 = vmatpush.msra.mxu3 %v2734_v47  ;;  %2990 = vmatpush.msra.mxu1 %v2764_v36  ;;  %v2784_v47 = vld [vmem:[#allocation2 + $0x540] sm:$0xff]  ;;  %v2722_v36 = vld [vmem:[#allocation2 + $0x350] sm:$0xff] }
0x1294   :  { %3012 = vmatpush.msra.mxu2 %v2733_v25  ;;  %3051 = vmatpush.msra.mxu0 %v2751_v45  ;;  %v2787_v25 = vld [vmem:[#allocation2 + $0x558] sm:$0xff]  ;;  %v2705_v45 = vld [vmem:[#allocation2 + $0x2c8] sm:$0xff] }
0x1295   :  { %3033 = vmatpush.msra.mxu3 %v2718_v19  ;;  %2991 = vmatpush.msra.mxu1 %v2748_v43  ;;  %v2768_v19 = vld [vmem:[#allocation2 + $0x4c0] sm:$0xff]  ;;  %v2706_v43 = vld [vmem:[#allocation2 + $0x2d0] sm:$0xff] }
0x1296   :  { %3013 = vmatpush.msra.mxu2 %v2717_v8  ;;  %3052 = vmatpush.msra.mxu0 %v2735_v41  ;;  %v2771_v8 = vld [vmem:[#allocation2 + $0x4d8] sm:$0xff]  ;;  %v2689_v41 = vld [vmem:[#allocation2 + $0x248] sm:$0xff] }
0x1297   :  { %3034 = vmatpush.msra.mxu3 %v2702_v20  ;;  %2992 = vmatpush.msra.mxu1 %v2732_v4  ;;  %v2752_v20 = vld [vmem:[#allocation2 + $0x440] sm:$0xff]  ;;  %v2690_v4 = vld [vmem:[#allocation2 + $0x250] sm:$0xff] }
0x1298   :  { %3014 = vmatpush.msra.mxu2 %v2701_v3  ;;  %3053 = vmatpush.msra.mxu0 %v2719_v15  ;;  %v2755_v3 = vld [vmem:[#allocation2 + $0x458] sm:$0xff]  ;;  %v2673_v15 = vld [vmem:[#allocation2 + $0x1c8] sm:$0xff] }
0x1299   :  { %3035 = vmatpush.msra.mxu3 %v2686_v28  ;;  %2993 = vmatpush.msra.mxu1 %v2716_v6  ;;  %v2736_v28 = vld [vmem:[#allocation2 + $0x3c0] sm:$0xff]  ;;  %v2674_v6 = vld [vmem:[#allocation2 + $0x1d0] sm:$0xff] }
0x129a   :  { %3015 = vmatpush.msra.mxu2 %v2685_v33  ;;  %3054 = vmatpush.msra.mxu0 %v2703_v59  ;;  %v2739_v33 = vld [vmem:[#allocation2 + $0x3d8] sm:$0xff]  ;;  %v2657_v59 = vld [vmem:[#allocation2 + $0x148] sm:$0xff] }
0x129b   :  { %3036 = vmatpush.msra.mxu3 %v2670_v17  ;;  %2994 = vmatpush.msra.mxu1 %v2700_v26  ;;  %v2720_v17 = vld [vmem:[#allocation2 + $0x340] sm:$0xff]  ;;  %v2658_v26 = vld [vmem:[#allocation2 + $0x150] sm:$0xff] }
0x129c   :  { %3016 = vmatpush.msra.mxu2 %v2669_v55  ;;  %3055 = vmatpush.msra.mxu0 %v2687_v27  ;;  %v2723_v55 = vld [vmem:[#allocation2 + $0x358] sm:$0xff]  ;;  %v2641_v27 = vld [vmem:[#allocation2 + $0xc8] sm:$0xff] }
0x129d   :  { %3037 = vmatpush.msra.mxu3 %v2654_v9  ;;  %2995 = vmatpush.msra.mxu1 %v2684_v50  ;;  %v2704_v9 = vld [vmem:[#allocation2 + $0x2c0] sm:$0xff]  ;;  %v2642_v50 = vld [vmem:[#allocation2 + $0xd0] sm:$0xff] }
0x129e   :  { %3017 = vmatpush.msra.mxu2 %v2653_v52  ;;  %3056 = vmatpush.msra.mxu0 %v2671_v61  ;;  %v2707_v52 = vld [vmem:[#allocation2 + $0x2d8] sm:$0xff]  ;;  %v2625_v61 = vld [vmem:[#allocation2 + $0x48] sm:$0xff] }
0x129f   :  { %3038 = vmatpush.msra.mxu3 %v2638_v30  ;;  %2996 = vmatpush.msra.mxu1 %v2668_v24  ;;  %v2688_v30 = vld [vmem:[#allocation2 + $0x240] sm:$0xff]  ;;  %v2626_v24 = vld [vmem:[#allocation2 + $0x50] sm:$0xff] }
0x12a0   :  { %3018 = vmatpush.msra.mxu2 %v2637_v57  ;;  %3057 = vmatpush.msra.mxu0 %v2655_v13  ;;  %v2691_v57 = vld [vmem:[#allocation2 + $0x258] sm:$0xff]  ;;  %v2672_v13 = vld [vmem:[#allocation2 + $0x1c0] sm:$0xff] }
0x12a1   :  { %3039 = vmatpush.msra.mxu3 %v2622_v18  ;;  %2997 = vmatpush.msra.mxu1 %v2652_v5  ;;  %v2659_v18 = vld [vmem:[#allocation2 + $0x158] sm:$0xff]  ;;  %v2656_v5 = vld [vmem:[#allocation2 + $0x140] sm:$0xff] }
0x12a2   :  { %3019 = vmatpush.msra.mxu2 %v2621_v1  ;;  %3598 = vmatmul.lmr.bf16.vlgmr.msra.gmra.1.mxu3  ;;  %v2675_v1 = vld [vmem:[#allocation2 + $0x1d8] sm:$0xff] }
0x12a3   :  { %3565 = vmatmul.lmr.bf16.vlgmr.msra.gmra.1.mxu2  ;;  %3104 = vmatpush.msra.mxu3 %v2866_v14  ;;  %v2870_v14 = vld [vmem:[#allocation2 + $0x7f0] sm:$0xff] }
0x12a4   :  { %3084 = vmatpush.msra.mxu2 %v2865_v2  ;;  %3058 = vmatpush.msra.mxu0 %v2639_v7  ;;  %v2869_v2 = vld [vmem:[#allocation2 + $0x7e8] sm:$0xff]  ;;  %v2643_v7 = vld [vmem:[#allocation2 + $0xd8] sm:$0xff] }
0x12a5   :  { %3105 = vmatpush.msra.mxu3 %v2850_v10  ;;  %2998 = vmatpush.msra.mxu1 %v2636_v31  ;;  %v2854_v10 = vld [vmem:[#allocation2 + $0x770] sm:$0xff]  ;;  %v2640_v31 = vld [vmem:[#allocation2 + $0xc0] sm:$0xff] }
0x12a6   :  { %3085 = vmatpush.msra.mxu2 %v2849_v42  ;;  %3059 = vmatpush.msra.mxu0 %v2623_v11  ;;  %v2853_v42 = vld [vmem:[#allocation2 + $0x768] sm:$0xff]  ;;  %v2627_v11 = vld [vmem:[#allocation2 + $0x58] sm:$0xff] }
0x12a7   :  { %3106 = vmatpush.msra.mxu3 %v2834_v60  ;;  %2999 = vmatpush.msra.mxu1 %v2620_v48  ;;  %v2838_v60 = vld [vmem:[#allocation2 + $0x6f0] sm:$0xff]  ;;  %v2624_v48 = vld [vmem:[#allocation2 + $0x40] sm:$0xff] }
0x12a8   :  { %3086 = vmatpush.msra.mxu2 %v2833_v62  ;;  %3499 = vmatmul.lmr.bf16.vlgmr.msra.gmra.1.mxu0  ;;  %v2837_v62 = vld [vmem:[#allocation2 + $0x6e8] sm:$0xff] }
0x12a9   :  { %3107 = vmatpush.msra.mxu3 %v2818_v35  ;;  %3124 = vmatpush.msra.mxu0 %v2867_v39  ;;  %v2822_v35 = vld [vmem:[#allocation2 + $0x670] sm:$0xff]  ;;  %v2871_v39 = vld [vmem:[#allocation2 + $0x7f8] sm:$0xff] }
0x12aa   :  { %3087 = vmatpush.msra.mxu2 %v2817_v58  ;;  %3532 = vmatmul.lmr.bf16.vlgmr.msra.gmra.1.mxu1  ;;  %v2821_v58 = vld [vmem:[#allocation2 + $0x668] sm:$0xff] }
0x12ab   :  { %3064 = vmatpush.msra.mxu1 %v2864_v21  ;;  %3108 = vmatpush.msra.mxu3 %v2802_v46  ;;  %v2868_v21 = vld [vmem:[#allocation2 + $0x7e0] sm:$0xff]  ;;  %v2806_v46 = vld [vmem:[#allocation2 + $0x5f0] sm:$0xff] }
0x12ac   :  { %3088 = vmatpush.msra.mxu2 %v2801_v22  ;;  %3125 = vmatpush.msra.mxu0 %v2851_v40  ;;  %v2805_v22 = vld [vmem:[#allocation2 + $0x5e8] sm:$0xff]  ;;  %v2855_v40 = vld [vmem:[#allocation2 + $0x778] sm:$0xff] }
0x12ad   :  { %3065 = vmatpush.msra.mxu1 %v2848_v37  ;;  %3109 = vmatpush.msra.mxu3 %v2786_v29  ;;  %v2852_v37 = vld [vmem:[#allocation2 + $0x760] sm:$0xff]  ;;  %v2790_v29 = vld [vmem:[#allocation2 + $0x570] sm:$0xff] }
0x12ae   :  { %3089 = vmatpush.msra.mxu2 %v2785_v0  ;;  %3126 = vmatpush.msra.mxu0 %v2835_v56  ;;  %v2789_v0 = vld [vmem:[#allocation2 + $0x568] sm:$0xff]  ;;  %v2839_v56 = vld [vmem:[#allocation2 + $0x6f8] sm:$0xff] }
0x12af   :  { %3066 = vmatpush.msra.mxu1 %v2832_v12  ;;  %3110 = vmatpush.msra.mxu3 %v2770_v38  ;;  %v2836_v12 = vld [vmem:[#allocation2 + $0x6e0] sm:$0xff]  ;;  %v2774_v38 = vld [vmem:[#allocation2 + $0x4f0] sm:$0xff] }
0x12b0   :  { %3090 = vmatpush.msra.mxu2 %v2769_v63  ;;  %3127 = vmatpush.msra.mxu0 %v2819_v54  ;;  %v2773_v63 = vld [vmem:[#allocation2 + $0x4e8] sm:$0xff]  ;;  %v2823_v54 = vld [vmem:[#allocation2 + $0x678] sm:$0xff] }
0x12b1   :  { %3067 = vmatpush.msra.mxu1 %v2816_v23  ;;  %3111 = vmatpush.msra.mxu3 %v2754_v53  ;;  %v2820_v23 = vld [vmem:[#allocation2 + $0x660] sm:$0xff]  ;;  %v2758_v53 = vld [vmem:[#allocation2 + $0x470] sm:$0xff] }
0x12b2   :  { %3091 = vmatpush.msra.mxu2 %v2753_v44  ;;  %3128 = vmatpush.msra.mxu0 %v2803_v51  ;;  %v2757_v44 = vld [vmem:[#allocation2 + $0x468] sm:$0xff]  ;;  %v2807_v51 = vld [vmem:[#allocation2 + $0x5f8] sm:$0xff] }
0x12b3   :  { %3068 = vmatpush.msra.mxu1 %v2800_v49  ;;  %3112 = vmatpush.msra.mxu3 %v2738_v16  ;;  %v2804_v49 = vld [vmem:[#allocation2 + $0x5e0] sm:$0xff]  ;;  %v2742_v16 = vld [vmem:[#allocation2 + $0x3f0] sm:$0xff] }
0x12b4   :  { %3092 = vmatpush.msra.mxu2 %v2737_v34  ;;  %3129 = vmatpush.msra.mxu0 %v2787_v25  ;;  %v2741_v34 = vld [vmem:[#allocation2 + $0x3e8] sm:$0xff]  ;;  %v2791_v25 = vld [vmem:[#allocation2 + $0x578] sm:$0xff] }
0x12b5   :  { %3069 = vmatpush.msra.mxu1 %v2784_v47  ;;  %3113 = vmatpush.msra.mxu3 %v2722_v36  ;;  %v2788_v47 = vld [vmem:[#allocation2 + $0x560] sm:$0xff]  ;;  %v2726_v36 = vld [vmem:[#allocation2 + $0x370] sm:$0xff] }
0x12b6   :  { %3093 = vmatpush.msra.mxu2 %v2721_v32  ;;  %3130 = vmatpush.msra.mxu0 %v2771_v8  ;;  %v2725_v32 = vld [vmem:[#allocation2 + $0x368] sm:$0xff]  ;;  %v2775_v8 = vld [vmem:[#allocation2 + $0x4f8] sm:$0xff] }
0x12b7   :  { %3070 = vmatpush.msra.mxu1 %v2768_v19  ;;  %3114 = vmatpush.msra.mxu3 %v2706_v43  ;;  %v2772_v19 = vld [vmem:[#allocation2 + $0x4e0] sm:$0xff]  ;;  %v2710_v43 = vld [vmem:[#allocation2 + $0x2f0] sm:$0xff] }
0x12b8   :  { %3094 = vmatpush.msra.mxu2 %v2705_v45  ;;  %3131 = vmatpush.msra.mxu0 %v2755_v3  ;;  %v2709_v45 = vld [vmem:[#allocation2 + $0x2e8] sm:$0xff]  ;;  %v2759_v3 = vld [vmem:[#allocation2 + $0x478] sm:$0xff] }
0x12b9   :  { %3071 = vmatpush.msra.mxu1 %v2752_v20  ;;  %3115 = vmatpush.msra.mxu3 %v2690_v4  ;;  %v2756_v20 = vld [vmem:[#allocation2 + $0x460] sm:$0xff]  ;;  %v2694_v4 = vld [vmem:[#allocation2 + $0x270] sm:$0xff] }
0x12ba   :  { %3095 = vmatpush.msra.mxu2 %v2689_v41  ;;  %3132 = vmatpush.msra.mxu0 %v2739_v33  ;;  %v2693_v41 = vld [vmem:[#allocation2 + $0x268] sm:$0xff]  ;;  %v2743_v33 = vld [vmem:[#allocation2 + $0x3f8] sm:$0xff] }
0x12bb   :  { %3072 = vmatpush.msra.mxu1 %v2736_v28  ;;  %3116 = vmatpush.msra.mxu3 %v2674_v6  ;;  %v2740_v28 = vld [vmem:[#allocation2 + $0x3e0] sm:$0xff]  ;;  %v2678_v6 = vld [vmem:[#allocation2 + $0x1f0] sm:$0xff] }
0x12bc   :  { %3096 = vmatpush.msra.mxu2 %v2673_v15  ;;  %3133 = vmatpush.msra.mxu0 %v2723_v55  ;;  %v2677_v15 = vld [vmem:[#allocation2 + $0x1e8] sm:$0xff]  ;;  %v2727_v55 = vld [vmem:[#allocation2 + $0x378] sm:$0xff] }
0x12bd   :  { %3073 = vmatpush.msra.mxu1 %v2720_v17  ;;  %3117 = vmatpush.msra.mxu3 %v2658_v26  ;;  %v2724_v17 = vld [vmem:[#allocation2 + $0x360] sm:$0xff]  ;;  %v2662_v26 = vld [vmem:[#allocation2 + $0x170] sm:$0xff] }
0x12be   :  { %3097 = vmatpush.msra.mxu2 %v2657_v59  ;;  %3134 = vmatpush.msra.mxu0 %v2707_v52  ;;  %v2661_v59 = vld [vmem:[#allocation2 + $0x168] sm:$0xff]  ;;  %v2711_v52 = vld [vmem:[#allocation2 + $0x2f8] sm:$0xff] }
0x12bf   :  { %3074 = vmatpush.msra.mxu1 %v2704_v9  ;;  %3118 = vmatpush.msra.mxu3 %v2642_v50  ;;  %v2708_v9 = vld [vmem:[#allocation2 + $0x2e0] sm:$0xff]  ;;  %v2646_v50 = vld [vmem:[#allocation2 + $0xf0] sm:$0xff] }
0x12c0   :  { %3098 = vmatpush.msra.mxu2 %v2641_v27  ;;  %3135 = vmatpush.msra.mxu0 %v2691_v57  ;;  %v2645_v27 = vld [vmem:[#allocation2 + $0xe8] sm:$0xff]  ;;  %v2695_v57 = vld [vmem:[#allocation2 + $0x278] sm:$0xff] }
0x12c1   :  { %3075 = vmatpush.msra.mxu1 %v2688_v30  ;;  %3119 = vmatpush.msra.mxu3 %v2626_v24  ;;  %v2692_v30 = vld [vmem:[#allocation2 + $0x260] sm:$0xff]  ;;  %v2630_v24 = vld [vmem:[#allocation2 + $0x70] sm:$0xff] }
0x12c2   :  { %3099 = vmatpush.msra.mxu2 %v2625_v61  ;;  %3136 = vmatpush.msra.mxu0 %v2675_v1  ;;  %v2629_v61 = vld [vmem:[#allocation2 + $0x68] sm:$0xff]  ;;  %v2679_v1 = vld [vmem:[#allocation2 + $0x1f8] sm:$0xff] }
0x12c3   :  { %3566 = vmatmul.lmr.bf16.vlgmr.msra.gmra.1.mxu2  ;;  %3076 = vmatpush.msra.mxu1 %v2672_v13  ;;  %v2676_v13 = vld [vmem:[#allocation2 + $0x1e0] sm:$0xff] }
0x12c4   :  { %3599 = vmatmul.lmr.bf16.vlgmr.msra.gmra.1.mxu3  ;;  %3137 = vmatpush.msra.mxu0 %v2659_v18  ;;  %v2663_v18 = vld [vmem:[#allocation2 + $0x178] sm:$0xff] }
0x12c5   :  { %3164 = vmatpush.msra.mxu2 %v2869_v2  ;;  %3184 = vmatpush.msra.mxu3 %v2870_v14  ;;  %v2660_v2 = vld [vmem:[#allocation2 + $0x160] sm:$0xff]  ;;  %v2647_v14 = vld [vmem:[#allocation2 + $0xf8] sm:$0xff] }
0x12c6   :  { %3077 = vmatpush.msra.mxu1 %v2656_v5  ;;  %3138 = vmatpush.msra.mxu0 %v2643_v7  ;;  %v2644_v5 = vld [vmem:[#allocation2 + $0xe0] sm:$0xff]  ;;  %v2631_v7 = vld [vmem:[#allocation2 + $0x78] sm:$0xff] }
0x12c7   :  { %3165 = vmatpush.msra.mxu2 %v2853_v42  ;;  %3185 = vmatpush.msra.mxu3 %v2854_v10  ;;  %v2628_v42 = vld [vmem:[#allocation2 + $0x60] sm:$0xff] }
0x12c8   :  { %3078 = vmatpush.msra.mxu1 %v2640_v31  ;;  %3139 = vmatpush.msra.mxu0 %v2627_v11 }
0x12c9   :  { %3166 = vmatpush.msra.mxu2 %v2837_v62  ;;  %3186 = vmatpush.msra.mxu3 %v2838_v60 }
0x12ca   :  { %3079 = vmatpush.msra.mxu1 %v2624_v48  ;;  %3500 = vmatmul.lmr.bf16.vlgmr.msra.gmra.1.mxu0 }
0x12cb   :  { %3167 = vmatpush.msra.mxu2 %v2821_v58  ;;  %3187 = vmatpush.msra.mxu3 %v2822_v35 }
0x12cc   :  { %3204 = vmatpush.msra.mxu0 %v2871_v39  ;;  %3533 = vmatmul.lmr.bf16.vlgmr.msra.gmra.1.mxu1 }
0x12cd   :  { %3168 = vmatpush.msra.mxu2 %v2805_v22  ;;  %3144 = vmatpush.msra.mxu1 %v2868_v21 }
0x12ce   :  { %3188 = vmatpush.msra.mxu3 %v2806_v46  ;;  %3205 = vmatpush.msra.mxu0 %v2855_v40 }
0x12cf   :  { %3169 = vmatpush.msra.mxu2 %v2789_v0  ;;  %3145 = vmatpush.msra.mxu1 %v2852_v37 }
0x12d0   :  { %3189 = vmatpush.msra.mxu3 %v2790_v29  ;;  %3206 = vmatpush.msra.mxu0 %v2839_v56 }
0x12d1   :  { %3170 = vmatpush.msra.mxu2 %v2773_v63  ;;  %3146 = vmatpush.msra.mxu1 %v2836_v12 }
0x12d2   :  { %3190 = vmatpush.msra.mxu3 %v2774_v38  ;;  %3207 = vmatpush.msra.mxu0 %v2823_v54 }
0x12d3   :  { %3171 = vmatpush.msra.mxu2 %v2757_v44  ;;  %3147 = vmatpush.msra.mxu1 %v2820_v23 }
0x12d4   :  { %3191 = vmatpush.msra.mxu3 %v2758_v53  ;;  %3208 = vmatpush.msra.mxu0 %v2807_v51 }
0x12d5   :  { %3172 = vmatpush.msra.mxu2 %v2741_v34  ;;  %3148 = vmatpush.msra.mxu1 %v2804_v49 }
0x12d6   :  { %3192 = vmatpush.msra.mxu3 %v2742_v16  ;;  %3209 = vmatpush.msra.mxu0 %v2791_v25 }
0x12d7   :  { %3173 = vmatpush.msra.mxu2 %v2725_v32  ;;  %3149 = vmatpush.msra.mxu1 %v2788_v47 }
0x12d8   :  { %3193 = vmatpush.msra.mxu3 %v2726_v36  ;;  %3210 = vmatpush.msra.mxu0 %v2775_v8 }
0x12d9   :  { %3174 = vmatpush.msra.mxu2 %v2709_v45  ;;  %3150 = vmatpush.msra.mxu1 %v2772_v19 }
0x12da   :  { %3194 = vmatpush.msra.mxu3 %v2710_v43  ;;  %3211 = vmatpush.msra.mxu0 %v2759_v3 }
0x12db   :  { %3175 = vmatpush.msra.mxu2 %v2693_v41  ;;  %3151 = vmatpush.msra.mxu1 %v2756_v20 }
0x12dc   :  { %3195 = vmatpush.msra.mxu3 %v2694_v4  ;;  %3212 = vmatpush.msra.mxu0 %v2743_v33 }
0x12dd   :  { %3176 = vmatpush.msra.mxu2 %v2677_v15  ;;  %3152 = vmatpush.msra.mxu1 %v2740_v28 }
0x12de   :  { %3196 = vmatpush.msra.mxu3 %v2678_v6  ;;  %3213 = vmatpush.msra.mxu0 %v2727_v55 }
0x12df   :  { %3177 = vmatpush.msra.mxu2 %v2661_v59  ;;  %3153 = vmatpush.msra.mxu1 %v2724_v17 }
0x12e0   :  { %3197 = vmatpush.msra.mxu3 %v2662_v26  ;;  %3214 = vmatpush.msra.mxu0 %v2711_v52 }
0x12e1   :  { %3178 = vmatpush.msra.mxu2 %v2645_v27  ;;  %3154 = vmatpush.msra.mxu1 %v2708_v9 }
0x12e2   :  { %3198 = vmatpush.msra.mxu3 %v2646_v50  ;;  %3215 = vmatpush.msra.mxu0 %v2695_v57 }
0x12e3   :  { %3179 = vmatpush.msra.mxu2 %v2629_v61  ;;  %3155 = vmatpush.msra.mxu1 %v2692_v30 }
0x12e4   :  { %3199 = vmatpush.msra.mxu3 %v2630_v24  ;;  %3216 = vmatpush.msra.mxu0 %v2679_v1 }
0x12e5   :  { %3567 = vmatmul.lmr.bf16.vlgmr.msra.gmra.1.mxu2  ;;  %3600 = vmatmul.lmr.bf16.vlgmr.msra.gmra.1.mxu3 }
0x12e6   :  { %3156 = vmatpush.msra.mxu1 %v2676_v13  ;;  %3217 = vmatpush.msra.mxu0 %v2663_v18 }
0x12e8   :  { %3157 = vmatpush.msra.mxu1 %v2660_v2  ;;  %3218 = vmatpush.msra.mxu0 %v2647_v14 }
0x12ea   :  { %3158 = vmatpush.msra.mxu1 %v2644_v5  ;;  %3219 = vmatpush.msra.mxu0 %v2631_v7 }
0x12eb   :  { %3501 = vmatmul.lmr.bf16.vlgmr.msra.gmra.1.mxu0 }
0x12ec   :  { %3159 = vmatpush.msra.mxu1 %v2628_v42 }
0x12ed   :  { %3534 = vmatmul.lmr.bf16.vlgmr.msra.gmra.1.mxu1 }
0x1302   :  { %v2981_v10 = vpop.f32.mrf.mxu0  ;;  %v2921_v62 = vpop.f32.mrf.mxu1 }
0x1303   :  { %v3242_v11 = vrot.slane %v2981_v10, 2 }
0x1304   :  { %v2961_v48 = vpop.f32.mrf.mxu3 }
0x1305   :  { %v3241_v58 = vrot.slane %v2961_v48, 4 }
0x1306   :  { %v2941_v31 = vpop.f32.mrf.mxu2 }
0x1307   :  { %v3240_v60 = vrot.slane %v2941_v31, 6  ;;  %v3254_v39 = vsel %vm3253_vm9, %v3241_v58, %v3242_v11 }
0x1309   :  { %v3252_v35 = vsel %vm1860_vm7, %v2921_v62, %v3240_v60 }
0x130a   :  { %v3256_v22 = vsel %vm3255_vm10, %v3252_v35, %v3254_v39 }
0x130b   :  { %3270 = vst [vmem:[%s5215_s5] sm:$0xff] %v3256_v22 }
0x1325   :  { %v3041_v40 = vpop.f32.mrf.mxu3  ;;  %v3061_v0 = vpop.f32.mrf.mxu0 }
0x1326   :  { %v3021_v21 = vpop.f32.mrf.mxu2  ;;  %v3244_v37 = vrot.slane %v3041_v40, 4  ;;  %v3245_v29 = vrot.slane %v3061_v0, 2 }
0x1327   :  { %v3243_v46 = vrot.slane %v3021_v21, 6  ;;  %v3001_v56 = vpop.f32.mrf.mxu1 }
0x1328   :  { %v3258_v63 = vsel %vm3253_vm9, %v3244_v37, %v3245_v29 }
0x1329   :  { %v3257_v12 = vsel %vm1860_vm7, %v3001_v56, %v3243_v46 }
0x132a   :  { %v3259_v38 = vsel %vm3255_vm10, %v3257_v12, %v3258_v63 }
0x132b   :  { %3271 = vst [vmem:[%s5215_s5 + $0x8] sm:$0xff] %v3259_v38 }
0x1346   :  { %v3101_v54 = vpop.f32.mrf.mxu2 }
0x1347   :  { %v3246_v44 = vrot.slane %v3101_v54, 6  ;;  %v3121_v23 = vpop.f32.mrf.mxu3  ;;  %v3141_v51 = vpop.f32.mrf.mxu0 }
0x1348   :  { %v3247_v53 = vrot.slane %v3121_v23, 4  ;;  %v3248_v34 = vrot.slane %v3141_v51, 2 }
0x1349   :  { %v3081_v49 = vpop.f32.mrf.mxu1 }
0x134a   :  { %v3261_v16 = vsel %vm3253_vm9, %v3247_v53, %v3248_v34  ;;  %v3260_v25 = vsel %vm1860_vm7, %v3081_v49, %v3246_v44 }
0x134b   :  { %v3262_v32 = vsel %vm3255_vm10, %v3260_v25, %v3261_v16 }
0x134c   :  { %3272 = vst [vmem:[%s5215_s5 + $0x10] sm:$0xff] %v3262_v32 }
0x1368   :  { %v3181_v47 = vpop.f32.mrf.mxu2  ;;  %v3201_v8 = vpop.f32.mrf.mxu3 }
0x1369   :  { %v3249_v36 = vrot.slane %v3181_v47, 6  ;;  %v3221_v45 = vpop.f32.mrf.mxu0  ;;  %v3250_v19 = vrot.slane %v3201_v8, 4 }
0x136a   :  { %v3251_v43 = vrot.slane %v3221_v45, 2  ;;  %v3161_v3 = vpop.f32.mrf.mxu1 }
0x136b   :  { %v3263_v41 = vsel %vm1860_vm7, %v3161_v3, %v3249_v36 }
0x136c   :  { %v3264_v20 = vsel %vm3253_vm9, %v3250_v19, %v3251_v43 }
0x136d   :  { %v3265_v4 = vsel %vm3255_vm10, %v3263_v41, %v3264_v20 }
0x136e   :  { %3273 = vst [vmem:[%s5215_s5 + $0x18] sm:$0xff] %v3265_v4 }
0x136f   :  { %3278 = vsyncpa [#allocation3], 1 }

</bundles_post_ra>
